<compile_context>
chip_gen: v5e
topology: v5e:2x2
jax: 0.10.0
libtpu: 0.0.40
codegen_flags: <defaults>
</compile_context>

<pallas_src>
import jax
import jax.numpy as jnp
import numpy as np
from jax import lax
from jax.experimental import pallas as pl
from jax.experimental.pallas import tpu as pltpu

SEQ_LEN = 227
FEATURE = 227 * 3      # 681
HIDDEN = 128
N_CLASS = 2

T_CHUNK = 32                                        # timesteps per grid iteration
SEQ_PAD = -(-SEQ_LEN // T_CHUNK) * T_CHUNK          # 256
M_TILE = 128                                        # row tile for the input projection


# ---------------------------------------------------------------------------
# Kernel 1: batched input projection  gates_x = x @ W_ih^T + b   (parallel grid)
# ---------------------------------------------------------------------------
def proj_kernel(x_ref, w_ih_ref, b_ref, gx_ref):
    gx_ref[...] = (jnp.dot(x_ref[...], w_ih_ref[...],
                           preferred_element_type=jnp.float32)
                   + b_ref[...])


# ---------------------------------------------------------------------------
# Kernel 2: chunked LSTM recurrence + fused final FC   (sequential grid)
# ---------------------------------------------------------------------------
def lstm_rec_kernel(gx_ref, w_hh_ref, w_fc_ref, b_fc_ref, out_ref, h_scr, c_scr):
    chunk = pl.program_id(0)

    @pl.when(chunk == 0)
    def _init():
        h_scr[...] = jnp.zeros_like(h_scr)
        c_scr[...] = jnp.zeros_like(c_scr)

    h = h_scr[...]                       # (B, H) f32
    c = c_scr[...]                       # (B, H) f32
    w_hh = w_hh_ref[...]                 # (H, 4H), loaded once per chunk
    t0 = chunk * T_CHUNK
    H = HIDDEN

    # Static unroll of the chunk: only the (B,H)x(H,4H) recurrent matmul + gating
    # remain on the serial critical path.  gates[:, k*H:(k+1)*H] slices are
    # lane-aligned (128) and free; B stays on the sublane axis.
    for i in range(T_CHUNK):
        gates = gx_ref[i] + jnp.dot(h, w_hh, preferred_element_type=jnp.float32)
        i_g = jax.nn.sigmoid(gates[:, 0 * H:1 * H])
        f_g = jax.nn.sigmoid(gates[:, 1 * H:2 * H])
        g_g = jnp.tanh(gates[:, 2 * H:3 * H])
        o_g = jax.nn.sigmoid(gates[:, 3 * H:4 * H])
        c_new = f_g * c + i_g * g_g
        h_new = o_g * jnp.tanh(c_new)
        valid = (t0 + i) < SEQ_LEN       # mask zero-padded tail timesteps
        h = jnp.where(valid, h_new, h)
        c = jnp.where(valid, c_new, c)

    h_scr[...] = h
    c_scr[...] = c

    @pl.when(chunk == pl.num_programs(0) - 1)
    def _finalize():
        out_ref[...] = (jnp.dot(h, w_fc_ref[...],
                                preferred_element_type=jnp.float32)
                        + b_fc_ref[...]).astype(out_ref.dtype)


# ---------------------------------------------------------------------------
# Wrapper
# ---------------------------------------------------------------------------
def lstm_forward(x, params):
    """x: (B, 3, 227, 227) float32 -> logits (B, N_CLASS)."""
    B = x.shape[0]
    w_ih, w_hh, b, w_fc, b_fc = params

    # Same data movement as torch: view(B, 681, 227) then permute(2, 0, 1) -> (S, B, F)
    x_sbf = x.reshape(B, FEATURE, SEQ_LEN).transpose(2, 0, 1)
    x_pad = jnp.pad(x_sbf, ((0, SEQ_PAD - SEQ_LEN), (0, 0), (0, 0)))
    x2 = x_pad.reshape(SEQ_PAD * B, FEATURE)

    rows = SEQ_PAD * B
    assert rows % M_TILE == 0  # SEQ_PAD=256 is a multiple of 128, so always true

    # -- hoisted input projection: one big (rows, F) x (F, 4H) matmul, parallel grid --
    gx2 = pl.pallas_call(
        proj_kernel,
        out_shape=jax.ShapeDtypeStruct((rows, 4 * HIDDEN), jnp.float32),
        grid_spec=pltpu.PrefetchScalarGridSpec(
            num_scalar_prefetch=0,
            grid=(rows // M_TILE,),
            in_specs=[
                pl.BlockSpec((M_TILE, FEATURE), lambda m: (m, 0)),       # x rows
                pl.BlockSpec((FEATURE, 4 * HIDDEN), lambda m: (0, 0)),   # W_ih^T
                pl.BlockSpec((1, 4 * HIDDEN), lambda m: (0, 0)),         # b_ih+b_hh
            ],
            out_specs=pl.BlockSpec((M_TILE, 4 * HIDDEN), lambda m: (m, 0)),
        ),
        compiler_params=pltpu.CompilerParams(
            dimension_semantics=("parallel",)),
    )(x2, w_ih, b)

    gates_x = gx2.reshape(SEQ_PAD, B, 4 * HIDDEN)                        # (S_pad, B, 4H)

    # -- sequential recurrence over time, T_CHUNK steps per grid iteration --
    out = pl.pallas_call(
        lstm_rec_kernel,
        out_shape=jax.ShapeDtypeStruct((B, N_CLASS), jnp.float32),
        grid_spec=pltpu.PrefetchScalarGridSpec(
            num_scalar_prefetch=0,
            grid=(SEQ_PAD // T_CHUNK,),
            in_specs=[
                pl.BlockSpec((T_CHUNK, B, 4 * HIDDEN), lambda c: (c, 0, 0)),  # gates_x
                pl.BlockSpec((HIDDEN, 4 * HIDDEN), lambda c: (0, 0)),         # W_hh^T
                pl.BlockSpec((HIDDEN, N_CLASS), lambda c: (0, 0)),            # W_fc^T
                pl.BlockSpec((1, N_CLASS), lambda c: (0, 0)),                 # b_fc
            ],
            out_specs=pl.BlockSpec((B, N_CLASS), lambda c: (0, 0)),
            scratch_shapes=[pltpu.VMEM((B, HIDDEN), jnp.float32),             # h
                            pltpu.VMEM((B, HIDDEN), jnp.float32)],            # c
        ),
        compiler_params=pltpu.CompilerParams(
            dimension_semantics=("arbitrary",)),   # recurrence: sequential grid
    )(gates_x, w_hh, w_fc, b_fc)
    return out


# ---------------------------------------------------------------------------
# Pure-JAX reference (matches torch.nn.LSTM + Linear semantics)
# ---------------------------------------------------------------------------
def lstm_reference(x, params):
    B = x.shape[0]
    x_sbf = x.reshape(B, FEATURE, SEQ_LEN).transpose(2, 0, 1)
    w_ih, w_hh, b, w_fc, b_fc = params

    def step(carry, x_s):
        h, c = carry
        gates = x_s @ w_ih + h @ w_hh + b
        H = HIDDEN
        i = jax.nn.sigmoid(gates[:, 0 * H:1 * H])
        f = jax.nn.sigmoid(gates[:, 1 * H:2 * H])
        g = jnp.tanh(gates[:, 2 * H:3 * H])
        o = jax.nn.sigmoid(gates[:, 3 * H:4 * H])
        c = f * c + i * g
        h = o * jnp.tanh(c)
        return (h, c), None

    init = (jnp.zeros((B, HIDDEN), jnp.float32),
            jnp.zeros((B, HIDDEN), jnp.float32))
    (h_n, _), _ = lax.scan(step, init, x_sbf)
    return h_n @ w_fc + b_fc


def init_params(key):
    """Deterministic init mirroring PyTorch shapes (LSTM weights stored transposed)."""
    k1, k2, k3, k4, k5, k6 = jax.random.split(key, 6)
    bound = 1.0 / float(np.sqrt(HIDDEN))
    w_ih = jax.random.uniform(k1, (FEATURE, 4 * HIDDEN), jnp.float32, -bound, bound)
    w_hh = jax.random.uniform(k2, (HIDDEN, 4 * HIDDEN), jnp.float32, -bound, bound)
    b_ih = jax.random.uniform(k3, (1, 4 * HIDDEN), jnp.float32, -bound, bound)
    b_hh = jax.random.uniform(k4, (1, 4 * HIDDEN), jnp.float32, -bound, bound)
    b = b_ih + b_hh                      # bias folded once into the projection
    w_fc = jax.random.uniform(k5, (HIDDEN, N_CLASS), jnp.float32, -bound, bound)
    b_fc = jax.random.uniform(k6, (1, N_CLASS), jnp.float32, -bound, bound)
    return (w_ih, w_hh, b, w_fc, b_fc)


if __name__ == "__main__":
    key = jax.random.PRNGKey(0)
    k_x, k_p = jax.random.split(key)
    B = 2
    x = jax.random.normal(k_x, (B, 3, SEQ_LEN, SEQ_LEN), dtype=jnp.float32)
    params = init_params(k_p)

    out = jax.block_until_ready(lstm_forward(x, params))
    assert out.shape == (B, N_CLASS), out.shape

    ref = jax.block_until_ready(lstm_reference(x, params))
    np.testing.assert_allclose(np.asarray(out), np.asarray(ref),
                               atol=1e-2, rtol=1e-2)
    print("KERNEL_OK")
</pallas_src>

<mosaic_0001>
module attributes {stable_mosaic.version = 11 : i64} {
  func.func @proj_kernel(%arg0: i32, %arg1: memref<128x681xf32, #tpu.memory_space<vmem>>, %arg2: memref<681x512xf32, #tpu.memory_space<vmem>>, %arg3: memref<1x512xf32, #tpu.memory_space<vmem>>, %arg4: memref<128x512xf32, #tpu.memory_space<vmem>>) attributes {dimension_semantics = [#tpu.dimension_semantics<parallel>], iteration_bounds = array<i64: 4>, scalar_prefetch = 0 : i64, scratch_operands = 0 : i64, tpu.core_type = #tpu.core_type<tc>, window_params = [{transform_indices = @transform_0, window_bounds = array<i64: 128, 681>}, {pipeline_mode = #tpu.pipeline_mode<synchronous>, transform_indices = @transform_1, window_bounds = array<i64: 681, 512>}, {pipeline_mode = #tpu.pipeline_mode<synchronous>, transform_indices = @transform_2, window_bounds = array<i64: 1, 512>}, {transform_indices = @transform_3, window_bounds = array<i64: 128, 512>}]} {
    %c0 = arith.constant 0 : index
    %c0_0 = arith.constant 0 : index
    %0 = vector.load %arg1[%c0, %c0_0] : memref<128x681xf32, #tpu.memory_space<vmem>>, vector<128x681xf32>
    %c0_1 = arith.constant 0 : index
    %c0_2 = arith.constant 0 : index
    %1 = vector.load %arg2[%c0_1, %c0_2] : memref<681x512xf32, #tpu.memory_space<vmem>>, vector<681x512xf32>
    %cst = arith.constant dense<0.000000e+00> : vector<128x512xf32>
    %2 = tpu.matmul %0, %1, %cst {dimension_numbers = #tpu.dot_dimension_numbers<[1], [0], [0], [1], [0, 0, 1, 1], [], []>} : vector<128x681xf32>, vector<681x512xf32>, vector<128x512xf32> -> vector<128x512xf32>
    %c0_3 = arith.constant 0 : index
    %c0_4 = arith.constant 0 : index
    %3 = vector.load %arg3[%c0_3, %c0_4] : memref<1x512xf32, #tpu.memory_space<vmem>>, vector<1x512xf32>
    %4 = vector.broadcast %3 : vector<1x512xf32> to vector<128x512xf32>
    %5 = arith.addf %2, %4 : vector<128x512xf32>
    %c0_5 = arith.constant 0 : index
    %c0_6 = arith.constant 0 : index
    %6 = vector.load %arg4[%c0_5, %c0_6] : memref<128x512xf32, #tpu.memory_space<vmem>>, vector<128x512xf32>
    tpu.vector_store %arg4[%c0_5, %c0_6], %5 {strides = array<i32>} : memref<128x512xf32, #tpu.memory_space<vmem>>, vector<128x512xf32>,
    return
  }
  func.func @transform_0(%arg0: i32) -> (i32, i32) {
    %c0_i32 = arith.constant 0 : i32
    %c0_i32_0 = arith.constant 0 : i32
    return %arg0, %c0_i32 : i32, i32
  }
  func.func @transform_1(%arg0: i32) -> (i32, i32) {
    %c0_i32 = arith.constant 0 : i32
    %c0_i32_0 = arith.constant 0 : i32
    %c0_i32_1 = arith.constant 0 : i32
    return %c0_i32, %c0_i32_0 : i32, i32
  }
  func.func @transform_2(%arg0: i32) -> (i32, i32) {
    %c0_i32 = arith.constant 0 : i32
    %c0_i32_0 = arith.constant 0 : i32
    %c0_i32_1 = arith.constant 0 : i32
    return %c0_i32, %c0_i32_0 : i32, i32
  }
  func.func @transform_3(%arg0: i32) -> (i32, i32) {
    %c0_i32 = arith.constant 0 : i32
    %c0_i32_0 = arith.constant 0 : i32
    return %arg0, %c0_i32 : i32, i32
  }
}

</mosaic_0001>

<bundles_post_ra>
// kernel: tpu_custom_call.1
= control target key start
LH: loop header
LB: loop body
LE: loop exit
PB: predicated region body
PF: predicated region fallthrough
CT: control target
= control target key end

     0   :  { %8 = vsyncpa [#allocation3], 0  ;;  %s5142_s0 = inlined_call_operand.vmem [shape: f32[512,681], index: 0, kind: input, shape index: {}]   ;;  %s5143_s1 = inlined_call_operand.vmem [shape: f32[681,512], index: 1, kind: input, shape index: {}]   ;;  %s5144_s2 = inlined_call_operand.vmem [shape: f32[1,512], index: 2, kind: input, shape index: {}]   ;;  %s5145_s3 = inlined_call_operand.hbm [shape: f32[512,512], index: 3, kind: output, shape index: {}]  }
   0x1   :  { %10 = vsyncpa [#allocation3 + $0x1], 0  ;;  %s2730_s12 = smov 0   ;;  %s2732_s13 = smov 0  }
   0x2   :  { %s2734_s14 = smov 0   ;;  %s2736_s15 = smov 0  }
   0x3 LB: > { %s2751_s16 = sadd.s32 4294967295, %s2706_s15   ;;  %s2390_s17 = sadd.s32 4294967294, %s2706_s15   ;;  %s2706_s15 = sphi %s2736_s15, %s5152_s15   ;;  %s2702_s14 = sphi %s2734_s14, %s5151_s14   ;;  %s2698_s13 = sphi %s2732_s13, %s5150_s13   ;;  %s2694_s12 = sphi %s2730_s12, %s5149_s12  }
   0x4   : > { %s2755_s18 = sadd.s32 1, %s2706_s15   ;;  %s91_s19 = sadd.s32 1, %s2702_s14 }
   0x5   : > { %s88_s20 = ssub.s32 %s2706_s15, %s2755_s18  ;;  %p101_p0 = scmp.ne.s32.totalorder %s2702_s14, %s2698_s13 }
   0x6   : > { %p89_p1 = scmp.eq.s32.totalorder %s88_s20, 0  ;;  %p102_p2 = scmp.eq.s32.totalorder %s2751_s16, 3 }
   0x7   : > { %p107_p3 = scmp.ne.s32.totalorder %s2698_s13, %s2694_s12  ;;  %p108_p4 = scmp.eq.s32.totalorder %s2390_s17, 3 }
   0x8   : > { %s2766_s21 = scalar_select %p89_p1, %s2702_s14, %s91_s19  }
   0x9   : > { %p2768_p5 = por %p102_p2, %p101_p0  ;;  %p2772_p6 = por %p108_p4, %p107_p3 }
   0xa   : > { %p2393_p7 = scmp.ge.s32.totalorder %s2706_s15, 1  ;;  %p142_p8 = scmp.lt.s32.totalorder %s2706_s15, 5 }
   0xc   : > { %p143_p9 = pnand %p2393_p7, %p142_p8 }
   0xd   : > { %s2395_s26 = sshll.u32 (!%p143_p9), %s2751_s16, 4  ;;  %s164_s19 = sand.u32 (!%p143_p9), 1, %s2698_s13  }
   0xe   : > { %146 = sbr.rel (%p143_p9) target bundleno = 983 (0x3d7), region = 32  ;;  %p2883_p10 = scmp.lt.s32.totalorder (!%p143_p9), %s2395_s26, 63 }
   0xf   : > { %s2664_s27 = scalar_lea.hbm (!%p143_p9), %s5145_s3, 2048 }
  0x13   : > { %v331_v0 = vld [vmem:[%s5143_s1 + $0x1e0] sm:$0xff]  ;;  %s5154_s26 = smov (!%p2883_p10, %s2395_s26), 63  ;;  %vm674_vm0 = vcmask 1040384   ;;  %vm625_vm1 = vcmask 334848  }
  0x14   : > { %v459_v1 = vld [vmem:[%s5143_s1 + $0x5e0] sm:$0xff]  ;;  %687 = vmatpush.msra.mxu0 %v331_v0  ;;  %s2473_s11 = smul.u32 48, %s5154_s26  ;;  %v332_v0 = vld [vmem:[%s5143_s1 + $0x1e8] sm:$0xff] }
  0x15   : > { %v327_v2 = vld [vmem:[%s5143_s1 + $0x1c0] sm:$0xff]  ;;  %817 = vmatpush.msra.mxu2 %v459_v1 }
  0x16   : > { %v395_v3 = vld [vmem:[%s5143_s1 + $0x3e0] sm:$0xff]  ;;  %688 = vmatpush.msra.mxu0 %v327_v2  ;;  %s2969_s20 = scalar_lea.vmem %s5142_s0, %s2473_s11  ;;  %s2394_s11 = sshll.u32 %s164_s19, 9 }
  0x17   : > { %v455_v4 = vld [vmem:[%s5143_s1 + $0x5c0] sm:$0xff]  ;;  %752 = vmatpush.msra.mxu1 %v395_v3  ;;  %v177_v63 = vld [vmem:[%s2969_s20 + $0x10] sm:$0xff]  ;;  %v2997_v3 = vld [vmem:[%s2969_s20 + $0x8] sm:$0xff]  ;;  %s3767_s4 = scalar_lea.vmem [#allocation2], %s2394_s11 }
  0x18   : > { %v523_v5 = vld [vmem:[%s5143_s1 + $0x7e0] sm:$0xff]  ;;  %818 = vmatpush.msra.mxu2 %v455_v4  ;;  %v178_v4 = vld [vmem:[%s2969_s20 + $0x18] sm:$0xff]  ;;  %s2325_s7 = sshll.u32 %s3767_s4, 4  ;;  %s2326_s7 = int_to_ptr.vmem [resolvable:$true] %s2325_s7 }
  0x19   : > { %882 = vmatpush.msra.mxu3 %v523_v5  ;;  %v323_v6 = vld [vmem:[%s5143_s1 + $0x1a0] sm:$0xff] }
  0x1a   : > { %v391_v7 = vld [vmem:[%s5143_s1 + $0x3c0] sm:$0xff]  ;;  %689 = vmatpush.msra.mxu0 %v323_v6  ;;  %v396_v6 = vld [vmem:[%s5143_s1 + $0x3e8] sm:$0xff] }
  0x1b   : > { %v451_v8 = vld [vmem:[%s5143_s1 + $0x5a0] sm:$0xff]  ;;  %753 = vmatpush.msra.mxu1 %v391_v7 }
  0x1c   : > { %v519_v9 = vld [vmem:[%s5143_s1 + $0x7c0] sm:$0xff]  ;;  %819 = vmatpush.msra.mxu2 %v451_v8  ;;  %v328_v8 = vld [vmem:[%s5143_s1 + $0x1c8] sm:$0xff] }
  0x1d   : > { %v387_v10 = vld [vmem:[%s5143_s1 + $0x3a0] sm:$0xff]  ;;  %883 = vmatpush.msra.mxu3 %v519_v9 }
  0x1e   : > { %v319_v11 = vld [vmem:[%s5143_s1 + $0x180] sm:$0xff]  ;;  %754 = vmatpush.msra.mxu1 %v387_v10  ;;  %v392_v10 = vld [vmem:[%s5143_s1 + $0x3c8] sm:$0xff] }
  0x1f   : > { %v447_v12 = vld [vmem:[%s5143_s1 + $0x580] sm:$0xff]  ;;  %690 = vmatpush.msra.mxu0 %v319_v11 }
  0x20   : > { %v515_v13 = vld [vmem:[%s5143_s1 + $0x7a0] sm:$0xff]  ;;  %820 = vmatpush.msra.mxu2 %v447_v12  ;;  %v324_v12 = vld [vmem:[%s5143_s1 + $0x1a8] sm:$0xff] }
  0x21   : > { %v383_v14 = vld [vmem:[%s5143_s1 + $0x380] sm:$0xff]  ;;  %884 = vmatpush.msra.mxu3 %v515_v13 }
  0x22   : > { %v511_v15 = vld [vmem:[%s5143_s1 + $0x780] sm:$0xff]  ;;  %755 = vmatpush.msra.mxu1 %v383_v14  ;;  %v3031_v14 = vld [vmem:[%s2969_s20 + $0x30] sm:$0xff] }
  0x23   : > { %v315_v16 = vld [vmem:[%s5143_s1 + $0x160] sm:$0xff]  ;;  %885 = vmatpush.msra.mxu3 %v511_v15 }
  0x24   : > { %v443_v17 = vld [vmem:[%s5143_s1 + $0x560] sm:$0xff]  ;;  %691 = vmatpush.msra.mxu0 %v315_v16  ;;  %v388_v16 = vld [vmem:[%s5143_s1 + $0x3a8] sm:$0xff] }
  0x25   : > { %v379_v18 = vld [vmem:[%s5143_s1 + $0x360] sm:$0xff]  ;;  %821 = vmatpush.msra.mxu2 %v443_v17  ;;  %v320_v17 = vld [vmem:[%s5143_s1 + $0x188] sm:$0xff] }
  0x26   : > { %v507_v19 = vld [vmem:[%s5143_s1 + $0x760] sm:$0xff]  ;;  %756 = vmatpush.msra.mxu1 %v379_v18  ;;  %v3041_v18 = vld [vmem:[%s2969_s20 + $0x38] sm:$0xff] }
  0x27   : > { %v311_v20 = vld [vmem:[%s5143_s1 + $0x140] sm:$0xff]  ;;  %886 = vmatpush.msra.mxu3 %v507_v19 }
  0x28   : > { %v439_v21 = vld [vmem:[%s5143_s1 + $0x540] sm:$0xff]  ;;  %692 = vmatpush.msra.mxu0 %v311_v20  ;;  %v184_v20 = vld [vmem:[%s2969_s20 + $0x48] sm:$0xff] }
  0x29   : > { %v375_v22 = vld [vmem:[%s5143_s1 + $0x340] sm:$0xff]  ;;  %822 = vmatpush.msra.mxu2 %v439_v21  ;;  %v316_v21 = vld [vmem:[%s5143_s1 + $0x168] sm:$0xff] }
  0x2a   : > { %v503_v23 = vld [vmem:[%s5143_s1 + $0x740] sm:$0xff]  ;;  %757 = vmatpush.msra.mxu1 %v375_v22  ;;  %v384_v22 = vld [vmem:[%s5143_s1 + $0x388] sm:$0xff] }
  0x2b   : > { %v307_v24 = vld [vmem:[%s5143_s1 + $0x120] sm:$0xff]  ;;  %887 = vmatpush.msra.mxu3 %v503_v23 }
  0x2c   : > { %v435_v25 = vld [vmem:[%s5143_s1 + $0x520] sm:$0xff]  ;;  %693 = vmatpush.msra.mxu0 %v307_v24  ;;  %v312_v24 = vld [vmem:[%s5143_s1 + $0x148] sm:$0xff] }
  0x2d   : > { %v371_v26 = vld [vmem:[%s5143_s1 + $0x320] sm:$0xff]  ;;  %823 = vmatpush.msra.mxu2 %v435_v25  ;;  %v380_v25 = vld [vmem:[%s5143_s1 + $0x368] sm:$0xff] }
  0x2e   : > { %v499_v27 = vld [vmem:[%s5143_s1 + $0x720] sm:$0xff]  ;;  %758 = vmatpush.msra.mxu1 %v371_v26 }
  0x2f   : > { %v303_v28 = vld [vmem:[%s5143_s1 + $0x100] sm:$0xff]  ;;  %888 = vmatpush.msra.mxu3 %v499_v27 }
  0x30   : > { %v431_v29 = vld [vmem:[%s5143_s1 + $0x500] sm:$0xff]  ;;  %694 = vmatpush.msra.mxu0 %v303_v28 }
  0x31   : > { %v367_v30 = vld [vmem:[%s5143_s1 + $0x300] sm:$0xff]  ;;  %824 = vmatpush.msra.mxu2 %v431_v29  ;;  %v189_v29 = vld [vmem:[%s2969_s20 + $0x70] sm:$0xff] }
  0x32   : > { %v495_v31 = vld [vmem:[%s5143_s1 + $0x700] sm:$0xff]  ;;  %759 = vmatpush.msra.mxu1 %v367_v30  ;;  %v376_v30 = vld [vmem:[%s5143_s1 + $0x348] sm:$0xff] }
  0x33   : > { %v299_v32 = vld [vmem:[%s5143_s1 + $0xe0] sm:$0xff]  ;;  %889 = vmatpush.msra.mxu3 %v495_v31  ;;  %v3078_v31 = vld [vmem:[%s2969_s20 + $0x68] sm:$0xff] }
  0x34   : > { %v427_v33 = vld [vmem:[%s5143_s1 + $0x4e0] sm:$0xff]  ;;  %695 = vmatpush.msra.mxu0 %v299_v32  ;;  %v190_v32 = vld [vmem:[%s2969_s20 + $0x78] sm:$0xff] }
  0x35   : > { %v363_v34 = vld [vmem:[%s5143_s1 + $0x2e0] sm:$0xff]  ;;  %825 = vmatpush.msra.mxu2 %v427_v33  ;;  %v308_v33 = vld [vmem:[%s5143_s1 + $0x128] sm:$0xff] }
  0x36   : > { %v491_v35 = vld [vmem:[%s5143_s1 + $0x6e0] sm:$0xff]  ;;  %760 = vmatpush.msra.mxu1 %v363_v34 }
  0x37   : > { %v295_v36 = vld [vmem:[%s5143_s1 + $0xc0] sm:$0xff]  ;;  %890 = vmatpush.msra.mxu3 %v491_v35  ;;  %v372_v35 = vld [vmem:[%s5143_s1 + $0x328] sm:$0xff] }
  0x38   : > { %v423_v37 = vld [vmem:[%s5143_s1 + $0x4c0] sm:$0xff]  ;;  %696 = vmatpush.msra.mxu0 %v295_v36  ;;  %v3093_v36 = vld [vmem:[%s2969_s20 + $0x90] sm:$0xff] }
  0x39   : > { %v359_v38 = vld [vmem:[%s5143_s1 + $0x2c0] sm:$0xff]  ;;  %826 = vmatpush.msra.mxu2 %v423_v37 }
  0x3a   : > { %v487_v39 = vld [vmem:[%s5143_s1 + $0x6c0] sm:$0xff]  ;;  %761 = vmatpush.msra.mxu1 %v359_v38  ;;  %v3097_v38 = vld [vmem:[%s2969_s20 + $0x98] sm:$0xff] }
  0x3b   : > { %v291_v40 = vld [vmem:[%s5143_s1 + $0xa0] sm:$0xff]  ;;  %891 = vmatpush.msra.mxu3 %v487_v39  ;;  %v196_v39 = vld [vmem:[%s2969_s20 + $0xa8] sm:$0xff] }
  0x3c   : > { %v419_v41 = vld [vmem:[%s5143_s1 + $0x4a0] sm:$0xff]  ;;  %697 = vmatpush.msra.mxu0 %v291_v40  ;;  %v304_v40 = vld [vmem:[%s5143_s1 + $0x108] sm:$0xff] }
  0x3d   : > { %v355_v42 = vld [vmem:[%s5143_s1 + $0x2a0] sm:$0xff]  ;;  %827 = vmatpush.msra.mxu2 %v419_v41 }
  0x3e   : > { %v483_v43 = vld [vmem:[%s5143_s1 + $0x6a0] sm:$0xff]  ;;  %762 = vmatpush.msra.mxu1 %v355_v42  ;;  %v368_v42 = vld [vmem:[%s5143_s1 + $0x308] sm:$0xff] }
  0x3f   : > { %v287_v44 = vld [vmem:[%s5143_s1 + $0x80] sm:$0xff]  ;;  %892 = vmatpush.msra.mxu3 %v483_v43 }
  0x40   : > { %v415_v45 = vld [vmem:[%s5143_s1 + $0x480] sm:$0xff]  ;;  %698 = vmatpush.msra.mxu0 %v287_v44  ;;  %v201_v44 = vld [vmem:[%s2969_s20 + $0xd0] sm:$0xff] }
  0x41   : > { %v351_v46 = vld [vmem:[%s5143_s1 + $0x280] sm:$0xff]  ;;  %828 = vmatpush.msra.mxu2 %v415_v45  ;;  %v3116_v45 = vld [vmem:[%s2969_s20 + $0xc8] sm:$0xff] }
  0x42   : > { %v479_v47 = vld [vmem:[%s5143_s1 + $0x680] sm:$0xff]  ;;  %763 = vmatpush.msra.mxu1 %v351_v46  ;;  %v202_v46 = vld [vmem:[%s2969_s20 + $0xd8] sm:$0xff] }
  0x43   : > { %v283_v48 = vld [vmem:[%s5143_s1 + $0x60] sm:$0xff]  ;;  %893 = vmatpush.msra.mxu3 %v479_v47  ;;  %v300_v47 = vld [vmem:[%s5143_s1 + $0xe8] sm:$0xff] }
  0x44   : > { %v411_v49 = vld [vmem:[%s5143_s1 + $0x460] sm:$0xff]  ;;  %699 = vmatpush.msra.mxu0 %v283_v48 }
  0x45   : > { %v347_v50 = vld [vmem:[%s5143_s1 + $0x260] sm:$0xff]  ;;  %829 = vmatpush.msra.mxu2 %v411_v49  ;;  %v364_v49 = vld [vmem:[%s5143_s1 + $0x2e8] sm:$0xff] }
  0x46   : > { %v475_v51 = vld [vmem:[%s5143_s1 + $0x660] sm:$0xff]  ;;  %764 = vmatpush.msra.mxu1 %v347_v50 }
  0x47   : > { %v279_v52 = vld [vmem:[%s5143_s1 + $0x40] sm:$0xff]  ;;  %894 = vmatpush.msra.mxu3 %v475_v51  ;;  %v3134_v51 = vld [vmem:[%s2969_s20 + $0xf0] sm:$0xff] }
  0x48   : > { %v407_v53 = vld [vmem:[%s5143_s1 + $0x440] sm:$0xff]  ;;  %700 = vmatpush.msra.mxu0 %v279_v52 }
  0x49   : > { %v343_v54 = vld [vmem:[%s5143_s1 + $0x240] sm:$0xff]  ;;  %830 = vmatpush.msra.mxu2 %v407_v53  ;;  %v3138_v53 = vld [vmem:[%s2969_s20 + $0xf8] sm:$0xff] }
  0x4a   : > { %v471_v55 = vld [vmem:[%s5143_s1 + $0x640] sm:$0xff]  ;;  %765 = vmatpush.msra.mxu1 %v343_v54  ;;  %v208_v54 = vld [vmem:[%s2969_s20 + $0x108] sm:$0xff] }
  0x4b   : > { %v275_v56 = vld [vmem:[%s5143_s1 + $0x20] sm:$0xff]  ;;  %895 = vmatpush.msra.mxu3 %v471_v55  ;;  %v296_v55 = vld [vmem:[%s5143_s1 + $0xc8] sm:$0xff] }
  0x4c   : > { %v403_v57 = vld [vmem:[%s5143_s1 + $0x420] sm:$0xff]  ;;  %701 = vmatpush.msra.mxu0 %v275_v56 }
  0x4d   : > { %v339_v58 = vld [vmem:[%s5143_s1 + $0x220] sm:$0xff]  ;;  %831 = vmatpush.msra.mxu2 %v403_v57  ;;  %v360_v57 = vld [vmem:[%s5143_s1 + $0x2c8] sm:$0xff] }
  0x4e   : > { %v467_v59 = vld [vmem:[%s5143_s1 + $0x620] sm:$0xff]  ;;  %766 = vmatpush.msra.mxu1 %v339_v58 }
  0x4f   : > { %v271_v60 = vld [vmem:[%s5143_s1] sm:$0xff]  ;;  %896 = vmatpush.msra.mxu3 %v467_v59  ;;  %v213_v59 = vld [vmem:[%s2969_s20 + $0x130] sm:$0xff] }
  0x50   : > { %v399_v61 = vld [vmem:[%s5143_s1 + $0x400] sm:$0xff]  ;;  %702 = vmatpush.msra.mxu0 %v271_v60  ;;  %v3157_v60 = vld [vmem:[%s2969_s20 + $0x128] sm:$0xff] }
  0x51   : > { %v2984_v62 = vld [vmem:[%s2969_s20] sm:$0xff]  ;;  %832 = vmatpush.msra.mxu2 %v399_v61  ;;  %v214_v61 = vld [vmem:[%s2969_s20 + $0x138] sm:$0xff] }
  0x52   : > { %v335_v1 = vld [vmem:[%s5143_s1 + $0x200] sm:$0xff]  ;;  %703 = vmatmul.f32.vlgmr.msra.gmra.mxu0 %v2984_v62  ;;  %833 = vmatmul.f32.vlgmr.msra.gmra.mxu2 %v177_v63  ;;  %v292_v63 = vld [vmem:[%s5143_s1 + $0xa8] sm:$0xff] }
  0x53   : > { %v463_v2 = vld [vmem:[%s5143_s1 + $0x600] sm:$0xff]  ;;  %1077 = vmatpush.msrb.mxu2 %v332_v0  ;;  %767 = vmatpush.msra.mxu1 %v335_v1  ;;  %v356_v1 = vld [vmem:[%s5143_s1 + $0x2a8] sm:$0xff] }
  0x54   : > { %v587_v5 = vld [vmem:[%s5143_s1 + $0x9e0] sm:$0xff]  ;;  %897 = vmatpush.msra.mxu3 %v463_v2  ;;  %768 = vmatmul.f32.vlgmr.msra.gmra.mxu1 %v2997_v3  ;;  %v3172_v2 = vld [vmem:[%s2969_s20 + $0x150] sm:$0xff] }
  0x55   : > { %v611_v7 = vld [vmem:[%s5143_s1 + $0xaa0] sm:$0x1]  ;;  %898 = vmatmul.f32.vlgmr.msra.gmra.mxu3 %v178_v4  ;;  %947 = vmatpush.msrb.mxu0 %v587_v5  ;;  %v3176_v5 = vld [vmem:[%s2969_s20 + $0x158] sm:$0xff] }
  0x56   : > { %v583_v9 = vld [vmem:[%s5143_s1 + $0x9c0] sm:$0xff]  ;;  %1142 = vmatpush.msrb.mxu3 %v396_v6  ;;  %2397 = vmatpush.msk.msrb.mxu1 %vm674_vm0, %v611_v7  ;;  %v220_v6 = vld [vmem:[%s2969_s20 + $0x168] sm:$0xff] }
  0x57   : > { %v607_v11 = vld [vmem:[%s5143_s1 + $0xa80] sm:$0xff]  ;;  %1078 = vmatpush.msrb.mxu2 %v328_v8  ;;  %948 = vmatpush.msrb.mxu0 %v583_v9  ;;  %v288_v7 = vld [vmem:[%s5143_s1 + $0x88] sm:$0xff] }
  0x58   : > { %v579_v13 = vld [vmem:[%s5143_s1 + $0x9a0] sm:$0xff]  ;;  %1143 = vmatpush.msrb.mxu3 %v392_v10  ;;  %1023 = vmatpush.msrb.mxu1 %v607_v11  ;;  %v352_v10 = vld [vmem:[%s5143_s1 + $0x288] sm:$0xff] }
  0x59   : > { %v183_v15 = vld [vmem:[%s2969_s20 + $0x40] sm:$0xff]  ;;  %1079 = vmatpush.msrb.mxu2 %v324_v12  ;;  %949 = vmatpush.msrb.mxu0 %v579_v13  ;;  %v225_v12 = vld [vmem:[%s2969_s20 + $0x190] sm:$0xff]  ;;  %v3198_v13 = vld [vmem:[%s2969_s20 + $0x188] sm:$0xff] }
  0x5a   : > { %v575_v19 = vld [vmem:[%s5143_s1 + $0x980] sm:$0xff]  ;;  %706 = vmatmul.f32.gmra.mxu0 %v3031_v14  ;;  %836 = vmatmul.f32.gmra.mxu2 %v183_v15  ;;  %v226_v15 = vld [vmem:[%s2969_s20 + $0x198] sm:$0xff] }
  0x5b   : > { %1144 = vmatpush.msrb.mxu3 %v388_v16  ;;  %1080 = vmatpush.msrb.mxu2 %v320_v17  ;;  %v571_v23 = vld [vmem:[%s5143_s1 + $0x960] sm:$0xff]  ;;  %v284_v16 = vld [vmem:[%s5143_s1 + $0x68] sm:$0xff] }
  0x5c   : > { %771 = vmatmul.f32.gmra.mxu1 %v3041_v18  ;;  %950 = vmatpush.msrb.mxu0 %v575_v19  ;;  %v567_v26 = vld [vmem:[%s5143_s1 + $0x940] sm:$0xff]  ;;  %v348_v19 = vld [vmem:[%s5143_s1 + $0x268] sm:$0xff] }
  0x5d   : > { %901 = vmatmul.f32.gmra.mxu3 %v184_v20  ;;  %1081 = vmatpush.msrb.mxu2 %v316_v21  ;;  %v603_v27 = vld [vmem:[%s5143_s1 + $0xa60] sm:$0xff]  ;;  %v3213_v20 = vld [vmem:[%s2969_s20 + $0x1b0] sm:$0xff] }
  0x5e   : > { %1145 = vmatpush.msrb.mxu3 %v384_v22  ;;  %951 = vmatpush.msrb.mxu0 %v571_v23  ;;  %v3071_v28 = vld [vmem:[%s2969_s20 + $0x60] sm:$0xff]  ;;  %v3217_v22 = vld [vmem:[%s2969_s20 + $0x1b8] sm:$0xff]  ;;  %v232_v23 = vld [vmem:[%s2969_s20 + $0x1c8] sm:$0xff] }
  0x5f   : > { %1082 = vmatpush.msrb.mxu2 %v312_v24  ;;  %1024 = vmatpush.msrb.mxu1 %v603_v27  ;;  %v563_v34 = vld [vmem:[%s5143_s1 + $0x920] sm:$0xff]  ;;  %v280_v24 = vld [vmem:[%s5143_s1 + $0x48] sm:$0xff] }
  0x60   : > { %1146 = vmatpush.msrb.mxu3 %v380_v25  ;;  %952 = vmatpush.msrb.mxu0 %v567_v26  ;;  %v195_v37 = vld [vmem:[%s2969_s20 + $0xa0] sm:$0xff]  ;;  %v344_v26 = vld [vmem:[%s5143_s1 + $0x248] sm:$0xff] }
  0x61   : > { %1083 = vmatpush.msrb.mxu2 %v308_v33  ;;  %v559_v41 = vld [vmem:[%s5143_s1 + $0x900] sm:$0xff]  ;;  %v238_v33 = vld [vmem:[%s2969_s20 + $0x1f8] sm:$0xff] }
  0x62   : > { %709 = vmatmul.f32.gmra.mxu0 %v3071_v28  ;;  %839 = vmatmul.f32.gmra.mxu2 %v189_v29  ;;  %v3112_v43 = vld [vmem:[%s2969_s20 + $0xc0] sm:$0xff] }
  0x63   : > { %1147 = vmatpush.msrb.mxu3 %v376_v30  ;;  %953 = vmatpush.msrb.mxu0 %v563_v34  ;;  %v555_v48 = vld [vmem:[%s5143_s1 + $0x8e0] sm:$0xff]  ;;  %v237_v30 = vld [vmem:[%s2969_s20 + $0x1f0] sm:$0xff]  ;;  %v276_v34 = vld [vmem:[%s5143_s1 + $0x28] sm:$0xff] }
  0x64   : > { %774 = vmatmul.f32.gmra.mxu1 %v3078_v31  ;;  %1084 = vmatpush.msrb.mxu2 %v304_v40  ;;  %v599_v50 = vld [vmem:[%s5143_s1 + $0xa40] sm:$0xff] }
  0x65   : > { %904 = vmatmul.f32.gmra.mxu3 %v190_v32  ;;  %954 = vmatpush.msrb.mxu0 %v559_v41  ;;  %v207_v52 = vld [vmem:[%s2969_s20 + $0x100] sm:$0xff]  ;;  %v3239_v32 = vld [vmem:[%s2969_s20 + $0x1e8] sm:$0xff]  ;;  %v3258_v41 = vld [vmem:[%s2969_s20 + $0x218] sm:$0xff] }
  0x66   : > { %1148 = vmatpush.msrb.mxu3 %v372_v35  ;;  %1085 = vmatpush.msrb.mxu2 %v300_v47  ;;  %v551_v56 = vld [vmem:[%s5143_s1 + $0x8c0] sm:$0xff]  ;;  %v336_v47 = vld [vmem:[%s5143_s1 + $0x208] sm:$0xff] }
  0x67   : > { %955 = vmatpush.msrb.mxu0 %v555_v48  ;;  %1025 = vmatpush.msrb.mxu1 %v599_v50  ;;  %v3153_v58 = vld [vmem:[%s2969_s20 + $0x120] sm:$0xff]  ;;  %v3277_v50 = vld [vmem:[%s2969_s20 + $0x248] sm:$0xff] }
  0x68   : > { %1149 = vmatpush.msrb.mxu3 %v368_v42  ;;  %1086 = vmatpush.msrb.mxu2 %v296_v55  ;;  %v547_v0 = vld [vmem:[%s5143_s1 + $0x8a0] sm:$0xff]  ;;  %v244_v42 = vld [vmem:[%s2969_s20 + $0x228] sm:$0xff] }
  0x69   : > { %956 = vmatpush.msrb.mxu0 %v551_v56  ;;  %v219_v4 = vld [vmem:[%s2969_s20 + $0x160] sm:$0xff]  ;;  %v460_v55 = vld [vmem:[%s5143_s1 + $0x5e8] sm:$0xff] }
  0x6a   : > { %712 = vmatmul.f32.gmra.mxu0 %v3093_v36  ;;  %842 = vmatmul.f32.gmra.mxu2 %v195_v37  ;;  %v543_v8 = vld [vmem:[%s5143_s1 + $0x880] sm:$0xff]  ;;  %v340_v37 = vld [vmem:[%s5143_s1 + $0x228] sm:$0xff] }
  0x6b   : > { %1150 = vmatpush.msrb.mxu3 %v364_v49  ;;  %1087 = vmatpush.msrb.mxu2 %v292_v63  ;;  %v595_v9 = vld [vmem:[%s5143_s1 + $0xa20] sm:$0xff]  ;;  %v249_v49 = vld [vmem:[%s2969_s20 + $0x250] sm:$0xff]  ;;  %v612_v56 = vld [vmem:[%s5143_s1 + $0xaa8] sm:$0x1] }
  0x6c   : > { %777 = vmatmul.f32.gmra.mxu1 %v3097_v38  ;;  %957 = vmatpush.msrb.mxu0 %v547_v0  ;;  %v3194_v11 = vld [vmem:[%s2969_s20 + $0x180] sm:$0xff]  ;;  %v3300_v63 = vld [vmem:[%s2969_s20 + $0x278] sm:$0xff]  ;;  %v256_v0 = vld [vmem:[%s2969_s20 + $0x288] sm:$0xff] }
  0x6d   : > { %907 = vmatmul.f32.gmra.mxu3 %v196_v39  ;;  %1088 = vmatpush.msrb.mxu2 %v288_v7  ;;  %v539_v17 = vld [vmem:[%s5143_s1 + $0x860] sm:$0xff]  ;;  %v3254_v39 = vld [vmem:[%s2969_s20 + $0x210] sm:$0xff] }
  0x6e   : > { %1151 = vmatpush.msrb.mxu3 %v360_v57  ;;  %958 = vmatpush.msrb.mxu0 %v543_v8  ;;  %v231_v21 = vld [vmem:[%s2969_s20 + $0x1c0] sm:$0xff]  ;;  %v524_v57 = vld [vmem:[%s5143_s1 + $0x7e8] sm:$0xff]  ;;  %v261_v8 = vld [vmem:[%s2969_s20 + $0x2b0] sm:$0xff] }
  0x6f   : > { %1026 = vmatpush.msrb.mxu1 %v595_v9  ;;  %1089 = vmatpush.msrb.mxu2 %v284_v16  ;;  %v535_v25 = vld [vmem:[%s5143_s1 + $0x840] sm:$0xff]  ;;  %v3319_v9 = vld [vmem:[%s2969_s20 + $0x2a8] sm:$0xff] }
  0x70   : > { %1152 = vmatpush.msrb.mxu3 %v356_v1  ;;  %959 = vmatpush.msrb.mxu0 %v539_v17  ;;  %v591_v27 = vld [vmem:[%s5143_s1 + $0xa00] sm:$0xff]  ;;  %v584_v1 = vld [vmem:[%s5143_s1 + $0x9c8] sm:$0xff]  ;;  %v3334_v17 = vld [vmem:[%s2969_s20 + $0x2d0] sm:$0xff] }
  0x71   : > { %1090 = vmatpush.msrb.mxu2 %v280_v24  ;;  %v3235_v29 = vld [vmem:[%s2969_s20 + $0x1e0] sm:$0xff]  ;;  %1027 = vmatpush.msrb.mxu1 %v591_v27  ;;  %v516_v16 = vld [vmem:[%s5143_s1 + $0x7a8] sm:$0xff] }
  0x72   : > { %715 = vmatmul.f32.gmra.mxu0 %v3112_v43  ;;  %845 = vmatmul.f32.gmra.mxu2 %v201_v44  ;;  %v531_v35 = vld [vmem:[%s5143_s1 + $0x820] sm:$0xff]  ;;  %v272_v44 = vld [vmem:[%s5143_s1 + $0x8] sm:$0xff] }
  0x73   : > { %1153 = vmatpush.msrb.mxu3 %v352_v10  ;;  %960 = vmatpush.msrb.mxu0 %v535_v25  ;;  %v243_v40 = vld [vmem:[%s2969_s20 + $0x220] sm:$0xff]  ;;  %v262_v10 = vld [vmem:[%s2969_s20 + $0x2b8] sm:$0xff]  ;;  %v268_v24 = vld [vmem:[%s2969_s20 + $0x2e8] sm:$0xff] }
  0x74   : > { %780 = vmatmul.f32.gmra.mxu1 %v3116_v45  ;;  %1091 = vmatpush.msrb.mxu2 %v276_v34  ;;  %v3273_v48 = vld [vmem:[%s2969_s20 + $0x240] sm:$0xff]  ;;  %v576_v25 = vld [vmem:[%s5143_s1 + $0x988] sm:$0xff] }
  0x75   : > { %910 = vmatmul.f32.gmra.mxu3 %v202_v46  ;;  %961 = vmatpush.msrb.mxu0 %v531_v35  ;;  %v527_v46 = vld [vmem:[%s5143_s1 + $0x800] sm:$0xff] }
  0x76   : > { %1154 = vmatpush.msrb.mxu3 %v348_v19  ;;  %1092 = vmatpush.msrb.mxu2 %v272_v44  ;;  %v3315_v7 = vld [vmem:[%s2969_s20 + $0x2a0] sm:$0xff] }
  0x77   : > { %962 = vmatpush.msrb.mxu0 %v527_v46  ;;  %1272 = vmatpush.msra.mxu1 %v524_v57  ;;  %v267_v19 = vld [vmem:[%s2969_s20 + $0x2e0] sm:$0xff]  ;;  %v572_v46 = vld [vmem:[%s5143_s1 + $0x968] sm:$0xff] }
  0x78   : > { %1155 = vmatpush.msrb.mxu3 %v344_v26  ;;  %v608_v26 = vld [vmem:[%s5143_s1 + $0xa88] sm:$0xff]  ;;  %v3364_v35 = vld [vmem:[%s2969_s20 + $0x20] sm:$0xff] }
  0x79   : > { %1207 = vmatpush.msra.mxu0 %v460_v55  ;;  %v3385_v55 = vld [vmem:[%s2969_s20 + $0x50] sm:$0xff] }
  0x7a   : > { %718 = vmatmul.f32.gmra.mxu0 %v3134_v51  ;;  %848 = vmatmul.f32.gmra.mxu2 %v207_v52  ;;  %v250_v52 = vld [vmem:[%s2969_s20 + $0x258] sm:$0xff] }
  0x7b   : > { %1156 = vmatpush.msrb.mxu3 %v340_v37 }
  0x7c   : > { %783 = vmatmul.f32.gmra.mxu1 %v3138_v53 }
  0x7d   : > { %913 = vmatmul.f32.gmra.mxu3 %v208_v54  ;;  %v588_v54 = vld [vmem:[%s5143_s1 + $0x9e8] sm:$0xff] }
  0x7e   : > { %1157 = vmatpush.msrb.mxu3 %v336_v47  ;;  %1337 = vmatpush.msra.mxu2 %v588_v54 }
  0x80   : > { %2414 = vmatpush.msk.msra.mxu3 %vm674_vm0, %v612_v56  ;;  %1338 = vmatpush.msra.mxu2 %v584_v1 }
  0x82   : > { %721 = vmatmul.f32.gmra.mxu0 %v3153_v58  ;;  %851 = vmatmul.f32.gmra.mxu2 %v213_v59  ;;  %v3296_v59 = vld [vmem:[%s2969_s20 + $0x270] sm:$0xff] }
  0x83   : > { %1413 = vmatpush.msra.mxu3 %v608_v26  ;;  %v604_v26 = vld [vmem:[%s5143_s1 + $0xa68] sm:$0xff] }
  0x84   : > { %786 = vmatmul.f32.gmra.mxu1 %v3157_v60 }
  0x85   : > { %916 = vmatmul.f32.gmra.mxu3 %v214_v61  ;;  %v255_v61 = vld [vmem:[%s2969_s20 + $0x280] sm:$0xff] }
  0x86   : > { %1414 = vmatpush.msra.mxu3 %v604_v26  ;;  %v428_v26 = vld [vmem:[%s5143_s1 + $0x4e8] sm:$0xff] }
  0x8a   : > { %724 = vmatmul.f32.gmra.mxu0 %v3172_v2  ;;  %854 = vmatmul.f32.gmra.mxu2 %v219_v4  ;;  %v456_v4 = vld [vmem:[%s5143_s1 + $0x5c8] sm:$0xff] }
  0x8b   : > { %1208 = vmatpush.msra.mxu0 %v456_v4  ;;  %v568_v4 = vld [vmem:[%s5143_s1 + $0x948] sm:$0xff] }
  0x8c   : > { %789 = vmatmul.f32.gmra.mxu1 %v3176_v5 }
  0x8d   : > { %919 = vmatmul.f32.gmra.mxu3 %v220_v6  ;;  %v520_v6 = vld [vmem:[%s5143_s1 + $0x7c8] sm:$0xff] }
  0x8e   : > { %1273 = vmatpush.msra.mxu1 %v520_v6 }
  0x90   : > { %1274 = vmatpush.msra.mxu1 %v516_v16 }
  0x92   : > { %727 = vmatmul.f32.gmra.mxu0 %v3194_v11  ;;  %857 = vmatmul.f32.gmra.mxu2 %v225_v12  ;;  %v580_v12 = vld [vmem:[%s5143_s1 + $0x9a8] sm:$0xff] }
  0x93   : > { %1339 = vmatpush.msra.mxu2 %v580_v12 }
  0x94   : > { %792 = vmatmul.f32.gmra.mxu1 %v3198_v13 }
  0x95   : > { %922 = vmatmul.f32.gmra.mxu3 %v226_v15  ;;  %v452_v15 = vld [vmem:[%s5143_s1 + $0x5a8] sm:$0xff]  ;;  %1340 = vmatpush.msra.mxu2 %v576_v25 }
  0x96   : > { %1209 = vmatpush.msra.mxu0 %v452_v15  ;;  %v3408_v15 = vld [vmem:[%s2969_s20 + $0x80] sm:$0xff]  ;;  %v3414_v25 = vld [vmem:[%s2969_s20 + $0x88] sm:$0xff] }
  0x97   : > { %1341 = vmatpush.msra.mxu2 %v572_v46  ;;  %v3434_v46 = vld [vmem:[%s2969_s20 + $0xb0] sm:$0xff] }
  0x99   : > { %1342 = vmatpush.msra.mxu2 %v568_v4 }
  0x9a   : > { %730 = vmatmul.f32.gmra.mxu0 %v3213_v20  ;;  %860 = vmatmul.f32.gmra.mxu2 %v231_v21  ;;  %v3338_v21 = vld [vmem:[%s2969_s20 + $0x2d8] sm:$0xff] }
  0x9c   : > { %795 = vmatmul.f32.gmra.mxu1 %v3217_v22 }
  0x9d   : > { %925 = vmatmul.f32.gmra.mxu3 %v232_v23  ;;  %v3343_v23 = vld [vmem:[%s5144_s2] sm:$0xf] }
  0x9e   : > { %v3355_v27 = vperm.slane %v3343_v23, 0 }
  0xa2   : > { %733 = vmatmul.f32.gmra.mxu0 %v3235_v29  ;;  %863 = vmatmul.f32.gmra.mxu2 %v237_v30  ;;  %v448_v30 = vld [vmem:[%s5143_s1 + $0x588] sm:$0xff] }
  0xa3   : > { %1210 = vmatpush.msra.mxu0 %v448_v30 }
  0xa4   : > { %798 = vmatmul.f32.gmra.mxu1 %v3239_v32 }
  0xa5   : > { %928 = vmatmul.f32.gmra.mxu3 %v238_v33  ;;  %v512_v33 = vld [vmem:[%s5143_s1 + $0x788] sm:$0xff] }
  0xa6   : > { %1275 = vmatpush.msra.mxu1 %v512_v33  ;;  %v564_v33 = vld [vmem:[%s5143_s1 + $0x928] sm:$0xff] }
  0xa7   : > { %1343 = vmatpush.msra.mxu2 %v564_v33  ;;  %v492_v33 = vld [vmem:[%s5143_s1 + $0x6e8] sm:$0xff] }
  0xaa   : > { %736 = vmatmul.f32.gmra.mxu0 %v3254_v39  ;;  %866 = vmatmul.f32.gmra.mxu2 %v243_v40 }
  0xac   : > { %801 = vmatmul.f32.gmra.mxu1 %v3258_v41 }
  0xad   : > { %931 = vmatmul.f32.gmra.mxu3 %v244_v42  ;;  %v3368_v42 = vld [vmem:[%s2969_s20 + $0x28] sm:$0xff] }
  0xb2   : > { %739 = vmatmul.f32.gmra.mxu0 %v3273_v48  ;;  %869 = vmatmul.f32.gmra.mxu2 %v249_v49  ;;  %v444_v49 = vld [vmem:[%s5143_s1 + $0x568] sm:$0xff] }
  0xb3   : > { %1211 = vmatpush.msra.mxu0 %v444_v49 }
  0xb4   : > { %804 = vmatmul.f32.gmra.mxu1 %v3277_v50 }
  0xb5   : > { %934 = vmatmul.f32.gmra.mxu3 %v250_v52 }
  0xba   : > { %742 = vmatmul.f32.gmra.mxu0 %v3296_v59  ;;  %872 = vmatmul.f32.gmra.mxu2 %v255_v61 }
  0xbc   : > { %807 = vmatmul.f32.gmra.mxu1 %v3300_v63 }
  0xbd   : > { %937 = vmatmul.f32.gmra.mxu3 %v256_v0  ;;  %v3391_v0 = vld [vmem:[%s2969_s20 + $0x58] sm:$0xff] }
  0xc2   : > { %745 = vmatmul.f32.gmra.mxu0 %v3315_v7  ;;  %875 = vmatmul.f32.gmra.mxu2 %v261_v8  ;;  %v440_v8 = vld [vmem:[%s5143_s1 + $0x548] sm:$0xff] }
  0xc3   : > { %1212 = vmatpush.msra.mxu0 %v440_v8 }
  0xc4   : > { %810 = vmatmul.f32.gmra.mxu1 %v3319_v9 }
  0xc5   : > { %940 = vmatmul.f32.gmra.mxu3 %v262_v10 }
  0xca   : > { %748 = vmatmul.f32.gmra.mxu0 %v3334_v17  ;;  %878 = vmatmul.f32.gmra.mxu2 %v267_v19 }
  0xcc   : > { %813 = vmatmul.f32.gmra.mxu1 %v3338_v21 }
  0xcd   : > { %943 = vmatmul.f32.gmra.mxu3 %v268_v24 }
  0xcf   : > { %v704_v34 = vpop.f32.mrf.mxu0 }
  0xd0   : > { %v705_v37 = vadd.f32 %v704_v34, %v3355_v27 }
  0xd1   : > { %v769_v40 = vpop.f32.mrf.mxu1 }
  0xd2   : > { %v770_v44 = vadd.f32 %v769_v40, %v705_v37  ;;  %963 = vmatmul.f32.vlgmr.msrb.gmra.mxu0 %v3364_v35  ;;  %1093 = vmatmul.f32.vlgmr.msrb.gmra.mxu2 %v2984_v62  ;;  %v508_v62 = vld [vmem:[%s5143_s1 + $0x768] sm:$0xff] }
  0xd3   : > { %1276 = vmatpush.msra.mxu1 %v508_v62  ;;  %v436_v37 = vld [vmem:[%s5143_s1 + $0x528] sm:$0xff]  ;;  %v3440_v62 = vld [vmem:[%s2969_s20 + $0xb8] sm:$0xff] }
  0xd4   : > { %2398 = vmatmul.msk.f32.vlgmr.msrb.gmra.mxu1 %vm625_vm1, %v3368_v42  ;;  %1213 = vmatpush.msra.mxu0 %v436_v37  ;;  %v3483_v37 = vld [vmem:[%s2969_s20 + $0x110] sm:$0xff] }
  0xd5   : > { %1158 = vmatmul.f32.vlgmr.msrb.gmra.mxu3 %v2997_v3  ;;  %v834_v47 = vpop.f32.mrf.mxu2 }
  0xd6   : > { %v835_v52 = vadd.f32 %v834_v47, %v770_v44 }
  0xd7   : > { %v707_v54 = vpop.f32.mrf.mxu0 }
  0xd8   : > { %v708_v56 = vadd.f32 %v707_v54, %v3355_v27  ;;  %v899_v57 = vpop.f32.mrf.mxu3 }
  0xd9   : > { %v3388_v61 = vadd.f32 %v899_v57, %v835_v52  ;;  %v772_v3 = vpop.f32.mrf.mxu1 }
  0xda   : > { %v773_v1 = vadd.f32 %v772_v3, %v708_v56  ;;  %966 = vmatmul.f32.gmra.mxu0 %v3385_v55  ;;  %1096 = vmatmul.f32.gmra.mxu2 %v3031_v14  ;;  %v504_v14 = vld [vmem:[%s5143_s1 + $0x748] sm:$0xff] }
  0xdb   : > { %1277 = vmatpush.msra.mxu1 %v504_v14  ;;  %v560_v56 = vld [vmem:[%s5143_s1 + $0x908] sm:$0xff] }
  0xdc   : > { %2399 = vmatmul.msk.f32.gmra.mxu1 %vm625_vm1, %v3391_v0  ;;  %1344 = vmatpush.msra.mxu2 %v560_v56  ;;  %v432_v3 = vld [vmem:[%s5143_s1 + $0x508] sm:$0xff] }
  0xdd   : > { %1161 = vmatmul.f32.gmra.mxu3 %v3041_v18  ;;  %v837_v6 = vpop.f32.mrf.mxu2  ;;  %1214 = vmatpush.msra.mxu0 %v432_v3  ;;  %v424_v56 = vld [vmem:[%s5143_s1 + $0x4c8] sm:$0xff] }
  0xde   : > { %v838_v10 = vadd.f32 %v837_v6, %v773_v1  ;;  %v3457_v6 = vld [vmem:[%s2969_s20 + $0xe0] sm:$0xff] }
  0xdf   : > { %v710_v12 = vpop.f32.mrf.mxu0  ;;  %1215 = vmatpush.msra.mxu0 %v428_v26 }
  0xe0   : > { %v711_v16 = vadd.f32 %v710_v12, %v3355_v27  ;;  %v902_v19 = vpop.f32.mrf.mxu3  ;;  %v3463_v12 = vld [vmem:[%s2969_s20 + $0xe8] sm:$0xff] }
  0xe1   : > { %v3411_v24 = vadd.f32 %v902_v19, %v838_v10  ;;  %v775_v18 = vpop.f32.mrf.mxu1  ;;  %v556_v19 = vld [vmem:[%s5143_s1 + $0x8e8] sm:$0xff]  ;;  %1216 = vmatpush.msra.mxu0 %v424_v56 }
  0xe2   : > { %v776_v30 = vadd.f32 %v775_v18, %v711_v16  ;;  %969 = vmatmul.f32.gmra.mxu0 %v3408_v15  ;;  %1099 = vmatmul.f32.gmra.mxu2 %v3071_v28  ;;  %v500_v28 = vld [vmem:[%s5143_s1 + $0x728] sm:$0xff] }
  0xe3   : > { %1278 = vmatpush.msra.mxu1 %v500_v28  ;;  %1345 = vmatpush.msra.mxu2 %v556_v19 }
  0xe4   : > { %2400 = vmatmul.msk.f32.gmra.mxu1 %vm625_vm1, %v3414_v25 }
  0xe5   : > { %1164 = vmatmul.f32.gmra.mxu3 %v3078_v31  ;;  %v840_v34 = vpop.f32.mrf.mxu2 }
  0xe6   : > { %v841_v40 = vadd.f32 %v840_v34, %v776_v30 }
  0xe7   : > { %v713_v44 = vpop.f32.mrf.mxu0 }
  0xe8   : > { %v714_v47 = vadd.f32 %v713_v44, %v3355_v27  ;;  %v905_v49 = vpop.f32.mrf.mxu3 }
  0xe9   : > { %v3437_v52 = vadd.f32 %v905_v49, %v841_v40  ;;  %v778_v31 = vpop.f32.mrf.mxu1 }
  0xea   : > { %v779_v54 = vadd.f32 %v778_v31, %v714_v47  ;;  %972 = vmatmul.f32.gmra.mxu0 %v3434_v46  ;;  %1102 = vmatmul.f32.gmra.mxu2 %v3093_v36  ;;  %v496_v36 = vld [vmem:[%s5143_s1 + $0x708] sm:$0xff]  ;;  %v3489_v47 = vld [vmem:[%s2969_s20 + $0x118] sm:$0xff] }
  0xeb   : > { %1279 = vmatpush.msra.mxu1 %v496_v36  ;;  %v552_v31 = vld [vmem:[%s5143_s1 + $0x8c8] sm:$0xff] }
  0xec   : > { %2401 = vmatmul.msk.f32.gmra.mxu1 %vm625_vm1, %v3440_v62  ;;  %1346 = vmatpush.msra.mxu2 %v552_v31  ;;  %v596_v31 = vld [vmem:[%s5143_s1 + $0xa28] sm:$0xff] }
  0xed   : > { %1167 = vmatmul.f32.gmra.mxu3 %v3097_v38  ;;  %v843_v57 = vpop.f32.mrf.mxu2  ;;  %1280 = vmatpush.msra.mxu1 %v492_v33 }
  0xee   : > { %v844_v1 = vadd.f32 %v843_v57, %v779_v54 }
  0xef   : > { %v716_v4 = vpop.f32.mrf.mxu0 }
  0xf0   : > { %v717_v8 = vadd.f32 %v716_v4, %v3355_v27  ;;  %v908_v10 = vpop.f32.mrf.mxu3 }
  0xf1   : > { %v3460_v14 = vadd.f32 %v908_v10, %v844_v1  ;;  %v781_v38 = vpop.f32.mrf.mxu1  ;;  %v3506_v1 = vld [vmem:[%s2969_s20 + $0x140] sm:$0xff]  ;;  %v3512_v10 = vld [vmem:[%s2969_s20 + $0x148] sm:$0xff] }
  0xf2   : > { %v782_v16 = vadd.f32 %v781_v38, %v717_v8  ;;  %975 = vmatmul.f32.gmra.mxu0 %v3457_v6  ;;  %1105 = vmatmul.f32.gmra.mxu2 %v3112_v43  ;;  %v600_v43 = vld [vmem:[%s5143_s1 + $0xa48] sm:$0xff] }
  0xf3   : > { %1415 = vmatpush.msra.mxu3 %v600_v43 }
  0xf4   : > { %2402 = vmatmul.msk.f32.gmra.mxu1 %vm625_vm1, %v3463_v12 }
  0xf5   : > { %1170 = vmatmul.f32.gmra.mxu3 %v3116_v45  ;;  %v846_v18 = vpop.f32.mrf.mxu2 }
  0xf6   : > { %v847_v30 = vadd.f32 %v846_v18, %v782_v16  ;;  %v548_v16 = vld [vmem:[%s5143_s1 + $0x8a8] sm:$0xff]  ;;  %1416 = vmatpush.msra.mxu3 %v596_v31 }
  0xf7   : > { %v719_v34 = vpop.f32.mrf.mxu0  ;;  %1347 = vmatpush.msra.mxu2 %v548_v16  ;;  %v420_v18 = vld [vmem:[%s5143_s1 + $0x4a8] sm:$0xff] }
  0xf8   : > { %v720_v45 = vadd.f32 %v719_v34, %v3355_v27  ;;  %v911_v40 = vpop.f32.mrf.mxu3  ;;  %1217 = vmatpush.msra.mxu0 %v420_v18 }
  0xf9   : > { %v3486_v28 = vadd.f32 %v911_v40, %v847_v30  ;;  %v784_v44 = vpop.f32.mrf.mxu1  ;;  %v3529_v30 = vld [vmem:[%s2969_s20 + $0x170] sm:$0xff]  ;;  %v3535_v40 = vld [vmem:[%s2969_s20 + $0x178] sm:$0xff] }
  0xfa   : > { %v785_v49 = vadd.f32 %v784_v44, %v720_v45  ;;  %978 = vmatmul.f32.gmra.mxu0 %v3483_v37  ;;  %1108 = vmatmul.f32.gmra.mxu2 %v3134_v51  ;;  %v488_v51 = vld [vmem:[%s5143_s1 + $0x6c8] sm:$0xff] }
  0xfb   : > { %1281 = vmatpush.msra.mxu1 %v488_v51 }
  0xfc   : > { %2403 = vmatmul.msk.f32.gmra.mxu1 %vm625_vm1, %v3489_v47 }
  0xfd   : > { %1173 = vmatmul.f32.gmra.mxu3 %v3138_v53  ;;  %v849_v54 = vpop.f32.mrf.mxu2 }
  0xfe   : > { %v850_v57 = vadd.f32 %v849_v54, %v785_v49  ;;  %v544_v49 = vld [vmem:[%s5143_s1 + $0x888] sm:$0xff] }
  0xff   : > { %v722_v3 = vpop.f32.mrf.mxu0  ;;  %1348 = vmatpush.msra.mxu2 %v544_v49  ;;  %v3584_v49 = vld [vmem:[%s2969_s20 + $0x1d8] sm:$0xff] }
 0x100   : > { %v723_v36 = vadd.f32 %v722_v3, %v3355_v27  ;;  %v914_v4 = vpop.f32.mrf.mxu3  ;;  %v3555_v3 = vld [vmem:[%s2969_s20 + $0x1a0] sm:$0xff] }
 0x101   : > { %v3509_v8 = vadd.f32 %v914_v4, %v850_v57  ;;  %v787_v53 = vpop.f32.mrf.mxu1  ;;  %v480_v57 = vld [vmem:[%s5143_s1 + $0x688] sm:$0xff] }
 0x102   : > { %v788_v38 = vadd.f32 %v787_v53, %v723_v36  ;;  %981 = vmatmul.f32.gmra.mxu0 %v3506_v1  ;;  %1111 = vmatmul.f32.gmra.mxu2 %v3153_v58  ;;  %v484_v58 = vld [vmem:[%s5143_s1 + $0x6a8] sm:$0xff] }
 0x103   : > { %1282 = vmatpush.msra.mxu1 %v484_v58 }
 0x104   : > { %2404 = vmatmul.msk.f32.gmra.mxu1 %vm625_vm1, %v3512_v10 }
 0x105   : > { %1176 = vmatmul.f32.gmra.mxu3 %v3157_v60  ;;  %v852_v19 = vpop.f32.mrf.mxu2  ;;  %1283 = vmatpush.msra.mxu1 %v480_v57 }
 0x106   : > { %v853_v26 = vadd.f32 %v852_v19, %v788_v38  ;;  %v3561_v38 = vld [vmem:[%s2969_s20 + $0x1a8] sm:$0xff] }
 0x107   : > { %v725_v43 = vpop.f32.mrf.mxu0  ;;  %v540_v19 = vld [vmem:[%s5143_s1 + $0x868] sm:$0xff] }
 0x108   : > { %v726_v33 = vadd.f32 %v725_v43, %v3355_v27  ;;  %v917_v34 = vpop.f32.mrf.mxu3  ;;  %1349 = vmatpush.msra.mxu2 %v540_v19  ;;  %v3607_v19 = vld [vmem:[%s2969_s20 + $0x208] sm:$0xff] }
 0x109   : > { %v3532_v45 = vadd.f32 %v917_v34, %v853_v26  ;;  %v790_v60 = vpop.f32.mrf.mxu1  ;;  %v412_v26 = vld [vmem:[%s5143_s1 + $0x468] sm:$0xff] }
 0x10a   : > { %v791_v44 = vadd.f32 %v790_v60, %v726_v33  ;;  %984 = vmatmul.f32.gmra.mxu0 %v3529_v30  ;;  %1114 = vmatmul.f32.gmra.mxu2 %v3172_v2  ;;  %v416_v2 = vld [vmem:[%s5143_s1 + $0x488] sm:$0xff]  ;;  %v3578_v33 = vld [vmem:[%s2969_s20 + $0x1d0] sm:$0xff] }
 0x10b   : > { %1218 = vmatpush.msra.mxu0 %v416_v2 }
 0x10c   : > { %2405 = vmatmul.msk.f32.gmra.mxu1 %vm625_vm1, %v3535_v40 }
 0x10d   : > { %1179 = vmatmul.f32.gmra.mxu3 %v3176_v5  ;;  %v855_v54 = vpop.f32.mrf.mxu2  ;;  %1219 = vmatpush.msra.mxu0 %v412_v26 }
 0x10e   : > { %v856_v56 = vadd.f32 %v855_v54, %v791_v44  ;;  %v536_v54 = vld [vmem:[%s5143_s1 + $0x848] sm:$0xff] }
 0x10f   : > { %v728_v51 = vpop.f32.mrf.mxu0  ;;  %1350 = vmatpush.msra.mxu2 %v536_v54 }
 0x110   : > { %v729_v36 = vadd.f32 %v728_v51, %v3355_v27  ;;  %v920_v4 = vpop.f32.mrf.mxu3 }
 0x111   : > { %v3558_v53 = vadd.f32 %v920_v4, %v856_v56  ;;  %v793_v5 = vpop.f32.mrf.mxu1  ;;  %v408_v56 = vld [vmem:[%s5143_s1 + $0x448] sm:$0xff] }
 0x112   : > { %v794_v16 = vadd.f32 %v793_v5, %v729_v36  ;;  %987 = vmatmul.f32.gmra.mxu0 %v3555_v3  ;;  %1117 = vmatmul.f32.gmra.mxu2 %v3194_v11  ;;  %v476_v11 = vld [vmem:[%s5143_s1 + $0x668] sm:$0xff]  ;;  %v3601_v36 = vld [vmem:[%s2969_s20 + $0x200] sm:$0xff] }
 0x113   : > { %1284 = vmatpush.msra.mxu1 %v476_v11  ;;  %1220 = vmatpush.msra.mxu0 %v408_v56  ;;  %v3633_v56 = vld [vmem:[%s2969_s20 + $0x238] sm:$0xff] }
 0x114   : > { %2406 = vmatmul.msk.f32.gmra.mxu1 %vm625_vm1, %v3561_v38 }
 0x115   : > { %1182 = vmatmul.f32.gmra.mxu3 %v3198_v13  ;;  %v858_v18 = vpop.f32.mrf.mxu2 }
 0x116   : > { %v859_v58 = vadd.f32 %v858_v18, %v794_v16  ;;  %v592_v18 = vld [vmem:[%s5143_s1 + $0xa08] sm:$0xff] }
 0x117   : > { %v731_v43 = vpop.f32.mrf.mxu0  ;;  %1417 = vmatpush.msra.mxu3 %v592_v18  ;;  %v3650_v18 = vld [vmem:[%s2969_s20 + $0x260] sm:$0xff] }
 0x118   : > { %v732_v34 = vadd.f32 %v731_v43, %v3355_v27  ;;  %v923_v60 = vpop.f32.mrf.mxu3  ;;  %v404_v43 = vld [vmem:[%s5143_s1 + $0x428] sm:$0xff] }
 0x119   : > { %v3581_v44 = vadd.f32 %v923_v60, %v859_v58  ;;  %v796_v13 = vpop.f32.mrf.mxu1  ;;  %v532_v58 = vld [vmem:[%s5143_s1 + $0x828] sm:$0xff]  ;;  %1221 = vmatpush.msra.mxu0 %v404_v43 }
 0x11a   : > { %v797_v31 = vadd.f32 %v796_v13, %v732_v34  ;;  %990 = vmatmul.f32.gmra.mxu0 %v3578_v33  ;;  %1120 = vmatmul.f32.gmra.mxu2 %v3213_v20  ;;  %v472_v20 = vld [vmem:[%s5143_s1 + $0x648] sm:$0xff]  ;;  %v3627_v13 = vld [vmem:[%s2969_s20 + $0x230] sm:$0xff] }
 0x11b   : > { %1285 = vmatpush.msra.mxu1 %v472_v20  ;;  %1351 = vmatpush.msra.mxu2 %v532_v58  ;;  %v528_v20 = vld [vmem:[%s5143_s1 + $0x808] sm:$0xff] }
 0x11c   : > { %2407 = vmatmul.msk.f32.gmra.mxu1 %vm625_vm1, %v3584_v49  ;;  %v3656_v43 = vld [vmem:[%s2969_s20 + $0x268] sm:$0xff] }
 0x11d   : > { %1185 = vmatmul.f32.gmra.mxu3 %v3217_v22  ;;  %v861_v2 = vpop.f32.mrf.mxu2  ;;  %1352 = vmatpush.msra.mxu2 %v528_v20 }
 0x11e   : > { %v862_v57 = vadd.f32 %v861_v2, %v797_v31 }
 0x11f   : > { %v734_v51 = vpop.f32.mrf.mxu0 }
 0x120   : > { %v735_v4 = vadd.f32 %v734_v51, %v3355_v27  ;;  %v926_v5 = vpop.f32.mrf.mxu3 }
 0x121   : > { %v3604_v16 = vadd.f32 %v926_v5, %v862_v57  ;;  %v799_v22 = vpop.f32.mrf.mxu1 }
 0x122   : > { %v800_v26 = vadd.f32 %v799_v22, %v735_v4  ;;  %993 = vmatmul.f32.gmra.mxu0 %v3601_v36  ;;  %1123 = vmatmul.f32.gmra.mxu2 %v3235_v29  ;;  %v468_v29 = vld [vmem:[%s5143_s1 + $0x628] sm:$0xff] }
 0x123   : > { %1286 = vmatpush.msra.mxu1 %v468_v29  ;;  %v400_v4 = vld [vmem:[%s5143_s1 + $0x408] sm:$0xff]  ;;  %v461_v29 = vld [vmem:[%s5143_s1 + $0x5f0] sm:$0xff] }
 0x124   : > { %2408 = vmatmul.msk.f32.gmra.mxu1 %vm625_vm1, %v3607_v19  ;;  %1222 = vmatpush.msra.mxu0 %v400_v4 }
 0x125   : > { %1188 = vmatmul.f32.gmra.mxu3 %v3239_v32  ;;  %v864_v11 = vpop.f32.mrf.mxu2  ;;  %1597 = vmatpush.msrb.mxu2 %v461_v29  ;;  %v393_v29 = vld [vmem:[%s5143_s1 + $0x3d0] sm:$0xff] }
 0x126   : > { %v865_v34 = vadd.f32 %v864_v11, %v800_v26 }
 0x127   : > { %v737_v60 = vpop.f32.mrf.mxu0 }
 0x128   : > { %v738_v31 = vadd.f32 %v737_v60, %v3355_v27  ;;  %v929_v54 = vpop.f32.mrf.mxu3 }
 0x129   : > { %v3630_v2 = vadd.f32 %v929_v54, %v865_v34  ;;  %v802_v32 = vpop.f32.mrf.mxu1 }
 0x12a   : > { %v803_v57 = vadd.f32 %v802_v32, %v738_v31  ;;  %996 = vmatmul.f32.gmra.mxu0 %v3627_v13  ;;  %1126 = vmatmul.f32.gmra.mxu2 %v3254_v39  ;;  %v464_v39 = vld [vmem:[%s5143_s1 + $0x608] sm:$0xff]  ;;  %v333_v31 = vld [vmem:[%s5143_s1 + $0x1f0] sm:$0xff] }
 0x12b   : > { %1287 = vmatpush.msra.mxu1 %v464_v39  ;;  %1467 = vmatpush.msrb.mxu0 %v333_v31  ;;  %v397_v32 = vld [vmem:[%s5143_s1 + $0x3f0] sm:$0xff]  ;;  %v3682_v39 = vld [vmem:[%s2969_s20 + $0x298] sm:$0xff] }
 0x12c   : > { %2409 = vmatmul.msk.f32.gmra.mxu1 %vm625_vm1, %v3633_v56 }
 0x12d   : > { %1191 = vmatmul.f32.gmra.mxu3 %v3258_v41  ;;  %v867_v51 = vpop.f32.mrf.mxu2  ;;  %1532 = vmatpush.msrb.mxu1 %v397_v32 }
 0x12e   : > { %v868_v5 = vadd.f32 %v867_v51, %v803_v57 }
 0x12f   : > { %v740_v22 = vpop.f32.mrf.mxu0  ;;  %1533 = vmatpush.msrb.mxu1 %v393_v29 }
 0x130   : > { %v741_v26 = vadd.f32 %v740_v22, %v3355_v27  ;;  %v932_v58 = vpop.f32.mrf.mxu3 }
 0x131   : > { %v3653_v11 = vadd.f32 %v932_v58, %v868_v5  ;;  %v805_v41 = vpop.f32.mrf.mxu1 }
 0x132   : > { %v806_v34 = vadd.f32 %v805_v41, %v741_v26  ;;  %999 = vmatmul.f32.gmra.mxu0 %v3650_v18  ;;  %1129 = vmatmul.f32.gmra.mxu2 %v3273_v48  ;;  %v525_v48 = vld [vmem:[%s5143_s1 + $0x7f0] sm:$0xff] }
 0x133   : > { %1662 = vmatpush.msrb.mxu3 %v525_v48  ;;  %v457_v26 = vld [vmem:[%s5143_s1 + $0x5d0] sm:$0xff] }
 0x134   : > { %2410 = vmatmul.msk.f32.gmra.mxu1 %vm625_vm1, %v3656_v43  ;;  %1598 = vmatpush.msrb.mxu2 %v457_v26  ;;  %v329_v41 = vld [vmem:[%s5143_s1 + $0x1d0] sm:$0xff] }
 0x135   : > { %1194 = vmatmul.f32.gmra.mxu3 %v3277_v50  ;;  %v870_v60 = vpop.f32.mrf.mxu2  ;;  %v3676_v50 = vld [vmem:[%s2969_s20 + $0x290] sm:$0xff]  ;;  %1468 = vmatpush.msrb.mxu0 %v329_v41 }
 0x136   : > { %v871_v54 = vadd.f32 %v870_v60, %v806_v34  ;;  %v3728_v41 = vld [vmem:[%s2969_s20 + $0x2f0] sm:$0xff] }
 0x137   : > { %v743_v57 = vpop.f32.mrf.mxu0 }
 0x138   : > { %v744_v20 = vadd.f32 %v743_v57, %v3355_v27  ;;  %v935_v51 = vpop.f32.mrf.mxu3  ;;  %v3708_v57 = vld [vmem:[%s2969_s20 + $0x2c8] sm:$0xff] }
 0x139   : > { %v3679_v4 = vadd.f32 %v935_v51, %v871_v54  ;;  %v808_v5 = vpop.f32.mrf.mxu1  ;;  %v453_v51 = vld [vmem:[%s5143_s1 + $0x5b0] sm:$0xff] }
 0x13a   : > { %v809_v22 = vadd.f32 %v808_v5, %v744_v20  ;;  %1002 = vmatmul.f32.gmra.mxu0 %v3676_v50  ;;  %1132 = vmatmul.f32.gmra.mxu2 %v3296_v59  ;;  %v521_v59 = vld [vmem:[%s5143_s1 + $0x7d0] sm:$0xff] }
 0x13b   : > { %1663 = vmatpush.msrb.mxu3 %v521_v59  ;;  %1599 = vmatpush.msrb.mxu2 %v453_v51 }
 0x13c   : > { %2411 = vmatmul.msk.f32.gmra.mxu1 %vm625_vm1, %v3682_v39 }
 0x13d   : > { %1197 = vmatmul.f32.gmra.mxu3 %v3300_v63  ;;  %v873_v58 = vpop.f32.mrf.mxu2  ;;  %v3702_v63 = vld [vmem:[%s2969_s20 + $0x2c0] sm:$0xff] }
 0x13e   : > { %v874_v34 = vadd.f32 %v873_v58, %v809_v22  ;;  %v325_v22 = vld [vmem:[%s5143_s1 + $0x1b0] sm:$0xff] }
 0x13f   : > { %v746_v60 = vpop.f32.mrf.mxu0  ;;  %1469 = vmatpush.msrb.mxu0 %v325_v22  ;;  %v389_v58 = vld [vmem:[%s5143_s1 + $0x3b0] sm:$0xff] }
 0x140   : > { %v747_v31 = vadd.f32 %v746_v60, %v3355_v27  ;;  %v938_v48 = vpop.f32.mrf.mxu3  ;;  %1534 = vmatpush.msrb.mxu1 %v389_v58 }
 0x141   : > { %v3705_v54 = vadd.f32 %v938_v48, %v874_v34  ;;  %v811_v32 = vpop.f32.mrf.mxu1 }
 0x142   : > { %v812_v20 = vadd.f32 %v811_v32, %v747_v31  ;;  %1005 = vmatmul.f32.gmra.mxu0 %v3702_v63  ;;  %1135 = vmatmul.f32.gmra.mxu2 %v3315_v7  ;;  %v517_v7 = vld [vmem:[%s5143_s1 + $0x7b0] sm:$0xff]  ;;  %v3734_v31 = vld [vmem:[%s2969_s20 + $0x2f8] sm:$0xff] }
 0x143   : > { %1664 = vmatpush.msrb.mxu3 %v517_v7 }
 0x144   : > { %2412 = vmatmul.msk.f32.gmra.mxu1 %vm625_vm1, %v3708_v57 }
 0x145   : > { %1200 = vmatmul.f32.gmra.mxu3 %v3319_v9  ;;  %v876_v5 = vpop.f32.mrf.mxu2 }
 0x146   : > { %v877_v26 = vadd.f32 %v876_v5, %v812_v20  ;;  %v321_v20 = vld [vmem:[%s5143_s1 + $0x190] sm:$0xff] }
 0x147   : > { %v749_v9 = vpop.f32.mrf.mxu0  ;;  %1470 = vmatpush.msrb.mxu0 %v321_v20 }
 0x148   : > { %v750_v59 = vadd.f32 %v749_v9, %v3355_v27  ;;  %v941_v34 = vpop.f32.mrf.mxu3  ;;  %v449_v27 = vld [vmem:[%s5143_s1 + $0x590] sm:$0xff] }
 0x149   : > { %v3731_v29 = vadd.f32 %v941_v34, %v877_v26  ;;  %v814_v60 = vpop.f32.mrf.mxu1  ;;  %1600 = vmatpush.msrb.mxu2 %v449_v27  ;;  %v3765_v34 = vperm.slane %v3343_v23, 1  ;;  %v317_v23 = vld [vmem:[%s5143_s1 + $0x170] sm:$0xff] }
 0x14a   : > { %v815_v48 = vadd.f32 %v814_v60, %v750_v59  ;;  %1008 = vmatmul.f32.gmra.mxu0 %v3728_v41  ;;  %1138 = vmatmul.f32.gmra.mxu2 %v3334_v17  ;;  %v513_v17 = vld [vmem:[%s5143_s1 + $0x790] sm:$0xff]  ;;  %v3771_v60 = vld [vmem:[%s2969_s20 + $0x18] sm:$0xff] }
 0x14b   : > { %1665 = vmatpush.msrb.mxu3 %v513_v17  ;;  %v3760_v59 = vld [vmem:[%s2969_s20 + $0x10] sm:$0xff]  ;;  %1471 = vmatpush.msrb.mxu0 %v317_v23 }
 0x14c   : > { %2413 = vmatmul.msk.f32.gmra.mxu1 %vm625_vm1, %v3734_v31 }
 0x14d   : > { %1203 = vmatmul.f32.gmra.mxu3 %v3338_v21  ;;  %v879_v32 = vpop.f32.mrf.mxu2  ;;  %v385_v21 = vld [vmem:[%s5143_s1 + $0x390] sm:$0xff] }
 0x14e   : > { %v880_v51 = vadd.f32 %v879_v32, %v815_v48  ;;  %1535 = vmatpush.msrb.mxu1 %v385_v21  ;;  %v509_v48 = vld [vmem:[%s5143_s1 + $0x770] sm:$0xff] }
 0x14f   : > { %v964_v5 = vpop.f32.mrf.mxu0  ;;  %1666 = vmatpush.msrb.mxu3 %v509_v48 }
 0x150   : > { %v944_v22 = vpop.f32.mrf.mxu3  ;;  %v965_v7 = vadd.f32 %v964_v5, %v3388_v61  ;;  %v445_v61 = vld [vmem:[%s5143_s1 + $0x570] sm:$0xff] }
 0x151   : > { %v3757_v26 = vadd.f32 %v944_v22, %v880_v51  ;;  %v1029_v58 = vpop.f32.mrf.mxu1  ;;  %1601 = vmatpush.msrb.mxu2 %v445_v61  ;;  %v3793_v22 = vld [vmem:[%s2969_s20 + $0x40] sm:$0xff] }
 0x152   : > { %v1030_v9 = vadd.f32 %v1029_v58, %v965_v7  ;;  %1223 = vmatmul.f32.vlgmr.msra.gmra.mxu0 %v3760_v59  ;;  %1353 = vmatmul.f32.vlgmr.msra.gmra.mxu2 %v3364_v35  ;;  %v3799_v7 = vld [vmem:[%s2969_s20 + $0x48] sm:$0xff] }
 0x154   : > { %2247 = vst [vmem:[%s3767_s4] sm:$0xff] %v1030_v9  ;;  %1288 = vmatmul.f32.vlgmr.msra.gmra.mxu1 %v3771_v60  ;;  %v313_v9 = vld [vmem:[%s5143_s1 + $0x150] sm:$0xff] }
 0x155   : > { %2415 = vmatmul.msk.f32.vlgmr.msra.gmra.mxu3 %vm625_vm1, %v3368_v42  ;;  %v1094_v35 = vpop.f32.mrf.mxu2  ;;  %v381_v42 = vld [vmem:[%s5143_s1 + $0x370] sm:$0xff]  ;;  %1472 = vmatpush.msrb.mxu0 %v313_v9 }
 0x156   : > { %v1095_v27 = vadd.f32 %v1094_v35, %v3765_v34  ;;  %1536 = vmatpush.msrb.mxu1 %v381_v42 }
 0x157   : > { %v967_v32 = vpop.f32.mrf.mxu0 }
 0x158   : > { %v968_v20 = vadd.f32 %v967_v32, %v3411_v24  ;;  %v1159_v17 = vpop.f32.mrf.mxu3  ;;  %v441_v24 = vld [vmem:[%s5143_s1 + $0x550] sm:$0xff] }
 0x159   : > { %v3790_v51 = vadd.f32 %v1159_v17, %v1095_v27  ;;  %v1032_v21 = vpop.f32.mrf.mxu1  ;;  %1602 = vmatpush.msrb.mxu2 %v441_v24  ;;  %v3827_v17 = vld [vmem:[%s2969_s20 + $0x78] sm:$0xff] }
 0x15a   : > { %v1033_v5 = vadd.f32 %v1032_v21, %v968_v20  ;;  %1226 = vmatmul.f32.gmra.mxu0 %v3793_v22  ;;  %1356 = vmatmul.f32.gmra.mxu2 %v3385_v55  ;;  %v505_v55 = vld [vmem:[%s5143_s1 + $0x750] sm:$0xff] }
 0x15b   : > { %1667 = vmatpush.msrb.mxu3 %v505_v55  ;;  %v3821_v20 = vld [vmem:[%s2969_s20 + $0x70] sm:$0xff] }
 0x15c   : > { %2251 = vst [vmem:[%s3767_s4 + $0x20] sm:$0xff] %v1033_v5  ;;  %1291 = vmatmul.f32.gmra.mxu1 %v3799_v7  ;;  %v309_v5 = vld [vmem:[%s5143_s1 + $0x130] sm:$0xff] }
 0x15d   : > { %2416 = vmatmul.msk.f32.gmra.mxu3 %vm625_vm1, %v3391_v0  ;;  %v1097_v58 = vpop.f32.mrf.mxu2  ;;  %v377_v0 = vld [vmem:[%s5143_s1 + $0x350] sm:$0xff]  ;;  %1473 = vmatpush.msrb.mxu0 %v309_v5 }
 0x15e   : > { %v1098_v61 = vadd.f32 %v1097_v58, %v3765_v34  ;;  %1537 = vmatpush.msrb.mxu1 %v377_v0 }
 0x15f   : > { %v970_v35 = vpop.f32.mrf.mxu0 }
 0x160   : > { %v971_v23 = vadd.f32 %v970_v35, %v3437_v52  ;;  %v1162_v48 = vpop.f32.mrf.mxu3  ;;  %v437_v52 = vld [vmem:[%s5143_s1 + $0x530] sm:$0xff] }
 0x161   : > { %v3818_v27 = vadd.f32 %v1162_v48, %v1098_v61  ;;  %v1035_v42 = vpop.f32.mrf.mxu1  ;;  %1603 = vmatpush.msrb.mxu2 %v437_v52  ;;  %v3855_v48 = vld [vmem:[%s2969_s20 + $0xa8] sm:$0xff] }
 0x162   : > { %v1036_v32 = vadd.f32 %v1035_v42, %v971_v23  ;;  %1229 = vmatmul.f32.gmra.mxu0 %v3821_v20  ;;  %1359 = vmatmul.f32.gmra.mxu2 %v3408_v15  ;;  %v501_v15 = vld [vmem:[%s5143_s1 + $0x730] sm:$0xff]  ;;  %v3849_v23 = vld [vmem:[%s2969_s20 + $0xa0] sm:$0xff] }
 0x163   : > { %1668 = vmatpush.msrb.mxu3 %v501_v15 }
 0x164   : > { %2255 = vst [vmem:[%s3767_s4 + $0x40] sm:$0xff] %v1036_v32  ;;  %1294 = vmatmul.f32.gmra.mxu1 %v3827_v17  ;;  %v305_v32 = vld [vmem:[%s5143_s1 + $0x110] sm:$0xff] }
 0x165   : > { %2417 = vmatmul.msk.f32.gmra.mxu3 %vm625_vm1, %v3414_v25  ;;  %v1100_v21 = vpop.f32.mrf.mxu2  ;;  %v373_v25 = vld [vmem:[%s5143_s1 + $0x330] sm:$0xff]  ;;  %1474 = vmatpush.msrb.mxu0 %v305_v32 }
 0x166   : > { %v1101_v24 = vadd.f32 %v1100_v21, %v3765_v34  ;;  %1538 = vmatpush.msrb.mxu1 %v373_v25 }
 0x167   : > { %v973_v58 = vpop.f32.mrf.mxu0 }
 0x168   : > { %v974_v9 = vadd.f32 %v973_v58, %v3460_v14  ;;  %v1165_v55 = vpop.f32.mrf.mxu3  ;;  %v433_v14 = vld [vmem:[%s5143_s1 + $0x510] sm:$0xff] }
 0x169   : > { %v3846_v61 = vadd.f32 %v1165_v55, %v1101_v24  ;;  %v1038_v0 = vpop.f32.mrf.mxu1  ;;  %1604 = vmatpush.msrb.mxu2 %v433_v14  ;;  %v3883_v55 = vld [vmem:[%s2969_s20 + $0xd8] sm:$0xff] }
 0x16a   : > { %v1039_v35 = vadd.f32 %v1038_v0, %v974_v9  ;;  %1232 = vmatmul.f32.gmra.mxu0 %v3849_v23  ;;  %1362 = vmatmul.f32.gmra.mxu2 %v3434_v46  ;;  %v497_v46 = vld [vmem:[%s5143_s1 + $0x710] sm:$0xff] }
 0x16b   : > { %1669 = vmatpush.msrb.mxu3 %v497_v46  ;;  %v3877_v9 = vld [vmem:[%s2969_s20 + $0xd0] sm:$0xff] }
 0x16c   : > { %2259 = vst [vmem:[%s3767_s4 + $0x60] sm:$0xff] %v1039_v35  ;;  %1297 = vmatmul.f32.gmra.mxu1 %v3855_v48  ;;  %v301_v35 = vld [vmem:[%s5143_s1 + $0xf0] sm:$0xff] }
 0x16d   : > { %2418 = vmatmul.msk.f32.gmra.mxu3 %vm625_vm1, %v3440_v62  ;;  %v1103_v42 = vpop.f32.mrf.mxu2  ;;  %v369_v62 = vld [vmem:[%s5143_s1 + $0x310] sm:$0xff]  ;;  %1475 = vmatpush.msrb.mxu0 %v301_v35 }
 0x16e   : > { %v1104_v52 = vadd.f32 %v1103_v42, %v3765_v34  ;;  %1539 = vmatpush.msrb.mxu1 %v369_v62 }
 0x16f   : > { %v976_v21 = vpop.f32.mrf.mxu0 }
 0x170   : > { %v977_v5 = vadd.f32 %v976_v21, %v3486_v28  ;;  %v1168_v15 = vpop.f32.mrf.mxu3  ;;  %v429_v28 = vld [vmem:[%s5143_s1 + $0x4f0] sm:$0xff] }
 0x171   : > { %v3874_v24 = vadd.f32 %v1168_v15, %v1104_v52  ;;  %v1041_v25 = vpop.f32.mrf.mxu1  ;;  %1605 = vmatpush.msrb.mxu2 %v429_v28  ;;  %v3911_v15 = vld [vmem:[%s2969_s20 + $0x108] sm:$0xff] }
 0x172   : > { %v1042_v58 = vadd.f32 %v1041_v25, %v977_v5  ;;  %1235 = vmatmul.f32.gmra.mxu0 %v3877_v9  ;;  %1365 = vmatmul.f32.gmra.mxu2 %v3457_v6  ;;  %v493_v6 = vld [vmem:[%s5143_s1 + $0x6f0] sm:$0xff]  ;;  %v3905_v5 = vld [vmem:[%s2969_s20 + $0x100] sm:$0xff] }
 0x173   : > { %1670 = vmatpush.msrb.mxu3 %v493_v6 }
 0x174   : > { %2263 = vst [vmem:[%s3767_s4 + $0x80] sm:$0xff] %v1042_v58  ;;  %1300 = vmatmul.f32.gmra.mxu1 %v3883_v55  ;;  %v297_v58 = vld [vmem:[%s5143_s1 + $0xd0] sm:$0xff] }
 0x175   : > { %2419 = vmatmul.msk.f32.gmra.mxu3 %vm625_vm1, %v3463_v12  ;;  %v1106_v0 = vpop.f32.mrf.mxu2  ;;  %v365_v12 = vld [vmem:[%s5143_s1 + $0x2f0] sm:$0xff]  ;;  %1476 = vmatpush.msrb.mxu0 %v297_v58 }
 0x176   : > { %v1107_v14 = vadd.f32 %v1106_v0, %v3765_v34  ;;  %1540 = vmatpush.msrb.mxu1 %v365_v12 }
 0x177   : > { %v979_v42 = vpop.f32.mrf.mxu0 }
 0x178   : > { %v980_v32 = vadd.f32 %v979_v42, %v3509_v8  ;;  %v1171_v46 = vpop.f32.mrf.mxu3  ;;  %v425_v8 = vld [vmem:[%s5143_s1 + $0x4d0] sm:$0xff] }
 0x179   : > { %v3902_v52 = vadd.f32 %v1171_v46, %v1107_v14  ;;  %v1044_v62 = vpop.f32.mrf.mxu1  ;;  %1606 = vmatpush.msrb.mxu2 %v425_v8  ;;  %v3939_v46 = vld [vmem:[%s2969_s20 + $0x138] sm:$0xff] }
 0x17a   : > { %v1045_v21 = vadd.f32 %v1044_v62, %v980_v32  ;;  %1238 = vmatmul.f32.gmra.mxu0 %v3905_v5  ;;  %1368 = vmatmul.f32.gmra.mxu2 %v3483_v37  ;;  %v489_v37 = vld [vmem:[%s5143_s1 + $0x6d0] sm:$0xff] }
 0x17b   : > { %1671 = vmatpush.msrb.mxu3 %v489_v37  ;;  %v3933_v32 = vld [vmem:[%s2969_s20 + $0x130] sm:$0xff] }
 0x17c   : > { %2267 = vst [vmem:[%s3767_s4 + $0xa0] sm:$0xff] %v1045_v21  ;;  %1303 = vmatmul.f32.gmra.mxu1 %v3911_v15  ;;  %v293_v21 = vld [vmem:[%s5143_s1 + $0xb0] sm:$0xff] }
 0x17d   : > { %2420 = vmatmul.msk.f32.gmra.mxu3 %vm625_vm1, %v3489_v47  ;;  %v1109_v25 = vpop.f32.mrf.mxu2  ;;  %v361_v47 = vld [vmem:[%s5143_s1 + $0x2d0] sm:$0xff]  ;;  %1477 = vmatpush.msrb.mxu0 %v293_v21 }
 0x17e   : > { %v1110_v28 = vadd.f32 %v1109_v25, %v3765_v34  ;;  %1541 = vmatpush.msrb.mxu1 %v361_v47 }
 0x17f   : > { %v982_v0 = vpop.f32.mrf.mxu0 }
 0x180   : > { %v983_v35 = vadd.f32 %v982_v0, %v3532_v45  ;;  %v1174_v6 = vpop.f32.mrf.mxu3  ;;  %v421_v45 = vld [vmem:[%s5143_s1 + $0x4b0] sm:$0xff] }
 0x181   : > { %v3930_v14 = vadd.f32 %v1174_v6, %v1110_v28  ;;  %v1047_v12 = vpop.f32.mrf.mxu1  ;;  %1607 = vmatpush.msrb.mxu2 %v421_v45  ;;  %v3967_v6 = vld [vmem:[%s2969_s20 + $0x168] sm:$0xff] }
 0x182   : > { %v1048_v42 = vadd.f32 %v1047_v12, %v983_v35  ;;  %1241 = vmatmul.f32.gmra.mxu0 %v3933_v32  ;;  %1371 = vmatmul.f32.gmra.mxu2 %v3506_v1  ;;  %v485_v1 = vld [vmem:[%s5143_s1 + $0x6b0] sm:$0xff]  ;;  %v3961_v35 = vld [vmem:[%s2969_s20 + $0x160] sm:$0xff] }
 0x183   : > { %1672 = vmatpush.msrb.mxu3 %v485_v1 }
 0x184   : > { %2271 = vst [vmem:[%s3767_s4 + $0xc0] sm:$0xff] %v1048_v42  ;;  %1306 = vmatmul.f32.gmra.mxu1 %v3939_v46  ;;  %v289_v42 = vld [vmem:[%s5143_s1 + $0x90] sm:$0xff] }
 0x185   : > { %2421 = vmatmul.msk.f32.gmra.mxu3 %vm625_vm1, %v3512_v10  ;;  %v1112_v62 = vpop.f32.mrf.mxu2  ;;  %v357_v10 = vld [vmem:[%s5143_s1 + $0x2b0] sm:$0xff]  ;;  %1478 = vmatpush.msrb.mxu0 %v289_v42 }
 0x186   : > { %v1113_v8 = vadd.f32 %v1112_v62, %v3765_v34  ;;  %1542 = vmatpush.msrb.mxu1 %v357_v10 }
 0x187   : > { %v985_v25 = vpop.f32.mrf.mxu0 }
 0x188   : > { %v986_v58 = vadd.f32 %v985_v25, %v3558_v53  ;;  %v1177_v37 = vpop.f32.mrf.mxu3  ;;  %v417_v53 = vld [vmem:[%s5143_s1 + $0x490] sm:$0xff] }
 0x189   : > { %v3958_v28 = vadd.f32 %v1177_v37, %v1113_v8  ;;  %v1050_v47 = vpop.f32.mrf.mxu1  ;;  %1608 = vmatpush.msrb.mxu2 %v417_v53  ;;  %v3995_v37 = vld [vmem:[%s2969_s20 + $0x198] sm:$0xff] }
 0x18a   : > { %v1051_v0 = vadd.f32 %v1050_v47, %v986_v58  ;;  %1244 = vmatmul.f32.gmra.mxu0 %v3961_v35  ;;  %1374 = vmatmul.f32.gmra.mxu2 %v3529_v30  ;;  %v481_v30 = vld [vmem:[%s5143_s1 + $0x690] sm:$0xff] }
 0x18b   : > { %1673 = vmatpush.msrb.mxu3 %v481_v30  ;;  %v3989_v58 = vld [vmem:[%s2969_s20 + $0x190] sm:$0xff] }
 0x18c   : > { %2275 = vst [vmem:[%s3767_s4 + $0xe0] sm:$0xff] %v1051_v0  ;;  %1309 = vmatmul.f32.gmra.mxu1 %v3967_v6  ;;  %v285_v0 = vld [vmem:[%s5143_s1 + $0x70] sm:$0xff] }
 0x18d   : > { %2422 = vmatmul.msk.f32.gmra.mxu3 %vm625_vm1, %v3535_v40  ;;  %v1115_v12 = vpop.f32.mrf.mxu2  ;;  %v353_v40 = vld [vmem:[%s5143_s1 + $0x290] sm:$0xff]  ;;  %1479 = vmatpush.msrb.mxu0 %v285_v0 }
 0x18e   : > { %v1116_v45 = vadd.f32 %v1115_v12, %v3765_v34  ;;  %1543 = vmatpush.msrb.mxu1 %v353_v40 }
 0x18f   : > { %v988_v62 = vpop.f32.mrf.mxu0 }
 0x190   : > { %v989_v21 = vadd.f32 %v988_v62, %v3581_v44  ;;  %v1180_v1 = vpop.f32.mrf.mxu3  ;;  %v413_v44 = vld [vmem:[%s5143_s1 + $0x470] sm:$0xff] }
 0x191   : > { %v3986_v8 = vadd.f32 %v1180_v1, %v1116_v45  ;;  %v1053_v10 = vpop.f32.mrf.mxu1  ;;  %1609 = vmatpush.msrb.mxu2 %v413_v44  ;;  %v4023_v1 = vld [vmem:[%s2969_s20 + $0x1c8] sm:$0xff] }
 0x192   : > { %v1054_v25 = vadd.f32 %v1053_v10, %v989_v21  ;;  %1247 = vmatmul.f32.gmra.mxu0 %v3989_v58  ;;  %1377 = vmatmul.f32.gmra.mxu2 %v3555_v3  ;;  %v477_v3 = vld [vmem:[%s5143_s1 + $0x670] sm:$0xff]  ;;  %v4017_v21 = vld [vmem:[%s2969_s20 + $0x1c0] sm:$0xff] }
 0x193   : > { %1674 = vmatpush.msrb.mxu3 %v477_v3 }
 0x194   : > { %2279 = vst [vmem:[%s3767_s4 + $0x100] sm:$0xff] %v1054_v25  ;;  %1312 = vmatmul.f32.gmra.mxu1 %v3995_v37  ;;  %v281_v25 = vld [vmem:[%s5143_s1 + $0x50] sm:$0xff] }
 0x195   : > { %2423 = vmatmul.msk.f32.gmra.mxu3 %vm625_vm1, %v3561_v38  ;;  %v1118_v47 = vpop.f32.mrf.mxu2  ;;  %v349_v38 = vld [vmem:[%s5143_s1 + $0x270] sm:$0xff]  ;;  %1480 = vmatpush.msrb.mxu0 %v281_v25 }
 0x196   : > { %v1119_v53 = vadd.f32 %v1118_v47, %v3765_v34  ;;  %1544 = vmatpush.msrb.mxu1 %v349_v38 }
 0x197   : > { %v991_v12 = vpop.f32.mrf.mxu0 }
 0x198   : > { %v992_v42 = vadd.f32 %v991_v12, %v3604_v16  ;;  %v1183_v30 = vpop.f32.mrf.mxu3  ;;  %v409_v16 = vld [vmem:[%s5143_s1 + $0x450] sm:$0xff] }
 0x199   : > { %v4014_v45 = vadd.f32 %v1183_v30, %v1119_v53  ;;  %v1056_v40 = vpop.f32.mrf.mxu1  ;;  %1610 = vmatpush.msrb.mxu2 %v409_v16  ;;  %v4051_v30 = vld [vmem:[%s2969_s20 + $0x1f8] sm:$0xff] }
 0x19a   : > { %v1057_v62 = vadd.f32 %v1056_v40, %v992_v42  ;;  %1250 = vmatmul.f32.gmra.mxu0 %v4017_v21  ;;  %1380 = vmatmul.f32.gmra.mxu2 %v3578_v33  ;;  %v473_v33 = vld [vmem:[%s5143_s1 + $0x650] sm:$0xff] }
 0x19b   : > { %1675 = vmatpush.msrb.mxu3 %v473_v33  ;;  %v4045_v42 = vld [vmem:[%s2969_s20 + $0x1f0] sm:$0xff] }
 0x19c   : > { %2283 = vst [vmem:[%s3767_s4 + $0x120] sm:$0xff] %v1057_v62  ;;  %1315 = vmatmul.f32.gmra.mxu1 %v4023_v1  ;;  %v277_v62 = vld [vmem:[%s5143_s1 + $0x30] sm:$0xff] }
 0x19d   : > { %2424 = vmatmul.msk.f32.gmra.mxu3 %vm625_vm1, %v3584_v49  ;;  %v1121_v10 = vpop.f32.mrf.mxu2  ;;  %v345_v49 = vld [vmem:[%s5143_s1 + $0x250] sm:$0xff]  ;;  %1481 = vmatpush.msrb.mxu0 %v277_v62 }
 0x19e   : > { %v1122_v44 = vadd.f32 %v1121_v10, %v3765_v34  ;;  %1545 = vmatpush.msrb.mxu1 %v345_v49 }
 0x19f   : > { %v994_v47 = vpop.f32.mrf.mxu0 }
 0x1a0   : > { %v995_v0 = vadd.f32 %v994_v47, %v3630_v2  ;;  %v1186_v3 = vpop.f32.mrf.mxu3  ;;  %v405_v2 = vld [vmem:[%s5143_s1 + $0x430] sm:$0xff] }
 0x1a1   : > { %v4042_v53 = vadd.f32 %v1186_v3, %v1122_v44  ;;  %v1059_v38 = vpop.f32.mrf.mxu1  ;;  %1611 = vmatpush.msrb.mxu2 %v405_v2  ;;  %v4079_v3 = vld [vmem:[%s2969_s20 + $0x228] sm:$0xff] }
 0x1a2   : > { %v1060_v12 = vadd.f32 %v1059_v38, %v995_v0  ;;  %1253 = vmatmul.f32.gmra.mxu0 %v4045_v42  ;;  %1383 = vmatmul.f32.gmra.mxu2 %v3601_v36  ;;  %v469_v36 = vld [vmem:[%s5143_s1 + $0x630] sm:$0xff]  ;;  %v4073_v0 = vld [vmem:[%s2969_s20 + $0x220] sm:$0xff] }
 0x1a3   : > { %1676 = vmatpush.msrb.mxu3 %v469_v36 }
 0x1a4   : > { %2287 = vst [vmem:[%s3767_s4 + $0x140] sm:$0xff] %v1060_v12  ;;  %1318 = vmatmul.f32.gmra.mxu1 %v4051_v30  ;;  %v273_v12 = vld [vmem:[%s5143_s1 + $0x10] sm:$0xff] }
 0x1a5   : > { %2425 = vmatmul.msk.f32.gmra.mxu3 %vm625_vm1, %v3607_v19  ;;  %v1124_v40 = vpop.f32.mrf.mxu2  ;;  %v341_v19 = vld [vmem:[%s5143_s1 + $0x230] sm:$0xff]  ;;  %1482 = vmatpush.msrb.mxu0 %v273_v12 }
 0x1a6   : > { %v1125_v16 = vadd.f32 %v1124_v40, %v3765_v34  ;;  %1546 = vmatpush.msrb.mxu1 %v341_v19 }
 0x1a7   : > { %v997_v10 = vpop.f32.mrf.mxu0 }
 0x1a8   : > { %v998_v25 = vadd.f32 %v997_v10, %v3653_v11  ;;  %v1189_v33 = vpop.f32.mrf.mxu3  ;;  %v401_v11 = vld [vmem:[%s5143_s1 + $0x410] sm:$0xff] }
 0x1a9   : > { %v4070_v44 = vadd.f32 %v1189_v33, %v1125_v16  ;;  %v1062_v49 = vpop.f32.mrf.mxu1  ;;  %1612 = vmatpush.msrb.mxu2 %v401_v11  ;;  %v334_v33 = vld [vmem:[%s5143_s1 + $0x1f8] sm:$0xff] }
 0x1aa   : > { %v1063_v47 = vadd.f32 %v1062_v49, %v998_v25  ;;  %1256 = vmatmul.f32.gmra.mxu0 %v4073_v0  ;;  %1386 = vmatmul.f32.gmra.mxu2 %v3627_v13  ;;  %v465_v13 = vld [vmem:[%s5143_s1 + $0x610] sm:$0xff]  ;;  %v4110_v49 = vld [vmem:[%s2969_s20 + $0x258] sm:$0xff] }
 0x1ab   : > { %1677 = vmatpush.msrb.mxu3 %v465_v13  ;;  %v4101_v25 = vld [vmem:[%s2969_s20 + $0x250] sm:$0xff]  ;;  %1857 = vmatpush.msra.mxu2 %v334_v33 }
 0x1ac   : > { %2291 = vst [vmem:[%s3767_s4 + $0x160] sm:$0xff] %v1063_v47  ;;  %1321 = vmatmul.f32.gmra.mxu1 %v4079_v3  ;;  %v589_v47 = vld [vmem:[%s5143_s1 + $0x9f0] sm:$0xff] }
 0x1ad   : > { %2426 = vmatmul.msk.f32.gmra.mxu3 %vm625_vm1, %v3633_v56  ;;  %v1127_v38 = vpop.f32.mrf.mxu2  ;;  %v337_v56 = vld [vmem:[%s5143_s1 + $0x210] sm:$0xff]  ;;  %1727 = vmatpush.msra.mxu0 %v589_v47 }
 0x1ae   : > { %v1128_v2 = vadd.f32 %v1127_v38, %v3765_v34  ;;  %1547 = vmatpush.msrb.mxu1 %v337_v56  ;;  %v613_v38 = vld [vmem:[%s5143_s1 + $0xab0] sm:$0x1] }
 0x1af   : > { %v1000_v40 = vpop.f32.mrf.mxu0 }
 0x1b0   : > { %v1001_v62 = vadd.f32 %v1000_v40, %v3679_v4  ;;  %v1192_v36 = vpop.f32.mrf.mxu3  ;;  %2431 = vmatpush.msk.msra.mxu1 %vm674_vm0, %v613_v38 }
 0x1b1   : > { %v4098_v16 = vadd.f32 %v1192_v36, %v1128_v2  ;;  %v1065_v19 = vpop.f32.mrf.mxu1  ;;  %v330_v36 = vld [vmem:[%s5143_s1 + $0x1d8] sm:$0xff] }
 0x1b2   : > { %v1066_v10 = vadd.f32 %v1065_v19, %v1001_v62  ;;  %1259 = vmatmul.f32.gmra.mxu0 %v4101_v25  ;;  %1389 = vmatmul.f32.gmra.mxu2 %v3650_v18  ;;  %v398_v18 = vld [vmem:[%s5143_s1 + $0x3f8] sm:$0xff]  ;;  %v4130_v62 = vld [vmem:[%s2969_s20 + $0x280] sm:$0xff]  ;;  %v4139_v19 = vld [vmem:[%s2969_s20 + $0x288] sm:$0xff] }
 0x1b3   : > { %1922 = vmatpush.msra.mxu3 %v398_v18  ;;  %1858 = vmatpush.msra.mxu2 %v330_v36 }
 0x1b4   : > { %2295 = vst [vmem:[%s3767_s4 + $0x180] sm:$0xff] %v1066_v10  ;;  %1324 = vmatmul.f32.gmra.mxu1 %v4110_v49  ;;  %v394_v10 = vld [vmem:[%s5143_s1 + $0x3d8] sm:$0xff] }
 0x1b5   : > { %2427 = vmatmul.msk.f32.gmra.mxu3 %vm625_vm1, %v3656_v43  ;;  %v1130_v4 = vpop.f32.mrf.mxu2 }
 0x1b6   : > { %v1131_v11 = vadd.f32 %v1130_v4, %v3765_v34  ;;  %1923 = vmatpush.msra.mxu3 %v394_v10 }
 0x1b7   : > { %v1003_v43 = vpop.f32.mrf.mxu0 }
 0x1b8   : > { %v1004_v12 = vadd.f32 %v1003_v43, %v3705_v54  ;;  %v1195_v13 = vpop.f32.mrf.mxu3  ;;  %v4155_v43 = vld [vmem:[%s2969_s20 + $0x2b0] sm:$0xff] }
 0x1b9   : > { %v4127_v2 = vadd.f32 %v1195_v13, %v1131_v11  ;;  %v1068_v56 = vpop.f32.mrf.mxu1  ;;  %v4164_v13 = vld [vmem:[%s2969_s20 + $0x2b8] sm:$0xff] }
 0x1ba   : > { %v1069_v40 = vadd.f32 %v1068_v56, %v1004_v12  ;;  %1262 = vmatmul.f32.gmra.mxu0 %v4130_v62  ;;  %1392 = vmatmul.f32.gmra.mxu2 %v3676_v50  ;;  %v585_v50 = vld [vmem:[%s5143_s1 + $0x9d0] sm:$0xff]  ;;  %v326_v12 = vld [vmem:[%s5143_s1 + $0x1b8] sm:$0xff] }
 0x1bb   : > { %1728 = vmatpush.msra.mxu0 %v585_v50  ;;  %1859 = vmatpush.msra.mxu2 %v326_v12  ;;  %v390_v56 = vld [vmem:[%s5143_s1 + $0x3b8] sm:$0xff] }
 0x1bc   : > { %2299 = vst [vmem:[%s3767_s4 + $0x1a0] sm:$0xff] %v1069_v40  ;;  %1327 = vmatmul.f32.gmra.mxu1 %v4139_v19  ;;  %1924 = vmatpush.msra.mxu3 %v390_v56 }
 0x1bd   : > { %2428 = vmatmul.msk.f32.gmra.mxu3 %vm625_vm1, %v3682_v39  ;;  %v1133_v54 = vpop.f32.mrf.mxu2 }
 0x1be   : > { %v1134_v33 = vadd.f32 %v1133_v54, %v3765_v34 }
 0x1bf   : > { %v1006_v4 = vpop.f32.mrf.mxu0 }
 0x1c0   : > { %v1007_v47 = vadd.f32 %v1006_v4, %v3731_v29  ;;  %v1198_v18 = vpop.f32.mrf.mxu3  ;;  %v4180_v4 = vld [vmem:[%s2969_s20 + $0x2e0] sm:$0xff] }
 0x1c1   : > { %v4152_v39 = vadd.f32 %v1198_v18, %v1134_v33  ;;  %v1071_v11 = vpop.f32.mrf.mxu1  ;;  %v4189_v18 = vld [vmem:[%s2969_s20 + $0x2e8] sm:$0xff] }
 0x1c2   : > { %v1072_v38 = vadd.f32 %v1071_v11, %v1007_v47  ;;  %1265 = vmatmul.f32.gmra.mxu0 %v4155_v43  ;;  %1395 = vmatmul.f32.gmra.mxu2 %v3702_v63  ;;  %v581_v63 = vld [vmem:[%s5143_s1 + $0x9b0] sm:$0xff]  ;;  %v322_v47 = vld [vmem:[%s5143_s1 + $0x198] sm:$0xff] }
 0x1c3   : > { %1729 = vmatpush.msra.mxu0 %v581_v63  ;;  %1860 = vmatpush.msra.mxu2 %v322_v47  ;;  %v577_v11 = vld [vmem:[%s5143_s1 + $0x990] sm:$0xff] }
 0x1c4   : > { %2303 = vst [vmem:[%s3767_s4 + $0x1c0] sm:$0xff] %v1072_v38  ;;  %1330 = vmatmul.f32.gmra.mxu1 %v4164_v13  ;;  %v386_v38 = vld [vmem:[%s5143_s1 + $0x398] sm:$0xff] }
 0x1c5   : > { %2429 = vmatmul.msk.f32.gmra.mxu3 %vm625_vm1, %v3708_v57  ;;  %v1136_v29 = vpop.f32.mrf.mxu2  ;;  %1730 = vmatpush.msra.mxu0 %v577_v11 }
 0x1c6   : > { %v1137_v40 = vadd.f32 %v1136_v29, %v3765_v34  ;;  %1925 = vmatpush.msra.mxu3 %v386_v38 }
 0x1c7   : > { %v1009_v36 = vpop.f32.mrf.mxu0 }
 0x1c8   : > { %v1010_v54 = vadd.f32 %v1009_v36, %v3757_v26  ;;  %v1201_v50 = vpop.f32.mrf.mxu3  ;;  %v4208_v36 = vld [vmem:[%s2969_s20] sm:$0xff] }
 0x1c9   : > { %v4177_v57 = vadd.f32 %v1201_v50, %v1137_v40  ;;  %v1074_v10 = vpop.f32.mrf.mxu1  ;;  %v4216_v50 = vld [vmem:[%s2969_s20 + $0x8] sm:$0xff] }
 0x1ca   : > { %v1075_v33 = vadd.f32 %v1074_v10, %v1010_v54  ;;  %1268 = vmatmul.f32.gmra.mxu0 %v4180_v4  ;;  %1398 = vmatmul.f32.gmra.mxu2 %v3728_v41  ;;  %v609_v41 = vld [vmem:[%s5143_s1 + $0xa90] sm:$0xff] }
 0x1cb   : > { %1803 = vmatpush.msra.mxu1 %v609_v41  ;;  %v573_v10 = vld [vmem:[%s5143_s1 + $0x970] sm:$0xff] }
 0x1cc   : > { %2307 = vst [vmem:[%s3767_s4 + $0x1e0] sm:$0xff] %v1075_v33  ;;  %1333 = vmatmul.f32.gmra.mxu1 %v4189_v18  ;;  %1731 = vmatpush.msra.mxu0 %v573_v10 }
 0x1cd   : > { %2430 = vmatmul.msk.f32.gmra.mxu3 %vm625_vm1, %v3734_v31  ;;  %v1139_v26 = vpop.f32.mrf.mxu2 }
 0x1ce   : > { %v1140_v12 = vadd.f32 %v1139_v26, %v3765_v34  ;;  %v318_v34 = vld [vmem:[%s5143_s1 + $0x178] sm:$0xff] }
 0x1cf   : > { %v1224_v29 = vpop.f32.mrf.mxu0  ;;  %1861 = vmatpush.msra.mxu2 %v318_v34 }
 0x1d0   : > { %v1204_v31 = vpop.f32.mrf.mxu3  ;;  %v1225_v63 = vadd.f32 %v1224_v29, %v3790_v51 }
 0x1d1   : > { %v4205_v56 = vadd.f32 %v1204_v31, %v1140_v12  ;;  %v1289_v40 = vpop.f32.mrf.mxu1  ;;  %v314_v12 = vld [vmem:[%s5143_s1 + $0x158] sm:$0xff] }
 0x1d2   : > { %1483 = vmatmul.f32.vlgmr.msrb.gmra.mxu0 %v4208_v36  ;;  %1613 = vmatmul.f32.vlgmr.msrb.gmra.mxu2 %v3760_v59  ;;  %v1290_v54 = vadd.f32 %v1289_v40, %v1225_v63  ;;  %v382_v59 = vld [vmem:[%s5143_s1 + $0x378] sm:$0xff] }
 0x1d3   : > { %1926 = vmatpush.msra.mxu3 %v382_v59  ;;  %v4237_v31 = vld [vmem:[%s2969_s20 + $0x38] sm:$0xff]  ;;  %1862 = vmatpush.msra.mxu2 %v314_v12 }
 0x1d4   : > { %1548 = vmatmul.f32.vlgmr.msrb.gmra.mxu1 %v4216_v50  ;;  %v378_v63 = vld [vmem:[%s5143_s1 + $0x358] sm:$0xff] }
 0x1d5   : > { %1678 = vmatmul.f32.vlgmr.msrb.gmra.mxu3 %v3771_v60  ;;  %v1354_v51 = vpop.f32.mrf.mxu2  ;;  %v4228_v60 = vld [vmem:[%s2969_s20 + $0x30] sm:$0xff] }
 0x1d6   : > { %v1355_v33 = vadd.f32 %v1354_v51, %v1290_v54  ;;  %1927 = vmatpush.msra.mxu3 %v378_v63  ;;  %v4273_v63 = vld [vmem:[%s2969_s20 + $0x90] sm:$0xff] }
 0x1d7   : > { %v1227_v47 = vpop.f32.mrf.mxu0 }
 0x1d8   : > { %v1228_v26 = vadd.f32 %v1227_v47, %v3818_v27  ;;  %v1419_v11 = vpop.f32.mrf.mxu3  ;;  %v310_v47 = vld [vmem:[%s5143_s1 + $0x138] sm:$0xff] }
 0x1d9   : > { %v1420_v41 = vadd.f32 %v1419_v11, %v1355_v33  ;;  %v1292_v38 = vpop.f32.mrf.mxu1  ;;  %v605_v33 = vld [vmem:[%s5143_s1 + $0xa70] sm:$0xff]  ;;  %1863 = vmatpush.msra.mxu2 %v310_v47 }
 0x1da   : > { %1486 = vmatmul.f32.gmra.mxu0 %v4228_v60  ;;  %1616 = vmatmul.f32.gmra.mxu2 %v3793_v22  ;;  %v1293_v29 = vadd.f32 %v1292_v38, %v1228_v26  ;;  %v569_v22 = vld [vmem:[%s5143_s1 + $0x950] sm:$0xff] }
 0x1db   : > { %2248 = vst [vmem:[%s3767_s4 + $0x8] sm:$0xff] %v1420_v41  ;;  %1732 = vmatpush.msra.mxu0 %v569_v22  ;;  %1804 = vmatpush.msra.mxu1 %v605_v33  ;;  %v565_v11 = vld [vmem:[%s5143_s1 + $0x930] sm:$0xff]  ;;  %v374_v41 = vld [vmem:[%s5143_s1 + $0x338] sm:$0xff] }
 0x1dc   : > { %1551 = vmatmul.f32.gmra.mxu1 %v4237_v31  ;;  %1928 = vmatpush.msra.mxu3 %v374_v41 }
 0x1dd   : > { %1681 = vmatmul.f32.gmra.mxu3 %v3799_v7  ;;  %v1357_v27 = vpop.f32.mrf.mxu2  ;;  %v4249_v7 = vld [vmem:[%s2969_s20 + $0x60] sm:$0xff]  ;;  %1733 = vmatpush.msra.mxu0 %v565_v11  ;;  %v302_v11 = vld [vmem:[%s5143_s1 + $0xf8] sm:$0xff] }
 0x1de   : > { %v1358_v40 = vadd.f32 %v1357_v27, %v1293_v29 }
 0x1df   : > { %v1230_v34 = vpop.f32.mrf.mxu0 }
 0x1e0   : > { %v1231_v54 = vadd.f32 %v1230_v34, %v3846_v61  ;;  %v1422_v51 = vpop.f32.mrf.mxu3  ;;  %v4261_v61 = vld [vmem:[%s2969_s20 + $0x68] sm:$0xff] }
 0x1e1   : > { %v1423_v10 = vadd.f32 %v1422_v51, %v1358_v40  ;;  %v1295_v59 = vpop.f32.mrf.mxu1  ;;  %v306_v40 = vld [vmem:[%s5143_s1 + $0x118] sm:$0xff] }
 0x1e2   : > { %1489 = vmatmul.f32.gmra.mxu0 %v4249_v7  ;;  %1619 = vmatmul.f32.gmra.mxu2 %v3821_v20  ;;  %v1296_v26 = vadd.f32 %v1295_v59, %v1231_v54  ;;  %v4282_v54 = vld [vmem:[%s2969_s20 + $0x98] sm:$0xff] }
 0x1e3   : > { %2252 = vst [vmem:[%s3767_s4 + $0x28] sm:$0xff] %v1423_v10  ;;  %1864 = vmatpush.msra.mxu2 %v306_v40  ;;  %v370_v51 = vld [vmem:[%s5143_s1 + $0x318] sm:$0xff] }
 0x1e4   : > { %1554 = vmatmul.f32.gmra.mxu1 %v4261_v61  ;;  %1929 = vmatpush.msra.mxu3 %v370_v51 }
 0x1e5   : > { %1684 = vmatmul.f32.gmra.mxu3 %v3827_v17  ;;  %v1360_v20 = vpop.f32.mrf.mxu2  ;;  %1865 = vmatpush.msra.mxu2 %v302_v11 }
 0x1e6   : > { %v1361_v38 = vadd.f32 %v1360_v20, %v1296_v26 }
 0x1e7   : > { %v1233_v12 = vpop.f32.mrf.mxu0 }
 0x1e8   : > { %v1234_v29 = vadd.f32 %v1233_v12, %v3874_v24  ;;  %v1425_v27 = vpop.f32.mrf.mxu3  ;;  %v366_v12 = vld [vmem:[%s5143_s1 + $0x2f8] sm:$0xff] }
 0x1e9   : > { %v1426_v17 = vadd.f32 %v1425_v27, %v1361_v38  ;;  %v1298_v22 = vpop.f32.mrf.mxu1  ;;  %v4303_v38 = vld [vmem:[%s2969_s20 + $0xc8] sm:$0xff]  ;;  %1930 = vmatpush.msra.mxu3 %v366_v12  ;;  %v601_v27 = vld [vmem:[%s5143_s1 + $0xa50] sm:$0xff] }
 0x1ea   : > { %1492 = vmatmul.f32.gmra.mxu0 %v4273_v63  ;;  %1622 = vmatmul.f32.gmra.mxu2 %v3849_v23  ;;  %v1299_v34 = vadd.f32 %v1298_v22, %v1234_v29  ;;  %v561_v23 = vld [vmem:[%s5143_s1 + $0x910] sm:$0xff]  ;;  %v4348_v12 = vld [vmem:[%s2969_s20 + $0x128] sm:$0xff] }
 0x1eb   : > { %2256 = vst [vmem:[%s3767_s4 + $0x48] sm:$0xff] %v1426_v17  ;;  %1734 = vmatpush.msra.mxu0 %v561_v23  ;;  %1805 = vmatpush.msra.mxu1 %v601_v27  ;;  %v298_v23 = vld [vmem:[%s5143_s1 + $0xd8] sm:$0xff] }
 0x1ec   : > { %1557 = vmatmul.f32.gmra.mxu1 %v4282_v54  ;;  %1866 = vmatpush.msra.mxu2 %v298_v23  ;;  %v290_v23 = vld [vmem:[%s5143_s1 + $0x98] sm:$0xff] }
 0x1ed   : > { %1687 = vmatmul.f32.gmra.mxu3 %v3855_v48  ;;  %v1363_v24 = vpop.f32.mrf.mxu2  ;;  %v4294_v48 = vld [vmem:[%s2969_s20 + $0xc0] sm:$0xff] }
 0x1ee   : > { %v1364_v10 = vadd.f32 %v1363_v24, %v1299_v34  ;;  %v4318_v24 = vld [vmem:[%s2969_s20 + $0xf0] sm:$0xff] }
 0x1ef   : > { %v1236_v59 = vpop.f32.mrf.mxu0 }
 0x1f0   : > { %v1237_v33 = vadd.f32 %v1236_v59, %v3902_v52  ;;  %v1428_v47 = vpop.f32.mrf.mxu3  ;;  %v362_v59 = vld [vmem:[%s5143_s1 + $0x2d8] sm:$0xff] }
 0x1f1   : > { %v1429_v26 = vadd.f32 %v1428_v47, %v1364_v10  ;;  %v1301_v20 = vpop.f32.mrf.mxu1  ;;  %v4327_v10 = vld [vmem:[%s2969_s20 + $0xf8] sm:$0xff]  ;;  %1931 = vmatpush.msra.mxu3 %v362_v59 }
 0x1f2   : > { %1495 = vmatmul.f32.gmra.mxu0 %v4294_v48  ;;  %1625 = vmatmul.f32.gmra.mxu2 %v3877_v9  ;;  %v1302_v41 = vadd.f32 %v1301_v20, %v1237_v33  ;;  %v557_v9 = vld [vmem:[%s5143_s1 + $0x8f0] sm:$0xff]  ;;  %v354_v59 = vld [vmem:[%s5143_s1 + $0x298] sm:$0xff] }
 0x1f3   : > { %2260 = vst [vmem:[%s3767_s4 + $0x68] sm:$0xff] %v1429_v26  ;;  %1735 = vmatpush.msra.mxu0 %v557_v9 }
 0x1f4   : > { %1560 = vmatmul.f32.gmra.mxu1 %v4303_v38 }
 0x1f5   : > { %1690 = vmatmul.f32.gmra.mxu3 %v3883_v55  ;;  %v1366_v52 = vpop.f32.mrf.mxu2 }
 0x1f6   : > { %v1367_v29 = vadd.f32 %v1366_v52, %v1302_v41  ;;  %v294_v52 = vld [vmem:[%s5143_s1 + $0xb8] sm:$0xff] }
 0x1f7   : > { %v1239_v17 = vpop.f32.mrf.mxu0  ;;  %1867 = vmatpush.msra.mxu2 %v294_v52  ;;  %v286_v52 = vld [vmem:[%s5143_s1 + $0x78] sm:$0xff] }
 0x1f8   : > { %v1240_v55 = vadd.f32 %v1239_v17, %v3930_v14  ;;  %v1431_v22 = vpop.f32.mrf.mxu3 }
 0x1f9   : > { %v1432_v40 = vadd.f32 %v1431_v22, %v1367_v29  ;;  %v1304_v34 = vpop.f32.mrf.mxu1  ;;  %v358_v29 = vld [vmem:[%s5143_s1 + $0x2b8] sm:$0xff]  ;;  %1868 = vmatpush.msra.mxu2 %v290_v23 }
 0x1fa   : > { %1498 = vmatmul.f32.gmra.mxu0 %v4318_v24  ;;  %1628 = vmatmul.f32.gmra.mxu2 %v3905_v5  ;;  %v1305_v51 = vadd.f32 %v1304_v34, %v1240_v55  ;;  %v553_v5 = vld [vmem:[%s5143_s1 + $0x8d0] sm:$0xff] }
 0x1fb   : > { %2264 = vst [vmem:[%s3767_s4 + $0x88] sm:$0xff] %v1432_v40  ;;  %1736 = vmatpush.msra.mxu0 %v553_v5  ;;  %1932 = vmatpush.msra.mxu3 %v358_v29  ;;  %v597_v5 = vld [vmem:[%s5143_s1 + $0xa30] sm:$0xff] }
 0x1fc   : > { %1563 = vmatmul.f32.gmra.mxu1 %v4327_v10  ;;  %1869 = vmatpush.msra.mxu2 %v286_v52  ;;  %v533_v52 = vld [vmem:[%s5143_s1 + $0x830] sm:$0xff] }
 0x1fd   : > { %1693 = vmatmul.f32.gmra.mxu3 %v3911_v15  ;;  %v1369_v14 = vpop.f32.mrf.mxu2  ;;  %v4339_v15 = vld [vmem:[%s2969_s20 + $0x120] sm:$0xff]  ;;  %1806 = vmatpush.msra.mxu1 %v597_v5 }
 0x1fe   : > { %v1370_v33 = vadd.f32 %v1369_v14, %v1305_v51  ;;  %v4369_v14 = vld [vmem:[%s2969_s20 + $0x158] sm:$0xff]  ;;  %1933 = vmatpush.msra.mxu3 %v354_v59 }
 0x1ff   : > { %v1242_v47 = vpop.f32.mrf.mxu0 }
 0x200   : > { %v1243_v26 = vadd.f32 %v1242_v47, %v3958_v28  ;;  %v1434_v20 = vpop.f32.mrf.mxu3 }
 0x201   : > { %v1435_v11 = vadd.f32 %v1434_v20, %v1370_v33  ;;  %v1307_v41 = vpop.f32.mrf.mxu1 }
 0x202   : > { %1501 = vmatmul.f32.gmra.mxu0 %v4339_v15  ;;  %1631 = vmatmul.f32.gmra.mxu2 %v3933_v32  ;;  %v1308_v9 = vadd.f32 %v1307_v41, %v1243_v26  ;;  %v549_v32 = vld [vmem:[%s5143_s1 + $0x8b0] sm:$0xff]  ;;  %v4384_v41 = vld [vmem:[%s2969_s20 + $0x180] sm:$0xff] }
 0x203   : > { %2268 = vst [vmem:[%s3767_s4 + $0xa8] sm:$0xff] %v1435_v11  ;;  %1737 = vmatpush.msra.mxu0 %v549_v32  ;;  %v350_v32 = vld [vmem:[%s5143_s1 + $0x278] sm:$0xff] }
 0x204   : > { %1566 = vmatmul.f32.gmra.mxu1 %v4348_v12  ;;  %1934 = vmatpush.msra.mxu3 %v350_v32 }
 0x205   : > { %1696 = vmatmul.f32.gmra.mxu3 %v3939_v46  ;;  %v1372_v28 = vpop.f32.mrf.mxu2  ;;  %v4360_v46 = vld [vmem:[%s2969_s20 + $0x150] sm:$0xff] }
 0x206   : > { %v1373_v27 = vadd.f32 %v1372_v28, %v1308_v9  ;;  %v4393_v28 = vld [vmem:[%s2969_s20 + $0x188] sm:$0xff] }
 0x207   : > { %v1245_v17 = vpop.f32.mrf.mxu0 }
 0x208   : > { %v1246_v55 = vadd.f32 %v1245_v17, %v3986_v8  ;;  %v1437_v22 = vpop.f32.mrf.mxu3 }
 0x209   : > { %v1438_v40 = vadd.f32 %v1437_v22, %v1373_v27  ;;  %v1310_v34 = vpop.f32.mrf.mxu1 }
 0x20a   : > { %1504 = vmatmul.f32.gmra.mxu0 %v4360_v46  ;;  %1634 = vmatmul.f32.gmra.mxu2 %v3961_v35  ;;  %v1311_v51 = vadd.f32 %v1310_v34, %v1246_v55  ;;  %v545_v35 = vld [vmem:[%s5143_s1 + $0x890] sm:$0xff]  ;;  %v282_v34 = vld [vmem:[%s5143_s1 + $0x58] sm:$0xff] }
 0x20b   : > { %2272 = vst [vmem:[%s3767_s4 + $0xc8] sm:$0xff] %v1438_v40  ;;  %1738 = vmatpush.msra.mxu0 %v545_v35  ;;  %1870 = vmatpush.msra.mxu2 %v282_v34  ;;  %v338_v34 = vld [vmem:[%s5143_s1 + $0x218] sm:$0xff] }
 0x20c   : > { %1569 = vmatmul.f32.gmra.mxu1 %v4369_v14 }
 0x20d   : > { %1699 = vmatmul.f32.gmra.mxu3 %v3967_v6  ;;  %v1375_v8 = vpop.f32.mrf.mxu2 }
 0x20e   : > { %v1376_v33 = vadd.f32 %v1375_v8, %v1311_v51  ;;  %v4414_v51 = vld [vmem:[%s2969_s20 + $0x1b8] sm:$0xff] }
 0x20f   : > { %v1248_v47 = vpop.f32.mrf.mxu0  ;;  %v346_v8 = vld [vmem:[%s5143_s1 + $0x258] sm:$0xff] }
 0x210   : > { %v1249_v6 = vadd.f32 %v1248_v47, %v4014_v45  ;;  %v1440_v26 = vpop.f32.mrf.mxu3  ;;  %1935 = vmatpush.msra.mxu3 %v346_v8 }
 0x211   : > { %v1441_v20 = vadd.f32 %v1440_v26, %v1376_v33  ;;  %v1313_v11 = vpop.f32.mrf.mxu1  ;;  %v593_v26 = vld [vmem:[%s5143_s1 + $0xa10] sm:$0xff] }
 0x212   : > { %1507 = vmatmul.f32.gmra.mxu0 %v4384_v41  ;;  %1637 = vmatmul.f32.gmra.mxu2 %v3989_v58  ;;  %v1314_v9 = vadd.f32 %v1313_v11, %v1249_v6  ;;  %v541_v58 = vld [vmem:[%s5143_s1 + $0x870] sm:$0xff] }
 0x213   : > { %2276 = vst [vmem:[%s3767_s4 + $0xe8] sm:$0xff] %v1441_v20  ;;  %1739 = vmatpush.msra.mxu0 %v541_v58  ;;  %v278_v20 = vld [vmem:[%s5143_s1 + $0x38] sm:$0xff]  ;;  %1807 = vmatpush.msra.mxu1 %v593_v26 }
 0x214   : > { %1572 = vmatmul.f32.gmra.mxu1 %v4393_v28  ;;  %1871 = vmatpush.msra.mxu2 %v278_v20  ;;  %v526_v20 = vld [vmem:[%s5143_s1 + $0x7f8] sm:$0xff] }
 0x215   : > { %1702 = vmatmul.f32.gmra.mxu3 %v3995_v37  ;;  %v1378_v45 = vpop.f32.mrf.mxu2  ;;  %v4405_v37 = vld [vmem:[%s2969_s20 + $0x1b0] sm:$0xff]  ;;  %2052 = vmatpush.msrb.mxu1 %v526_v20  ;;  %v4550_v20 = vld [vmem:[%s2969_s20 + $0x2d8] sm:$0xff] }
 0x216   : > { %v1379_v29 = vadd.f32 %v1378_v45, %v1314_v9  ;;  %v342_v9 = vld [vmem:[%s5143_s1 + $0x238] sm:$0xff] }
 0x217   : > { %v1251_v27 = vpop.f32.mrf.mxu0  ;;  %1936 = vmatpush.msra.mxu3 %v342_v9 }
 0x218   : > { %v1252_v17 = vadd.f32 %v1251_v27, %v4042_v53  ;;  %v1443_v55 = vpop.f32.mrf.mxu3 }
 0x219   : > { %v1444_v22 = vadd.f32 %v1443_v55, %v1379_v29  ;;  %v1316_v40 = vpop.f32.mrf.mxu1  ;;  %v274_v55 = vld [vmem:[%s5143_s1 + $0x18] sm:$0xff]  ;;  %1937 = vmatpush.msra.mxu3 %v338_v34  ;;  %v4517_v34 = vld [vmem:[%s2969_s20 + $0x2a0] sm:$0xff] }
 0x21a   : > { %1510 = vmatmul.f32.gmra.mxu0 %v4405_v37  ;;  %1640 = vmatmul.f32.gmra.mxu2 %v4017_v21  ;;  %v1317_v23 = vadd.f32 %v1316_v40, %v1252_v17  ;;  %v537_v21 = vld [vmem:[%s5143_s1 + $0x850] sm:$0xff]  ;;  %v4459_v40 = vld [vmem:[%s2969_s20 + $0x218] sm:$0xff] }
 0x21b   : > { %2280 = vst [vmem:[%s3767_s4 + $0x108] sm:$0xff] %v1444_v22  ;;  %1740 = vmatpush.msra.mxu0 %v537_v21  ;;  %v4450_v17 = vld [vmem:[%s2969_s20 + $0x210] sm:$0xff]  ;;  %1872 = vmatpush.msra.mxu2 %v274_v55 }
 0x21c   : > { %1575 = vmatmul.f32.gmra.mxu1 %v4414_v51 }
 0x21d   : > { %1705 = vmatmul.f32.gmra.mxu3 %v4023_v1  ;;  %v1381_v53 = vpop.f32.mrf.mxu2  ;;  %v4426_v1 = vld [vmem:[%s2969_s20 + $0x1e0] sm:$0xff]  ;;  %1741 = vmatpush.msra.mxu0 %v533_v52 }
 0x21e   : > { %v1382_v35 = vadd.f32 %v1381_v53, %v1317_v23 }
 0x21f   : > { %v1254_v5 = vpop.f32.mrf.mxu0 }
 0x220   : > { %v1255_v59 = vadd.f32 %v1254_v5, %v4070_v44  ;;  %v1446_v33 = vpop.f32.mrf.mxu3  ;;  %v4438_v44 = vld [vmem:[%s2969_s20 + $0x1e8] sm:$0xff] }
 0x221   : > { %v1447_v47 = vadd.f32 %v1446_v33, %v1382_v35  ;;  %v1319_v6 = vpop.f32.mrf.mxu1 }
 0x222   : > { %1513 = vmatmul.f32.gmra.mxu0 %v4426_v1  ;;  %1643 = vmatmul.f32.gmra.mxu2 %v4045_v42  ;;  %v1320_v11 = vadd.f32 %v1319_v6, %v1255_v59  ;;  %v590_v59 = vld [vmem:[%s5143_s1 + $0x9f8] sm:$0xff] }
 0x223   : > { %2284 = vst [vmem:[%s3767_s4 + $0x128] sm:$0xff] %v1447_v47  ;;  %v4480_v47 = vld [vmem:[%s2969_s20 + $0x248] sm:$0xff]  ;;  %2117 = vmatpush.msrb.mxu2 %v590_v59  ;;  %v462_v6 = vld [vmem:[%s5143_s1 + $0x5f8] sm:$0xff] }
 0x224   : > { %1578 = vmatmul.f32.gmra.mxu1 %v4438_v44 }
 0x225   : > { %1708 = vmatmul.f32.gmra.mxu3 %v4051_v30  ;;  %v1384_v42 = vpop.f32.mrf.mxu2 }
 0x226   : > { %v1385_v45 = vadd.f32 %v1384_v42, %v1320_v11 }
 0x227   : > { %v1257_v58 = vpop.f32.mrf.mxu0 }
 0x228   : > { %v1258_v32 = vadd.f32 %v1257_v58, %v4098_v16  ;;  %v1449_v29 = vpop.f32.mrf.mxu3  ;;  %v586_v58 = vld [vmem:[%s5143_s1 + $0x9d8] sm:$0xff] }
 0x229   : > { %v1450_v30 = vadd.f32 %v1449_v29, %v1385_v45  ;;  %v1322_v27 = vpop.f32.mrf.mxu1  ;;  %v4496_v45 = vld [vmem:[%s2969_s20 + $0x270] sm:$0xff]  ;;  %2118 = vmatpush.msrb.mxu2 %v586_v58  ;;  %v4505_v29 = vld [vmem:[%s2969_s20 + $0x278] sm:$0xff] }
 0x22a   : > { %1516 = vmatmul.f32.gmra.mxu0 %v4450_v17  ;;  %1646 = vmatmul.f32.gmra.mxu2 %v4073_v0  ;;  %v1323_v22 = vadd.f32 %v1322_v27, %v1258_v32  ;;  %v529_v0 = vld [vmem:[%s5143_s1 + $0x810] sm:$0xff]  ;;  %v522_v27 = vld [vmem:[%s5143_s1 + $0x7d8] sm:$0xff] }
 0x22b   : > { %2288 = vst [vmem:[%s3767_s4 + $0x148] sm:$0xff] %v1450_v30  ;;  %1742 = vmatpush.msra.mxu0 %v529_v0  ;;  %2053 = vmatpush.msrb.mxu1 %v522_v27  ;;  %v4570_v27 = vld [vmem:[%s2969_s20 + $0x20] sm:$0xff] }
 0x22c   : > { %1581 = vmatmul.f32.gmra.mxu1 %v4459_v40 }
 0x22d   : > { %1711 = vmatmul.f32.gmra.mxu3 %v4079_v3  ;;  %v1387_v16 = vpop.f32.mrf.mxu2  ;;  %v4471_v3 = vld [vmem:[%s2969_s20 + $0x240] sm:$0xff]  ;;  %1987 = vmatpush.msrb.mxu0 %v462_v6  ;;  %v4538_v6 = vld [vmem:[%s2969_s20 + $0x2d0] sm:$0xff] }
 0x22e   : > { %v1388_v23 = vadd.f32 %v1387_v16, %v1323_v22 }
 0x22f   : > { %v1260_v53 = vpop.f32.mrf.mxu0 }
 0x230   : > { %v1261_v21 = vadd.f32 %v1260_v53, %v4127_v2  ;;  %v1452_v8 = vpop.f32.mrf.mxu3 }
 0x231   : > { %v1453_v35 = vadd.f32 %v1452_v8, %v1388_v23  ;;  %v1325_v5 = vpop.f32.mrf.mxu1  ;;  %v582_v23 = vld [vmem:[%s5143_s1 + $0x9b8] sm:$0xff] }
 0x232   : > { %1519 = vmatmul.f32.gmra.mxu0 %v4471_v3  ;;  %1649 = vmatmul.f32.gmra.mxu2 %v4101_v25  ;;  %v1326_v33 = vadd.f32 %v1325_v5, %v1261_v21  ;;  %v614_v25 = vld [vmem:[%s5143_s1 + $0xab8] sm:$0x1]  ;;  %v4526_v21 = vld [vmem:[%s2969_s20 + $0x2a8] sm:$0xff] }
 0x233   : > { %2292 = vst [vmem:[%s3767_s4 + $0x168] sm:$0xff] %v1453_v35  ;;  %2448 = vmatpush.msk.msrb.mxu3 %vm674_vm0, %v614_v25  ;;  %2119 = vmatpush.msrb.mxu2 %v582_v23  ;;  %v518_v35 = vld [vmem:[%s5143_s1 + $0x7b8] sm:$0xff] }
 0x234   : > { %1584 = vmatmul.f32.gmra.mxu1 %v4480_v47  ;;  %v578_v25 = vld [vmem:[%s5143_s1 + $0x998] sm:$0xff] }
 0x235   : > { %1714 = vmatmul.f32.gmra.mxu3 %v4110_v49  ;;  %v1390_v2 = vpop.f32.mrf.mxu2  ;;  %2054 = vmatpush.msrb.mxu1 %v518_v35  ;;  %v4594_v35 = vld [vmem:[%s2969_s20 + $0x50] sm:$0xff] }
 0x236   : > { %v1391_v26 = vadd.f32 %v1390_v2, %v1326_v33  ;;  %2120 = vmatpush.msrb.mxu2 %v578_v25 }
 0x237   : > { %v1263_v49 = vpop.f32.mrf.mxu0 }
 0x238   : > { %v1264_v11 = vadd.f32 %v1263_v49, %v4152_v39  ;;  %v1455_v42 = vpop.f32.mrf.mxu3 }
 0x239   : > { %v1456_v52 = vadd.f32 %v1455_v42, %v1391_v26  ;;  %v1328_v9 = vpop.f32.mrf.mxu1  ;;  %v610_v26 = vld [vmem:[%s5143_s1 + $0xa98] sm:$0xff] }
 0x23a   : > { %1522 = vmatmul.f32.gmra.mxu0 %v4496_v45  ;;  %1652 = vmatmul.f32.gmra.mxu2 %v4130_v62  ;;  %v1329_v32 = vadd.f32 %v1328_v9, %v1264_v11  ;;  %v458_v62 = vld [vmem:[%s5143_s1 + $0x5d8] sm:$0xff] }
 0x23b   : > { %2296 = vst [vmem:[%s3767_s4 + $0x188] sm:$0xff] %v1456_v52  ;;  %1988 = vmatpush.msrb.mxu0 %v458_v62  ;;  %2193 = vmatpush.msrb.mxu3 %v610_v26  ;;  %v450_v42 = vld [vmem:[%s5143_s1 + $0x598] sm:$0xff] }
 0x23c   : > { %1587 = vmatmul.f32.gmra.mxu1 %v4505_v29  ;;  %v514_v9 = vld [vmem:[%s5143_s1 + $0x798] sm:$0xff] }
 0x23d   : > { %1717 = vmatmul.f32.gmra.mxu3 %v4139_v19  ;;  %v1393_v39 = vpop.f32.mrf.mxu2  ;;  %2055 = vmatpush.msrb.mxu1 %v514_v9  ;;  %v4620_v9 = vld [vmem:[%s2969_s20 + $0x80] sm:$0xff] }
 0x23e   : > { %v1394_v30 = vadd.f32 %v1393_v39, %v1329_v32 }
 0x23f   : > { %v1266_v55 = vpop.f32.mrf.mxu0 }
 0x240   : > { %v1267_v22 = vadd.f32 %v1266_v55, %v4177_v57  ;;  %v1458_v16 = vpop.f32.mrf.mxu3  ;;  %v574_v55 = vld [vmem:[%s5143_s1 + $0x978] sm:$0xff] }
 0x241   : > { %v1459_v0 = vadd.f32 %v1458_v16, %v1394_v30  ;;  %v1331_v19 = vpop.f32.mrf.mxu1  ;;  %2121 = vmatpush.msrb.mxu2 %v574_v55 }
 0x242   : > { %1525 = vmatmul.f32.gmra.mxu0 %v4517_v34  ;;  %1655 = vmatmul.f32.gmra.mxu2 %v4155_v43  ;;  %v1332_v53 = vadd.f32 %v1331_v19, %v1267_v22  ;;  %v454_v43 = vld [vmem:[%s5143_s1 + $0x5b8] sm:$0xff]  ;;  %v4579_v22 = vld [vmem:[%s2969_s20 + $0x28] sm:$0xff] }
 0x243   : > { %2300 = vst [vmem:[%s3767_s4 + $0x1a8] sm:$0xff] %v1459_v0  ;;  %1989 = vmatpush.msrb.mxu0 %v454_v43  ;;  %v446_v0 = vld [vmem:[%s5143_s1 + $0x578] sm:$0xff] }
 0x244   : > { %1590 = vmatmul.f32.gmra.mxu1 %v4526_v21  ;;  %v510_v19 = vld [vmem:[%s5143_s1 + $0x778] sm:$0xff] }
 0x245   : > { %1720 = vmatmul.f32.gmra.mxu3 %v4164_v13  ;;  %v1396_v57 = vpop.f32.mrf.mxu2  ;;  %1990 = vmatpush.msrb.mxu0 %v450_v42  ;;  %v606_v42 = vld [vmem:[%s5143_s1 + $0xa78] sm:$0xff] }
 0x246   : > { %v1397_v8 = vadd.f32 %v1396_v57, %v1332_v53  ;;  %2056 = vmatpush.msrb.mxu1 %v510_v19  ;;  %2194 = vmatpush.msrb.mxu3 %v606_v42  ;;  %v4643_v19 = vld [vmem:[%s2969_s20 + $0xb0] sm:$0xff]  ;;  %v430_v42 = vld [vmem:[%s5143_s1 + $0x4f8] sm:$0xff] }
 0x247   : > { %v1269_v5 = vpop.f32.mrf.mxu0  ;;  %1991 = vmatpush.msrb.mxu0 %v446_v0 }
 0x248   : > { %v1270_v59 = vadd.f32 %v1269_v5, %v4205_v56  ;;  %v1461_v33 = vpop.f32.mrf.mxu3  ;;  %v570_v5 = vld [vmem:[%s5143_s1 + $0x958] sm:$0xff] }
 0x249   : > { %v1462_v2 = vadd.f32 %v1461_v33, %v1397_v8  ;;  %v1334_v13 = vpop.f32.mrf.mxu1  ;;  %2122 = vmatpush.msrb.mxu2 %v570_v5 }
 0x24a   : > { %1528 = vmatmul.f32.gmra.mxu0 %v4538_v6  ;;  %1658 = vmatmul.f32.gmra.mxu2 %v4180_v4  ;;  %v1335_v56 = vadd.f32 %v1334_v13, %v1270_v59  ;;  %v4556_v4 = vld [vmem:[%s5144_s2] sm:$0xf]  ;;  %v4602_v59 = vld [vmem:[%s2969_s20 + $0x58] sm:$0xff] }
 0x24b   : > { %2304 = vst [vmem:[%s3767_s4 + $0x1c8] sm:$0xff] %v1462_v2  ;;  %v4559_v49 = vperm.slane %v4556_v4, 2  ;;  %v442_v2 = vld [vmem:[%s5143_s1 + $0x558] sm:$0xff] }
 0x24c   : > { %1593 = vmatmul.f32.gmra.mxu1 %v4550_v20  ;;  %1992 = vmatpush.msrb.mxu0 %v442_v2 }
 0x24d   : > { %1723 = vmatmul.f32.gmra.mxu3 %v4189_v18  ;;  %v1399_v11 = vpop.f32.mrf.mxu2 }
 0x24e   : > { %v1400_v52 = vadd.f32 %v1399_v11, %v1335_v56 }
 0x24f   : > { %v1484_v58 = vpop.f32.mrf.mxu0 }
 0x250   : > { %v1464_v32 = vpop.f32.mrf.mxu3  ;;  %v1485_v39 = vadd.f32 %v1484_v58, %v4559_v49  ;;  %v566_v58 = vld [vmem:[%s5143_s1 + $0x938] sm:$0xff] }
 0x251   : > { %v1465_v62 = vadd.f32 %v1464_v32, %v1400_v52  ;;  %v1549_v18 = vpop.f32.mrf.mxu1  ;;  %2123 = vmatpush.msrb.mxu2 %v566_v58  ;;  %v4628_v32 = vld [vmem:[%s2969_s20 + $0x88] sm:$0xff]  ;;  %v494_v58 = vld [vmem:[%s5143_s1 + $0x6f8] sm:$0xff] }
 0x252   : > { %v1550_v30 = vadd.f32 %v1549_v18, %v1485_v39  ;;  %1743 = vmatmul.f32.vlgmr.msra.gmra.mxu0 %v4570_v27  ;;  %1873 = vmatmul.f32.vlgmr.msra.gmra.mxu2 %v4208_v36  ;;  %v502_v18 = vld [vmem:[%s5143_s1 + $0x738] sm:$0xff] }
 0x253   : > { %2308 = vst [vmem:[%s3767_s4 + $0x1e8] sm:$0xff] %v1465_v62  ;;  %v438_v62 = vld [vmem:[%s5143_s1 + $0x538] sm:$0xff] }
 0x254   : > { %2432 = vmatmul.msk.f32.vlgmr.msra.gmra.mxu1 %vm625_vm1, %v4579_v22  ;;  %1993 = vmatpush.msrb.mxu0 %v438_v62 }
 0x255   : > { %1938 = vmatmul.f32.vlgmr.msra.gmra.mxu3 %v4216_v50  ;;  %v1614_v16 = vpop.f32.mrf.mxu2 }
 0x256   : > { %v1615_v36 = vadd.f32 %v1614_v16, %v1550_v30 }
 0x257   : > { %v1487_v23 = vpop.f32.mrf.mxu0 }
 0x258   : > { %v1488_v53 = vadd.f32 %v1487_v23, %v4559_v49  ;;  %v1679_v57 = vpop.f32.mrf.mxu3  ;;  %v562_v23 = vld [vmem:[%s5143_s1 + $0x918] sm:$0xff] }
 0x259   : > { %v4591_v43 = vadd.f32 %v1679_v57, %v1615_v36  ;;  %v1552_v50 = vpop.f32.mrf.mxu1  ;;  %2124 = vmatpush.msrb.mxu2 %v562_v23  ;;  %v426_v23 = vld [vmem:[%s5143_s1 + $0x4d8] sm:$0xff] }
 0x25a   : > { %v1553_v8 = vadd.f32 %v1552_v50, %v1488_v53  ;;  %1746 = vmatmul.f32.gmra.mxu0 %v4594_v35  ;;  %1876 = vmatmul.f32.gmra.mxu2 %v4228_v60  ;;  %v506_v60 = vld [vmem:[%s5143_s1 + $0x758] sm:$0xff] }
 0x25b   : > { %2057 = vmatpush.msrb.mxu1 %v506_v60  ;;  %v4651_v53 = vld [vmem:[%s2969_s20 + $0xb8] sm:$0xff] }
 0x25c   : > { %2433 = vmatmul.msk.f32.gmra.mxu1 %vm625_vm1, %v4602_v59  ;;  %v434_v50 = vld [vmem:[%s5143_s1 + $0x518] sm:$0xff] }
 0x25d   : > { %1941 = vmatmul.f32.gmra.mxu3 %v4237_v31  ;;  %v1617_v33 = vpop.f32.mrf.mxu2  ;;  %2058 = vmatpush.msrb.mxu1 %v502_v18 }
 0x25e   : > { %v1618_v13 = vadd.f32 %v1617_v33, %v1553_v8  ;;  %1994 = vmatpush.msrb.mxu0 %v434_v50  ;;  %v498_v8 = vld [vmem:[%s5143_s1 + $0x718] sm:$0xff] }
 0x25f   : > { %v1490_v25 = vpop.f32.mrf.mxu0  ;;  %2059 = vmatpush.msrb.mxu1 %v498_v8 }
 0x260   : > { %v1491_v26 = vadd.f32 %v1490_v25, %v4559_v49  ;;  %v1682_v56 = vpop.f32.mrf.mxu3  ;;  %v4666_v25 = vld [vmem:[%s2969_s20 + $0xe0] sm:$0xff]  ;;  %1995 = vmatpush.msrb.mxu0 %v430_v42 }
 0x261   : > { %v4614_v11 = vadd.f32 %v1682_v56, %v1618_v13  ;;  %v1555_v31 = vpop.f32.mrf.mxu1  ;;  %v4674_v56 = vld [vmem:[%s2969_s20 + $0xe8] sm:$0xff]  ;;  %2060 = vmatpush.msrb.mxu1 %v494_v58 }
 0x262   : > { %v1556_v52 = vadd.f32 %v1555_v31, %v1491_v26  ;;  %1749 = vmatmul.f32.gmra.mxu0 %v4620_v9  ;;  %1879 = vmatmul.f32.gmra.mxu2 %v4249_v7  ;;  %v558_v26 = vld [vmem:[%s5143_s1 + $0x8f8] sm:$0xff] }
 0x263   : > { %2125 = vmatpush.msrb.mxu2 %v558_v26  ;;  %1996 = vmatpush.msrb.mxu0 %v426_v23 }
 0x264   : > { %2434 = vmatmul.msk.f32.gmra.mxu1 %vm625_vm1, %v4628_v32 }
 0x265   : > { %1944 = vmatmul.f32.gmra.mxu3 %v4261_v61  ;;  %v1620_v39 = vpop.f32.mrf.mxu2 }
 0x266   : > { %v1621_v7 = vadd.f32 %v1620_v39, %v1556_v52 }
 0x267   : > { %v1493_v30 = vpop.f32.mrf.mxu0 }
 0x268   : > { %v1494_v55 = vadd.f32 %v1493_v30, %v4559_v49  ;;  %v1685_v16 = vpop.f32.mrf.mxu3 }
 0x269   : > { %v4640_v0 = vadd.f32 %v1685_v16, %v1621_v7  ;;  %v1558_v61 = vpop.f32.mrf.mxu1  ;;  %v554_v16 = vld [vmem:[%s5143_s1 + $0x8d8] sm:$0xff] }
 0x26a   : > { %v1559_v36 = vadd.f32 %v1558_v61, %v1494_v55  ;;  %1752 = vmatmul.f32.gmra.mxu0 %v4643_v19  ;;  %1882 = vmatmul.f32.gmra.mxu2 %v4273_v63  ;;  %v4692_v55 = vld [vmem:[%s2969_s20 + $0x110] sm:$0xff]  ;;  %v4700_v61 = vld [vmem:[%s2969_s20 + $0x118] sm:$0xff] }
 0x26b   : > { %2126 = vmatpush.msrb.mxu2 %v554_v16  ;;  %v4749_v16 = vld [vmem:[%s2969_s20 + $0x178] sm:$0xff] }
 0x26c   : > { %2435 = vmatmul.msk.f32.gmra.mxu1 %vm625_vm1, %v4651_v53 }
 0x26d   : > { %1947 = vmatmul.f32.gmra.mxu3 %v4282_v54  ;;  %v1623_v57 = vpop.f32.mrf.mxu2 }
 0x26e   : > { %v1624_v63 = vadd.f32 %v1623_v57, %v1559_v36  ;;  %v490_v57 = vld [vmem:[%s5143_s1 + $0x6d8] sm:$0xff] }
 0x26f   : > { %v1496_v5 = vpop.f32.mrf.mxu0  ;;  %2061 = vmatpush.msrb.mxu1 %v490_v57 }
 0x270   : > { %v1497_v33 = vadd.f32 %v1496_v5, %v4559_v49  ;;  %v1688_v2 = vpop.f32.mrf.mxu3 }
 0x271   : > { %v4663_v13 = vadd.f32 %v1688_v2, %v1624_v63  ;;  %v1561_v54 = vpop.f32.mrf.mxu1  ;;  %v4715_v2 = vld [vmem:[%s2969_s20 + $0x140] sm:$0xff] }
 0x272   : > { %v1562_v60 = vadd.f32 %v1561_v54, %v1497_v33  ;;  %1755 = vmatmul.f32.gmra.mxu0 %v4666_v25  ;;  %1885 = vmatmul.f32.gmra.mxu2 %v4294_v48  ;;  %v602_v48 = vld [vmem:[%s5143_s1 + $0xa58] sm:$0xff] }
 0x273   : > { %2195 = vmatpush.msrb.mxu3 %v602_v48  ;;  %v550_v54 = vld [vmem:[%s5143_s1 + $0x8b8] sm:$0xff] }
 0x274   : > { %2436 = vmatmul.msk.f32.gmra.mxu1 %vm625_vm1, %v4674_v56  ;;  %2127 = vmatpush.msrb.mxu2 %v550_v54  ;;  %v542_v54 = vld [vmem:[%s5143_s1 + $0x878] sm:$0xff] }
 0x275   : > { %1950 = vmatmul.f32.gmra.mxu3 %v4303_v38  ;;  %v1626_v31 = vpop.f32.mrf.mxu2 }
 0x276   : > { %v1627_v52 = vadd.f32 %v1626_v31, %v1562_v60  ;;  %v4723_v60 = vld [vmem:[%s2969_s20 + $0x148] sm:$0xff]  ;;  %v422_v31 = vld [vmem:[%s5143_s1 + $0x4b8] sm:$0xff] }
 0x277   : > { %v1499_v39 = vpop.f32.mrf.mxu0  ;;  %1997 = vmatpush.msrb.mxu0 %v422_v31 }
 0x278   : > { %v1500_v38 = vadd.f32 %v1499_v39, %v4559_v49  ;;  %v1691_v62 = vpop.f32.mrf.mxu3 }
 0x279   : > { %v4689_v7 = vadd.f32 %v1691_v62, %v1627_v52  ;;  %v1564_v18 = vpop.f32.mrf.mxu1  ;;  %v4738_v62 = vld [vmem:[%s2969_s20 + $0x170] sm:$0xff] }
 0x27a   : > { %v1565_v30 = vadd.f32 %v1564_v18, %v1500_v38  ;;  %1758 = vmatmul.f32.gmra.mxu0 %v4692_v55  ;;  %1888 = vmatmul.f32.gmra.mxu2 %v4318_v24  ;;  %v546_v18 = vld [vmem:[%s5143_s1 + $0x898] sm:$0xff] }
 0x27b   : > { %2128 = vmatpush.msrb.mxu2 %v546_v18  ;;  %v4787_v18 = vld [vmem:[%s2969_s20 + $0x1d0] sm:$0xff] }
 0x27c   : > { %2437 = vmatmul.msk.f32.gmra.mxu1 %vm625_vm1, %v4700_v61 }
 0x27d   : > { %1953 = vmatmul.f32.gmra.mxu3 %v4327_v10  ;;  %v1629_v36 = vpop.f32.mrf.mxu2  ;;  %2129 = vmatpush.msrb.mxu2 %v542_v54 }
 0x27e   : > { %v1630_v24 = vadd.f32 %v1629_v36, %v1565_v30  ;;  %v598_v30 = vld [vmem:[%s5143_s1 + $0xa38] sm:$0xff] }
 0x27f   : > { %v1502_v50 = vpop.f32.mrf.mxu0  ;;  %2196 = vmatpush.msrb.mxu3 %v598_v30  ;;  %v538_v30 = vld [vmem:[%s5143_s1 + $0x858] sm:$0xff] }
 0x280   : > { %v1503_v63 = vadd.f32 %v1502_v50, %v4559_v49  ;;  %v1694_v8 = vpop.f32.mrf.mxu3  ;;  %2130 = vmatpush.msrb.mxu2 %v538_v30 }
 0x281   : > { %v4712_v5 = vadd.f32 %v1694_v8, %v1630_v24  ;;  %v1567_v10 = vpop.f32.mrf.mxu1  ;;  %v482_v24 = vld [vmem:[%s5143_s1 + $0x698] sm:$0xff] }
 0x282   : > { %v1568_v33 = vadd.f32 %v1567_v10, %v1503_v63  ;;  %1761 = vmatmul.f32.gmra.mxu0 %v4715_v2  ;;  %1891 = vmatmul.f32.gmra.mxu2 %v4339_v15  ;;  %v486_v15 = vld [vmem:[%s5143_s1 + $0x6b8] sm:$0xff] }
 0x283   : > { %2062 = vmatpush.msrb.mxu1 %v486_v15  ;;  %v478_v15 = vld [vmem:[%s5143_s1 + $0x678] sm:$0xff] }
 0x284   : > { %2438 = vmatmul.msk.f32.gmra.mxu1 %vm625_vm1, %v4723_v60 }
 0x285   : > { %1956 = vmatmul.f32.gmra.mxu3 %v4348_v12  ;;  %v1632_v26 = vpop.f32.mrf.mxu2  ;;  %2063 = vmatpush.msrb.mxu1 %v482_v24 }
 0x286   : > { %v1633_v42 = vadd.f32 %v1632_v26, %v1568_v33  ;;  %v4764_v33 = vld [vmem:[%s2969_s20 + $0x1a0] sm:$0xff]  ;;  %v4772_v26 = vld [vmem:[%s2969_s20 + $0x1a8] sm:$0xff] }
 0x287   : > { %v1505_v48 = vpop.f32.mrf.mxu0  ;;  %2064 = vmatpush.msrb.mxu1 %v478_v15 }
 0x288   : > { %v1506_v52 = vadd.f32 %v1505_v48, %v4559_v49  ;;  %v1697_v58 = vpop.f32.mrf.mxu3 }
 0x289   : > { %v4735_v39 = vadd.f32 %v1697_v58, %v1633_v42  ;;  %v1570_v12 = vpop.f32.mrf.mxu1  ;;  %v414_v42 = vld [vmem:[%s5143_s1 + $0x478] sm:$0xff] }
 0x28a   : > { %v1571_v38 = vadd.f32 %v1570_v12, %v1506_v52  ;;  %1764 = vmatmul.f32.gmra.mxu0 %v4738_v62  ;;  %1894 = vmatmul.f32.gmra.mxu2 %v4360_v46  ;;  %v418_v46 = vld [vmem:[%s5143_s1 + $0x498] sm:$0xff] }
 0x28b   : > { %1998 = vmatpush.msrb.mxu0 %v418_v46 }
 0x28c   : > { %2439 = vmatmul.msk.f32.gmra.mxu1 %vm625_vm1, %v4749_v16 }
 0x28d   : > { %1959 = vmatmul.f32.gmra.mxu3 %v4369_v14  ;;  %v1635_v36 = vpop.f32.mrf.mxu2  ;;  %1999 = vmatpush.msrb.mxu0 %v414_v42  ;;  %v534_v42 = vld [vmem:[%s5143_s1 + $0x838] sm:$0xff] }
 0x28e   : > { %v1636_v23 = vadd.f32 %v1635_v36, %v1571_v38  ;;  %v4795_v36 = vld [vmem:[%s2969_s20 + $0x1d8] sm:$0xff]  ;;  %2131 = vmatpush.msrb.mxu2 %v534_v42 }
 0x28f   : > { %v1508_v57 = vpop.f32.mrf.mxu0 }
 0x290   : > { %v1509_v50 = vadd.f32 %v1508_v57, %v4559_v49  ;;  %v1700_v63 = vpop.f32.mrf.mxu3 }
 0x291   : > { %v4761_v8 = vadd.f32 %v1700_v63, %v1636_v23  ;;  %v1573_v14 = vpop.f32.mrf.mxu1  ;;  %v410_v23 = vld [vmem:[%s5143_s1 + $0x458] sm:$0xff] }
 0x292   : > { %v1574_v10 = vadd.f32 %v1573_v14, %v1509_v50  ;;  %1767 = vmatmul.f32.gmra.mxu0 %v4764_v33  ;;  %1897 = vmatmul.f32.gmra.mxu2 %v4384_v41 }
 0x293   : > { %2000 = vmatpush.msrb.mxu0 %v410_v23  ;;  %v4836_v23 = vld [vmem:[%s2969_s20 + $0x230] sm:$0xff] }
 0x294   : > { %2440 = vmatmul.msk.f32.gmra.mxu1 %vm625_vm1, %v4772_v26 }
 0x295   : > { %1962 = vmatmul.f32.gmra.mxu3 %v4393_v28  ;;  %v1638_v31 = vpop.f32.mrf.mxu2 }
 0x296   : > { %v1639_v41 = vadd.f32 %v1638_v31, %v1574_v10  ;;  %v594_v10 = vld [vmem:[%s5143_s1 + $0xa18] sm:$0xff]  ;;  %v4813_v31 = vld [vmem:[%s2969_s20 + $0x200] sm:$0xff] }
 0x297   : > { %v1511_v48 = vpop.f32.mrf.mxu0  ;;  %2197 = vmatpush.msrb.mxu3 %v594_v10 }
 0x298   : > { %v1512_v52 = vadd.f32 %v1511_v48, %v4559_v49  ;;  %v1703_v58 = vpop.f32.mrf.mxu3  ;;  %v406_v48 = vld [vmem:[%s5143_s1 + $0x438] sm:$0xff] }
 0x299   : > { %v4784_v12 = vadd.f32 %v1703_v58, %v1639_v41  ;;  %v1576_v28 = vpop.f32.mrf.mxu1  ;;  %v4821_v41 = vld [vmem:[%s2969_s20 + $0x208] sm:$0xff]  ;;  %2001 = vmatpush.msrb.mxu0 %v406_v48  ;;  %v4859_v48 = vld [vmem:[%s2969_s20 + $0x260] sm:$0xff] }
 0x29a   : > { %v1577_v38 = vadd.f32 %v1576_v28, %v1512_v52  ;;  %1770 = vmatmul.f32.gmra.mxu0 %v4787_v18  ;;  %1900 = vmatmul.f32.gmra.mxu2 %v4405_v37  ;;  %v474_v37 = vld [vmem:[%s5143_s1 + $0x658] sm:$0xff] }
 0x29b   : > { %2065 = vmatpush.msrb.mxu1 %v474_v37  ;;  %v470_v52 = vld [vmem:[%s5143_s1 + $0x638] sm:$0xff] }
 0x29c   : > { %2441 = vmatmul.msk.f32.gmra.mxu1 %vm625_vm1, %v4795_v36  ;;  %v4844_v37 = vld [vmem:[%s2969_s20 + $0x238] sm:$0xff] }
 0x29d   : > { %1965 = vmatmul.f32.gmra.mxu3 %v4414_v51  ;;  %v1641_v46 = vpop.f32.mrf.mxu2  ;;  %2066 = vmatpush.msrb.mxu1 %v470_v52 }
 0x29e   : > { %v1642_v24 = vadd.f32 %v1641_v46, %v1577_v38 }
 0x29f   : > { %v1514_v57 = vpop.f32.mrf.mxu0 }
 0x2a0   : > { %v1515_v50 = vadd.f32 %v1514_v57, %v4559_v49  ;;  %v1706_v63 = vpop.f32.mrf.mxu3 }
 0x2a1   : > { %v4807_v14 = vadd.f32 %v1706_v63, %v1642_v24  ;;  %v1579_v51 = vpop.f32.mrf.mxu1  ;;  %v530_v24 = vld [vmem:[%s5143_s1 + $0x818] sm:$0xff] }
 0x2a2   : > { %v1580_v54 = vadd.f32 %v1579_v51, %v1515_v50  ;;  %1773 = vmatmul.f32.gmra.mxu0 %v4813_v31  ;;  %1903 = vmatmul.f32.gmra.mxu2 %v4426_v1  ;;  %v402_v50 = vld [vmem:[%s5143_s1 + $0x418] sm:$0xff] }
 0x2a3   : > { %2132 = vmatpush.msrb.mxu2 %v530_v24  ;;  %2002 = vmatpush.msrb.mxu0 %v402_v50  ;;  %v466_v63 = vld [vmem:[%s5143_s1 + $0x618] sm:$0xff]  ;;  %v4873_v50 = vld [vmem:[%s2969_s20 + $0x290] sm:$0xff] }
 0x2a4   : > { %2442 = vmatmul.msk.f32.gmra.mxu1 %vm625_vm1, %v4821_v41 }
 0x2a5   : > { %1968 = vmatmul.f32.gmra.mxu3 %v4438_v44  ;;  %v1644_v15 = vpop.f32.mrf.mxu2  ;;  %2067 = vmatpush.msrb.mxu1 %v466_v63 }
 0x2a6   : > { %v1645_v1 = vadd.f32 %v1644_v15, %v1580_v54 }
 0x2a7   : > { %v1517_v58 = vpop.f32.mrf.mxu0 }
 0x2a8   : > { %v1518_v28 = vadd.f32 %v1517_v58, %v4559_v49  ;;  %v1709_v38 = vpop.f32.mrf.mxu3 }
 0x2a9   : > { %v4833_v30 = vadd.f32 %v1709_v38, %v1645_v1  ;;  %v1582_v44 = vpop.f32.mrf.mxu1  ;;  %v4864_v1 = vld [vmem:[%s2969_s20 + $0x268] sm:$0xff] }
 0x2aa   : > { %v1583_v46 = vadd.f32 %v1582_v44, %v1518_v28  ;;  %1776 = vmatmul.f32.gmra.mxu0 %v4836_v23  ;;  %1906 = vmatmul.f32.gmra.mxu2 %v4450_v17 }
 0x2ac   : > { %2443 = vmatmul.msk.f32.gmra.mxu1 %vm625_vm1, %v4844_v37 }
 0x2ad   : > { %1971 = vmatmul.f32.gmra.mxu3 %v4459_v40  ;;  %v1647_v57 = vpop.f32.mrf.mxu2 }
 0x2ae   : > { %v1648_v17 = vadd.f32 %v1647_v57, %v1583_v46 }
 0x2af   : > { %v1520_v51 = vpop.f32.mrf.mxu0 }
 0x2b0   : > { %v1521_v10 = vadd.f32 %v1520_v51, %v4559_v49  ;;  %v1712_v54 = vpop.f32.mrf.mxu3 }
 0x2b1   : > { %v4856_v42 = vadd.f32 %v1712_v54, %v1648_v17  ;;  %v1585_v40 = vpop.f32.mrf.mxu1 }
 0x2b2   : > { %v1586_v15 = vadd.f32 %v1585_v40, %v1521_v10  ;;  %1779 = vmatmul.f32.gmra.mxu0 %v4859_v48  ;;  %1909 = vmatmul.f32.gmra.mxu2 %v4471_v3  ;;  %v4878_v3 = vld [vmem:[%s2969_s20 + $0x298] sm:$0xff] }
 0x2b4   : > { %2444 = vmatmul.msk.f32.gmra.mxu1 %vm625_vm1, %v4864_v1 }
 0x2b5   : > { %1974 = vmatmul.f32.gmra.mxu3 %v4480_v47  ;;  %v1650_v52 = vpop.f32.mrf.mxu2 }
 0x2b6   : > { %v1651_v58 = vadd.f32 %v1650_v52, %v1586_v15  ;;  %v4887_v52 = vld [vmem:[%s2969_s20 + $0x2c0] sm:$0xff] }
 0x2b7   : > { %v1523_v28 = vpop.f32.mrf.mxu0 }
 0x2b8   : > { %v1524_v38 = vadd.f32 %v1523_v28, %v4559_v49  ;;  %v1715_v44 = vpop.f32.mrf.mxu3 }
 0x2b9   : > { %v4870_v46 = vadd.f32 %v1715_v44, %v1651_v58  ;;  %v1588_v24 = vpop.f32.mrf.mxu1 }
 0x2ba   : > { %v1589_v57 = vadd.f32 %v1588_v24, %v1524_v38  ;;  %1782 = vmatmul.f32.gmra.mxu0 %v4873_v50  ;;  %1912 = vmatmul.f32.gmra.mxu2 %v4496_v45  ;;  %v4892_v45 = vld [vmem:[%s2969_s20 + $0x2c8] sm:$0xff] }
 0x2bc   : > { %2445 = vmatmul.msk.f32.gmra.mxu1 %vm625_vm1, %v4878_v3 }
 0x2bd   : > { %1977 = vmatmul.f32.gmra.mxu3 %v4505_v29  ;;  %v1653_v47 = vpop.f32.mrf.mxu2 }
 0x2be   : > { %v1654_v17 = vadd.f32 %v1653_v47, %v1589_v57 }
 0x2bf   : > { %v1526_v63 = vpop.f32.mrf.mxu0 }
 0x2c0   : > { %v1527_v51 = vadd.f32 %v1526_v63, %v4559_v49  ;;  %v1718_v10 = vpop.f32.mrf.mxu3 }
 0x2c1   : > { %v4884_v54 = vadd.f32 %v1718_v10, %v1654_v17  ;;  %v1591_v40 = vpop.f32.mrf.mxu1  ;;  %v4901_v17 = vld [vmem:[%s2969_s20 + $0x2f0] sm:$0xff] }
 0x2c2   : > { %v1592_v15 = vadd.f32 %v1591_v40, %v1527_v51  ;;  %1785 = vmatmul.f32.gmra.mxu0 %v4887_v52  ;;  %1915 = vmatmul.f32.gmra.mxu2 %v4517_v34  ;;  %v4906_v34 = vld [vmem:[%s2969_s20 + $0x2f8] sm:$0xff] }
 0x2c4   : > { %2446 = vmatmul.msk.f32.gmra.mxu1 %vm625_vm1, %v4892_v45 }
 0x2c5   : > { %1980 = vmatmul.f32.gmra.mxu3 %v4526_v21  ;;  %v1656_v29 = vpop.f32.mrf.mxu2 }
 0x2c6   : > { %v1657_v58 = vadd.f32 %v1656_v29, %v1592_v15 }
 0x2c7   : > { %v1529_v28 = vpop.f32.mrf.mxu0 }
 0x2c8   : > { %v1530_v38 = vadd.f32 %v1529_v28, %v4559_v49  ;;  %v1721_v44 = vpop.f32.mrf.mxu3 }
 0x2c9   : > { %v4898_v24 = vadd.f32 %v1721_v44, %v1657_v58  ;;  %v1594_v57 = vpop.f32.mrf.mxu1  ;;  %v4917_v58 = vperm.slane %v4556_v4, 3 }
 0x2ca   : > { %v1595_v47 = vadd.f32 %v1594_v57, %v1530_v38  ;;  %1788 = vmatmul.f32.gmra.mxu0 %v4901_v17  ;;  %1918 = vmatmul.f32.gmra.mxu2 %v4538_v6  ;;  %v2612_v6 = vld [vmem:[%s2969_s20 + $0x10] sm:$0xff] }
 0x2cc   : > { %2447 = vmatmul.msk.f32.gmra.mxu1 %vm625_vm1, %v4906_v34 }
 0x2cd   : > { %1983 = vmatmul.f32.gmra.mxu3 %v4550_v20  ;;  %v1659_v21 = vpop.f32.mrf.mxu2  ;;  %v2613_v20 = vld [vmem:[%s2969_s20 + $0x18] sm:$0xff] }
 0x2ce   : > { %v1660_v49 = vadd.f32 %v1659_v21, %v1595_v47  ;;  %v2614_v21 = vld [vmem:[%s2969_s20 + $0x40] sm:$0xff] }
 0x2cf   : > { %v1744_v63 = vpop.f32.mrf.mxu0 }
 0x2d0   : > { %v1724_v51 = vpop.f32.mrf.mxu3  ;;  %v1745_v10 = vadd.f32 %v1744_v63, %v4591_v43 }
 0x2d1   : > { %v4912_v40 = vadd.f32 %v1724_v51, %v1660_v49  ;;  %v1809_v15 = vpop.f32.mrf.mxu1 }
 0x2d2   : > { %v1810_v29 = vadd.f32 %v1809_v15, %v1745_v10  ;;  %2003 = vmatmul.f32.vlgmr.msrb.gmra.mxu0 %v2612_v6  ;;  %2133 = vmatmul.f32.vlgmr.msrb.gmra.mxu2 %v4570_v27 }
 0x2d4   : > { %2249 = vst [vmem:[%s3767_s4 + $0x10] sm:$0xff] %v1810_v29  ;;  %2068 = vmatmul.f32.vlgmr.msrb.gmra.mxu1 %v2613_v20 }
 0x2d5   : > { %2449 = vmatmul.msk.f32.vlgmr.msrb.gmra.mxu3 %vm625_vm1, %v4579_v22  ;;  %v1874_v43 = vpop.f32.mrf.mxu2  ;;  %v2615_v22 = vld [vmem:[%s2969_s20 + $0x48] sm:$0xff] }
 0x2d6   : > { %v1875_v28 = vadd.f32 %v1874_v43, %v4917_v58 }
 0x2d7   : > { %v1747_v38 = vpop.f32.mrf.mxu0 }
 0x2d8   : > { %v1748_v44 = vadd.f32 %v1747_v38, %v4614_v11  ;;  %v1939_v57 = vpop.f32.mrf.mxu3 }
 0x2d9   : > { %v4925_v47 = vadd.f32 %v1939_v57, %v1875_v28  ;;  %v1812_v27 = vpop.f32.mrf.mxu1 }
 0x2da   : > { %v1813_v4 = vadd.f32 %v1812_v27, %v1748_v44  ;;  %2006 = vmatmul.f32.gmra.mxu0 %v2614_v21  ;;  %2136 = vmatmul.f32.gmra.mxu2 %v4594_v35  ;;  %v2616_v35 = vld [vmem:[%s2969_s20 + $0x70] sm:$0xff] }
 0x2dc   : > { %2253 = vst [vmem:[%s3767_s4 + $0x30] sm:$0xff] %v1813_v4  ;;  %2071 = vmatmul.f32.gmra.mxu1 %v2615_v22 }
 0x2dd   : > { %2450 = vmatmul.msk.f32.gmra.mxu3 %vm625_vm1, %v4602_v59  ;;  %v1877_v49 = vpop.f32.mrf.mxu2  ;;  %v2617_v59 = vld [vmem:[%s2969_s20 + $0x78] sm:$0xff] }
 0x2de   : > { %v1878_v11 = vadd.f32 %v1877_v49, %v4917_v58 }
 0x2df   : > { %v1750_v63 = vpop.f32.mrf.mxu0 }
 0x2e0   : > { %v1751_v51 = vadd.f32 %v1750_v63, %v4640_v0  ;;  %v1942_v10 = vpop.f32.mrf.mxu3 }
 0x2e1   : > { %v4935_v15 = vadd.f32 %v1942_v10, %v1878_v11  ;;  %v1815_v29 = vpop.f32.mrf.mxu1 }
 0x2e2   : > { %v1816_v6 = vadd.f32 %v1815_v29, %v1751_v51  ;;  %2009 = vmatmul.f32.gmra.mxu0 %v2616_v35  ;;  %2139 = vmatmul.f32.gmra.mxu2 %v4620_v9  ;;  %v2618_v9 = vld [vmem:[%s2969_s20 + $0xa0] sm:$0xff] }
 0x2e4   : > { %2257 = vst [vmem:[%s3767_s4 + $0x50] sm:$0xff] %v1816_v6  ;;  %2074 = vmatmul.f32.gmra.mxu1 %v2617_v59 }
 0x2e5   : > { %2451 = vmatmul.msk.f32.gmra.mxu3 %vm625_vm1, %v4628_v32  ;;  %v1880_v20 = vpop.f32.mrf.mxu2  ;;  %v2619_v32 = vld [vmem:[%s2969_s20 + $0xa8] sm:$0xff] }
 0x2e6   : > { %v1881_v0 = vadd.f32 %v1880_v20, %v4917_v58 }
 0x2e7   : > { %v1753_v43 = vpop.f32.mrf.mxu0 }
 0x2e8   : > { %v1754_v28 = vadd.f32 %v1753_v43, %v4663_v13  ;;  %v1945_v38 = vpop.f32.mrf.mxu3 }
 0x2e9   : > { %v4945_v44 = vadd.f32 %v1945_v38, %v1881_v0  ;;  %v1818_v57 = vpop.f32.mrf.mxu1 }
 0x2ea   : > { %v1819_v27 = vadd.f32 %v1818_v57, %v1754_v28  ;;  %2012 = vmatmul.f32.gmra.mxu0 %v2618_v9  ;;  %2142 = vmatmul.f32.gmra.mxu2 %v4643_v19  ;;  %v2620_v19 = vld [vmem:[%s2969_s20 + $0xd0] sm:$0xff] }
 0x2ec   : > { %2261 = vst [vmem:[%s3767_s4 + $0x70] sm:$0xff] %v1819_v27  ;;  %2077 = vmatmul.f32.gmra.mxu1 %v2619_v32 }
 0x2ed   : > { %2452 = vmatmul.msk.f32.gmra.mxu3 %vm625_vm1, %v4651_v53  ;;  %v1883_v4 = vpop.f32.mrf.mxu2  ;;  %v2621_v53 = vld [vmem:[%s2969_s20 + $0xd8] sm:$0xff] }
 0x2ee   : > { %v1884_v13 = vadd.f32 %v1883_v4, %v4917_v58 }
 0x2ef   : > { %v1756_v21 = vpop.f32.mrf.mxu0 }
 0x2f0   : > { %v1757_v22 = vadd.f32 %v1756_v21, %v4689_v7  ;;  %v1948_v49 = vpop.f32.mrf.mxu3 }
 0x2f1   : > { %v4955_v11 = vadd.f32 %v1948_v49, %v1884_v13  ;;  %v1821_v63 = vpop.f32.mrf.mxu1 }
 0x2f2   : > { %v1822_v51 = vadd.f32 %v1821_v63, %v1757_v22  ;;  %2015 = vmatmul.f32.gmra.mxu0 %v2620_v19  ;;  %2145 = vmatmul.f32.gmra.mxu2 %v4666_v25  ;;  %v2622_v25 = vld [vmem:[%s2969_s20 + $0x100] sm:$0xff] }
 0x2f4   : > { %2265 = vst [vmem:[%s3767_s4 + $0x90] sm:$0xff] %v1822_v51  ;;  %2080 = vmatmul.f32.gmra.mxu1 %v2621_v53 }
 0x2f5   : > { %2453 = vmatmul.msk.f32.gmra.mxu3 %vm625_vm1, %v4674_v56  ;;  %v1886_v10 = vpop.f32.mrf.mxu2  ;;  %v2623_v56 = vld [vmem:[%s2969_s20 + $0x108] sm:$0xff] }
 0x2f6   : > { %v1887_v7 = vadd.f32 %v1886_v10, %v4917_v58 }
 0x2f7   : > { %v1759_v29 = vpop.f32.mrf.mxu0 }
 0x2f8   : > { %v1760_v6 = vadd.f32 %v1759_v29, %v4712_v5  ;;  %v1951_v35 = vpop.f32.mrf.mxu3 }
 0x2f9   : > { %v4965_v59 = vadd.f32 %v1951_v35, %v1887_v7  ;;  %v1824_v20 = vpop.f32.mrf.mxu1 }
 0x2fa   : > { %v1825_v0 = vadd.f32 %v1824_v20, %v1760_v6  ;;  %2018 = vmatmul.f32.gmra.mxu0 %v2622_v25  ;;  %2148 = vmatmul.f32.gmra.mxu2 %v4692_v55  ;;  %v2624_v55 = vld [vmem:[%s2969_s20 + $0x130] sm:$0xff] }
 0x2fc   : > { %2269 = vst [vmem:[%s3767_s4 + $0xb0] sm:$0xff] %v1825_v0  ;;  %2083 = vmatmul.f32.gmra.mxu1 %v2623_v56 }
 0x2fd   : > { %2454 = vmatmul.msk.f32.gmra.mxu3 %vm625_vm1, %v4700_v61  ;;  %v1889_v43 = vpop.f32.mrf.mxu2  ;;  %v2625_v61 = vld [vmem:[%s2969_s20 + $0x138] sm:$0xff] }
 0x2fe   : > { %v1890_v5 = vadd.f32 %v1889_v43, %v4917_v58 }
 0x2ff   : > { %v1762_v28 = vpop.f32.mrf.mxu0 }
 0x300   : > { %v1763_v38 = vadd.f32 %v1762_v28, %v4735_v39  ;;  %v1954_v57 = vpop.f32.mrf.mxu3 }
 0x301   : > { %v4975_v27 = vadd.f32 %v1954_v57, %v1890_v5  ;;  %v1827_v9 = vpop.f32.mrf.mxu1 }
 0x302   : > { %v1828_v32 = vadd.f32 %v1827_v9, %v1763_v38  ;;  %2021 = vmatmul.f32.gmra.mxu0 %v2624_v55  ;;  %2151 = vmatmul.f32.gmra.mxu2 %v4715_v2  ;;  %v2626_v2 = vld [vmem:[%s2969_s20 + $0x160] sm:$0xff] }
 0x304   : > { %2273 = vst [vmem:[%s3767_s4 + $0xd0] sm:$0xff] %v1828_v32  ;;  %2086 = vmatmul.f32.gmra.mxu1 %v2625_v61 }
 0x305   : > { %2455 = vmatmul.msk.f32.gmra.mxu3 %vm625_vm1, %v4723_v60  ;;  %v1892_v4 = vpop.f32.mrf.mxu2  ;;  %v2627_v60 = vld [vmem:[%s2969_s20 + $0x168] sm:$0xff] }
 0x306   : > { %v1893_v39 = vadd.f32 %v1892_v4, %v4917_v58 }
 0x307   : > { %v1765_v13 = vpop.f32.mrf.mxu0 }
 0x308   : > { %v1766_v21 = vadd.f32 %v1765_v13, %v4761_v8  ;;  %v1957_v22 = vpop.f32.mrf.mxu3 }
 0x309   : > { %v4985_v49 = vadd.f32 %v1957_v22, %v1893_v39  ;;  %v1830_v63 = vpop.f32.mrf.mxu1 }
 0x30a   : > { %v1831_v51 = vadd.f32 %v1830_v63, %v1766_v21  ;;  %2024 = vmatmul.f32.gmra.mxu0 %v2626_v2  ;;  %2154 = vmatmul.f32.gmra.mxu2 %v4738_v62  ;;  %v2628_v62 = vld [vmem:[%s2969_s20 + $0x190] sm:$0xff] }
 0x30c   : > { %2277 = vst [vmem:[%s3767_s4 + $0xf0] sm:$0xff] %v1831_v51  ;;  %2089 = vmatmul.f32.gmra.mxu1 %v2627_v60 }
 0x30d   : > { %2456 = vmatmul.msk.f32.gmra.mxu3 %vm625_vm1, %v4749_v16  ;;  %v1895_v19 = vpop.f32.mrf.mxu2  ;;  %v2629_v16 = vld [vmem:[%s2969_s20 + $0x198] sm:$0xff] }
 0x30e   : > { %v1896_v8 = vadd.f32 %v1895_v19, %v4917_v58 }
 0x30f   : > { %v1768_v53 = vpop.f32.mrf.mxu0 }
 0x310   : > { %v1769_v10 = vadd.f32 %v1768_v53, %v4784_v12  ;;  %v1960_v7 = vpop.f32.mrf.mxu3 }
 0x311   : > { %v4995_v29 = vadd.f32 %v1960_v7, %v1896_v8  ;;  %v1833_v6 = vpop.f32.mrf.mxu1 }
 0x312   : > { %v1834_v35 = vadd.f32 %v1833_v6, %v1769_v10  ;;  %2027 = vmatmul.f32.gmra.mxu0 %v2628_v62  ;;  %2157 = vmatmul.f32.gmra.mxu2 %v4764_v33  ;;  %v2630_v33 = vld [vmem:[%s2969_s20 + $0x1c0] sm:$0xff] }
 0x314   : > { %2281 = vst [vmem:[%s3767_s4 + $0x110] sm:$0xff] %v1834_v35  ;;  %2092 = vmatmul.f32.gmra.mxu1 %v2629_v16 }
 0x315   : > { %2457 = vmatmul.msk.f32.gmra.mxu3 %vm625_vm1, %v4772_v26  ;;  %v1898_v20 = vpop.f32.mrf.mxu2  ;;  %v2631_v26 = vld [vmem:[%s2969_s20 + $0x1c8] sm:$0xff] }
 0x316   : > { %v1899_v12 = vadd.f32 %v1898_v20, %v4917_v58 }
 0x317   : > { %v1771_v0 = vpop.f32.mrf.mxu0 }
 0x318   : > { %v1772_v25 = vadd.f32 %v1771_v0, %v4807_v14  ;;  %v1963_v56 = vpop.f32.mrf.mxu3 }
 0x319   : > { %v5005_v43 = vadd.f32 %v1963_v56, %v1899_v12  ;;  %v1836_v5 = vpop.f32.mrf.mxu1 }
 0x31a   : > { %v1837_v28 = vadd.f32 %v1836_v5, %v1772_v25  ;;  %2030 = vmatmul.f32.gmra.mxu0 %v2630_v33  ;;  %2160 = vmatmul.f32.gmra.mxu2 %v4787_v18  ;;  %v2632_v18 = vld [vmem:[%s2969_s20 + $0x1f0] sm:$0xff] }
 0x31c   : > { %2285 = vst [vmem:[%s3767_s4 + $0x130] sm:$0xff] %v1837_v28  ;;  %2095 = vmatmul.f32.gmra.mxu1 %v2631_v26 }
 0x31d   : > { %2458 = vmatmul.msk.f32.gmra.mxu3 %vm625_vm1, %v4795_v36  ;;  %v1901_v38 = vpop.f32.mrf.mxu2  ;;  %v2633_v36 = vld [vmem:[%s2969_s20 + $0x1f8] sm:$0xff] }
 0x31e   : > { %v1902_v14 = vadd.f32 %v1901_v38, %v4917_v58 }
 0x31f   : > { %v1774_v57 = vpop.f32.mrf.mxu0 }
 0x320   : > { %v1775_v9 = vadd.f32 %v1774_v57, %v4833_v30  ;;  %v1966_v32 = vpop.f32.mrf.mxu3 }
 0x321   : > { %v5015_v55 = vadd.f32 %v1966_v32, %v1902_v14  ;;  %v1839_v61 = vpop.f32.mrf.mxu1 }
 0x322   : > { %v1840_v4 = vadd.f32 %v1839_v61, %v1775_v9  ;;  %2033 = vmatmul.f32.gmra.mxu0 %v2632_v18  ;;  %2163 = vmatmul.f32.gmra.mxu2 %v4813_v31  ;;  %v2634_v31 = vld [vmem:[%s2969_s20 + $0x220] sm:$0xff] }
 0x324   : > { %2289 = vst [vmem:[%s3767_s4 + $0x150] sm:$0xff] %v1840_v4  ;;  %2098 = vmatmul.f32.gmra.mxu1 %v2633_v36 }
 0x325   : > { %2459 = vmatmul.msk.f32.gmra.mxu3 %vm625_vm1, %v4821_v41  ;;  %v1904_v39 = vpop.f32.mrf.mxu2  ;;  %v2635_v41 = vld [vmem:[%s2969_s20 + $0x228] sm:$0xff] }
 0x326   : > { %v1905_v30 = vadd.f32 %v1904_v39, %v4917_v58  ;;  %v2643_v39 = vld [vmem:[%s2969_s20 + $0x2e8] sm:$0xff] }
 0x327   : > { %v1777_v13 = vpop.f32.mrf.mxu0 }
 0x328   : > { %v1778_v21 = vadd.f32 %v1777_v13, %v4856_v42  ;;  %v1969_v22 = vpop.f32.mrf.mxu3 }
 0x329   : > { %v5025_v63 = vadd.f32 %v1969_v22, %v1905_v30  ;;  %v1842_v51 = vpop.f32.mrf.mxu1 }
 0x32a   : > { %v1843_v2 = vadd.f32 %v1842_v51, %v1778_v21  ;;  %2036 = vmatmul.f32.gmra.mxu0 %v2634_v31  ;;  %2166 = vmatmul.f32.gmra.mxu2 %v4836_v23  ;;  %v2636_v23 = vld [vmem:[%s2969_s20 + $0x250] sm:$0xff] }
 0x32c   : > { %2293 = vst [vmem:[%s3767_s4 + $0x170] sm:$0xff] %v1843_v2  ;;  %2101 = vmatmul.f32.gmra.mxu1 %v2635_v41 }
 0x32d   : > { %2460 = vmatmul.msk.f32.gmra.mxu3 %vm625_vm1, %v4844_v37  ;;  %v1907_v60 = vpop.f32.mrf.mxu2  ;;  %v2637_v37 = vld [vmem:[%s2969_s20 + $0x258] sm:$0xff] }
 0x32e   : > { %v1908_v42 = vadd.f32 %v1907_v60, %v4917_v58 }
 0x32f   : > { %v1780_v19 = vpop.f32.mrf.mxu0 }
 0x330   : > { %v1781_v8 = vadd.f32 %v1780_v19, %v4870_v46  ;;  %v1972_v53 = vpop.f32.mrf.mxu3 }
 0x331   : > { %v5035_v10 = vadd.f32 %v1972_v53, %v1908_v42  ;;  %v1845_v7 = vpop.f32.mrf.mxu1 }
 0x332   : > { %v1846_v6 = vadd.f32 %v1845_v7, %v1781_v8  ;;  %2039 = vmatmul.f32.gmra.mxu0 %v2636_v23  ;;  %2169 = vmatmul.f32.gmra.mxu2 %v4859_v48  ;;  %v2638_v48 = vld [vmem:[%s2969_s20 + $0x280] sm:$0xff] }
 0x334   : > { %2297 = vst [vmem:[%s3767_s4 + $0x190] sm:$0xff] %v1846_v6  ;;  %2104 = vmatmul.f32.gmra.mxu1 %v2637_v37 }
 0x335   : > { %2461 = vmatmul.msk.f32.gmra.mxu3 %vm625_vm1, %v4864_v1  ;;  %v1910_v35 = vpop.f32.mrf.mxu2  ;;  %v2639_v1 = vld [vmem:[%s2969_s20 + $0x288] sm:$0xff] }
 0x336   : > { %v1911_v46 = vadd.f32 %v1910_v35, %v4917_v58 }
 0x337   : > { %v1783_v62 = vpop.f32.mrf.mxu0 }
 0x338   : > { %v1784_v16 = vadd.f32 %v1783_v62, %v4884_v54  ;;  %v1975_v20 = vpop.f32.mrf.mxu3 }
 0x339   : > { %v5045_v12 = vadd.f32 %v1975_v20, %v1911_v46  ;;  %v1848_v0 = vpop.f32.mrf.mxu1 }
 0x33a   : > { %v1849_v25 = vadd.f32 %v1848_v0, %v1784_v16  ;;  %2042 = vmatmul.f32.gmra.mxu0 %v2638_v48  ;;  %2172 = vmatmul.f32.gmra.mxu2 %v4873_v50  ;;  %v2640_v50 = vld [vmem:[%s2969_s20 + $0x2b0] sm:$0xff] }
 0x33c   : > { %2301 = vst [vmem:[%s3767_s4 + $0x1b0] sm:$0xff] %v1849_v25  ;;  %2107 = vmatmul.f32.gmra.mxu1 %v2639_v1 }
 0x33d   : > { %2462 = vmatmul.msk.f32.gmra.mxu3 %vm625_vm1, %v4878_v3  ;;  %v1913_v56 = vpop.f32.mrf.mxu2  ;;  %v2641_v3 = vld [vmem:[%s2969_s20 + $0x2b8] sm:$0xff] }
 0x33e   : > { %v1914_v54 = vadd.f32 %v1913_v56, %v4917_v58 }
 0x33f   : > { %v1786_v5 = vpop.f32.mrf.mxu0 }
 0x340   : > { %v1787_v28 = vadd.f32 %v1786_v5, %v4898_v24  ;;  %v1978_v33 = vpop.f32.mrf.mxu3 }
 0x341   : > { %v5055_v26 = vadd.f32 %v1978_v33, %v1914_v54  ;;  %v1851_v38 = vpop.f32.mrf.mxu1 }
 0x342   : > { %v1852_v14 = vadd.f32 %v1851_v38, %v1787_v28  ;;  %2045 = vmatmul.f32.gmra.mxu0 %v2640_v50  ;;  %2175 = vmatmul.f32.gmra.mxu2 %v4887_v52  ;;  %v2642_v52 = vld [vmem:[%s2969_s20 + $0x2e0] sm:$0xff]  ;;  %s2472_s20 = sshll.u32 %s2751_s16, 9  ;;  %s2312_s16 = scalar_lea.sflag [#allocation3], %s164_s19 }
 0x343   : > { %s2324_s6 = scalar_lea.hbm %s5145_s3, %s2472_s20 }
 0x344   : > { %2305 = vst [vmem:[%s3767_s4 + $0x1d0] sm:$0xff] %v1852_v14  ;;  %2110 = vmatmul.f32.gmra.mxu1 %v2641_v3  ;;  %s2327_s8 = sshll.u32 %s2324_s6, 4  ;;  %s2328_s8 = int_to_ptr.hbm [resolvable:$true] %s2327_s8 }
 0x345   : > { %2463 = vmatmul.msk.f32.gmra.mxu3 %vm625_vm1, %v4892_v45  ;;  %v1916_v57 = vpop.f32.mrf.mxu2  ;;  %s2658_s9 = sshra.s32 %s2328_s8, 4  ;;  %s2659_s9 = int_to_ptr.hbm [resolvable:$true] %s2658_s9 }
 0x346   : > { %v1917_v24 = vadd.f32 %v1916_v57, %v4917_v58  ;;  %s2660_s10 = scalar_lea.hbm %s2659_s9, 512  ;;  %p2665_p0 = scmp.lt.s32.totalorder %s2659_s9, %s5145_s3 }
 0x347   : > { %v1789_v9 = vpop.f32.mrf.mxu0  ;;  %p2661_p11 = scmp.ne.s32.totalorder %s2659_s9, %s2660_s10  ;;  %p2666_p1 = scmp.lt.s32.totalorder %s2664_s27, %s2660_s10 }
 0x348   : > { %v1790_v32 = vadd.f32 %v1789_v9, %v4912_v40  ;;  %v1981_v61 = vpop.f32.mrf.mxu3 }
 0x349   : > { %v5065_v4 = vadd.f32 %v1981_v61, %v1917_v24  ;;  %v1854_v18 = vpop.f32.mrf.mxu1  ;;  %p2662_p12 = pnand %p2661_p11, %p2768_p5  ;;  %p2667_p2 = por %p2666_p1, %p2665_p0 }
 0x34a   : > { %v1855_v36 = vadd.f32 %v1854_v18, %v1790_v32  ;;  %2048 = vmatmul.f32.gmra.mxu0 %v2642_v52  ;;  %2178 = vmatmul.f32.gmra.mxu2 %v4901_v17 }
 0x34b   : > { %p2663_p13 = pneg %p2662_p12 }
 0x34c   : > { %2309 = vst [vmem:[%s3767_s4 + $0x1f0] sm:$0xff] %v1855_v36  ;;  %2113 = vmatmul.f32.gmra.mxu1 %v2643_v39 }
 0x34d   : > { %2464 = vmatmul.msk.f32.gmra.mxu3 %vm625_vm1, %v4906_v34  ;;  %v1919_v45 = vpop.f32.mrf.mxu2  ;;  %p2668_p3 = pnand %p2667_p2, %p2663_p13 }
 0x34e   : > { %v1920_v30 = vadd.f32 %v1919_v45, %v4917_v58 }
 0x34f   : > { %v2004_v40 = vpop.f32.mrf.mxu0 }
 0x350   : > { %v1984_v13 = vpop.f32.mrf.mxu3  ;;  %v2005_v21 = vadd.f32 %v2004_v40, %v4925_v47 }
 0x351   : > { %v5075_v22 = vadd.f32 %v1984_v13, %v1920_v30  ;;  %v2069_v51 = vpop.f32.mrf.mxu1 }
 0x352   : > { %v2070_v2 = vadd.f32 %v2069_v51, %v2005_v21 }
 0x355   : > { %v2134_v31 = vpop.f32.mrf.mxu2 }
 0x356   : > { %v2135_v17 = vadd.f32 %v2134_v31, %v2070_v2 }
 0x357   : > { %v2007_v41 = vpop.f32.mrf.mxu0 }
 0x358   : > { %v2008_v60 = vadd.f32 %v2007_v41, %v4935_v15  ;;  %v2199_v42 = vpop.f32.mrf.mxu3 }
 0x359   : > { %v2200_v34 = vadd.f32 %v2199_v42, %v2135_v17  ;;  %v2072_v19 = vpop.f32.mrf.mxu1 }
 0x35a   : > { %v2073_v8 = vadd.f32 %v2072_v19, %v2008_v60 }
 0x35b   : > { %2250 = vst [vmem:[%s3767_s4 + $0x18] sm:$0xff] %v2200_v34 }
 0x35d   : > { %v2137_v58 = vpop.f32.mrf.mxu2 }
 0x35e   : > { %v2138_v53 = vadd.f32 %v2137_v58, %v2073_v8 }
 0x35f   : > { %v2010_v7 = vpop.f32.mrf.mxu0 }
 0x360   : > { %v2011_v47 = vadd.f32 %v2010_v7, %v4945_v44  ;;  %v2202_v6 = vpop.f32.mrf.mxu3 }
 0x361   : > { %v2203_v23 = vadd.f32 %v2202_v6, %v2138_v53  ;;  %v2075_v37 = vpop.f32.mrf.mxu1 }
 0x362   : > { %v2076_v35 = vadd.f32 %v2075_v37, %v2011_v47 }
 0x363   : > { %2254 = vst [vmem:[%s3767_s4 + $0x38] sm:$0xff] %v2203_v23 }
 0x365   : > { %v2140_v46 = vpop.f32.mrf.mxu2 }
 0x366   : > { %v2141_v62 = vadd.f32 %v2140_v46, %v2076_v35 }
 0x367   : > { %v2013_v15 = vpop.f32.mrf.mxu0 }
 0x368   : > { %v2014_v16 = vadd.f32 %v2013_v15, %v4955_v11  ;;  %v2205_v20 = vpop.f32.mrf.mxu3 }
 0x369   : > { %v2206_v0 = vadd.f32 %v2205_v20, %v2141_v62  ;;  %v2078_v25 = vpop.f32.mrf.mxu1 }
 0x36a   : > { %v2079_v48 = vadd.f32 %v2078_v25, %v2014_v16 }
 0x36b   : > { %2258 = vst [vmem:[%s3767_s4 + $0x58] sm:$0xff] %v2206_v0 }
 0x36d   : > { %v2143_v1 = vpop.f32.mrf.mxu2 }
 0x36e   : > { %v2144_v56 = vadd.f32 %v2143_v1, %v2079_v48 }
 0x36f   : > { %v2016_v44 = vpop.f32.mrf.mxu0 }
 0x370   : > { %v2017_v54 = vadd.f32 %v2016_v44, %v4965_v59  ;;  %v2208_v5 = vpop.f32.mrf.mxu3 }
 0x371   : > { %v2209_v28 = vadd.f32 %v2208_v5, %v2144_v56  ;;  %v2081_v33 = vpop.f32.mrf.mxu1 }
 0x372   : > { %v2082_v38 = vadd.f32 %v2081_v33, %v2017_v54 }
 0x373   : > { %2262 = vst [vmem:[%s3767_s4 + $0x78] sm:$0xff] %v2209_v28 }
 0x375   : > { %v2146_v14 = vpop.f32.mrf.mxu2 }
 0x376   : > { %v2147_v50 = vadd.f32 %v2146_v14, %v2082_v38 }
 0x377   : > { %v2019_v11 = vpop.f32.mrf.mxu0 }
 0x378   : > { %v2020_v3 = vadd.f32 %v2019_v11, %v4975_v27  ;;  %v2211_v57 = vpop.f32.mrf.mxu3 }
 0x379   : > { %v2212_v24 = vadd.f32 %v2211_v57, %v2147_v50  ;;  %v2084_v9 = vpop.f32.mrf.mxu1 }
 0x37a   : > { %v2085_v32 = vadd.f32 %v2084_v9, %v2020_v3 }
 0x37b   : > { %2266 = vst [vmem:[%s3767_s4 + $0x98] sm:$0xff] %v2212_v24 }
 0x37d   : > { %v2149_v61 = vpop.f32.mrf.mxu2 }
 0x37e   : > { %v2150_v18 = vadd.f32 %v2149_v61, %v2085_v32 }
 0x37f   : > { %v2022_v59 = vpop.f32.mrf.mxu0 }
 0x380   : > { %v2023_v36 = vadd.f32 %v2022_v59, %v4985_v49  ;;  %v2214_v52 = vpop.f32.mrf.mxu3 }
 0x381   : > { %v2215_v39 = vadd.f32 %v2214_v52, %v2150_v18  ;;  %v2087_v45 = vpop.f32.mrf.mxu1 }
 0x382   : > { %v2088_v30 = vadd.f32 %v2087_v45, %v2023_v36 }
 0x383   : > { %2270 = vst [vmem:[%s3767_s4 + $0xb8] sm:$0xff] %v2215_v39 }
 0x385   : > { %v2152_v40 = vpop.f32.mrf.mxu2 }
 0x386   : > { %v2153_v13 = vadd.f32 %v2152_v40, %v2088_v30 }
 0x387   : > { %v2025_v27 = vpop.f32.mrf.mxu0 }
 0x388   : > { %v2026_v21 = vadd.f32 %v2025_v27, %v4995_v29  ;;  %v2217_v51 = vpop.f32.mrf.mxu3 }
 0x389   : > { %v2218_v2 = vadd.f32 %v2217_v51, %v2153_v13  ;;  %v2090_v31 = vpop.f32.mrf.mxu1 }
 0x38a   : > { %v2091_v17 = vadd.f32 %v2090_v31, %v2026_v21 }
 0x38b   : > { %2274 = vst [vmem:[%s3767_s4 + $0xd8] sm:$0xff] %v2218_v2 }
 0x38d   : > { %v2155_v41 = vpop.f32.mrf.mxu2 }
 0x38e   : > { %v2156_v60 = vadd.f32 %v2155_v41, %v2091_v17 }
 0x38f   : > { %v2028_v49 = vpop.f32.mrf.mxu0 }
 0x390   : > { %v2029_v42 = vadd.f32 %v2028_v49, %v5005_v43  ;;  %v2220_v34 = vpop.f32.mrf.mxu3 }
 0x391   : > { %v2221_v19 = vadd.f32 %v2220_v34, %v2156_v60  ;;  %v2093_v8 = vpop.f32.mrf.mxu1 }
 0x392   : > { %v2094_v58 = vadd.f32 %v2093_v8, %v2029_v42 }
 0x393   : > { %2278 = vst [vmem:[%s3767_s4 + $0xf8] sm:$0xff] %v2221_v19 }
 0x395   : > { %v2158_v53 = vpop.f32.mrf.mxu2 }
 0x396   : > { %v2159_v7 = vadd.f32 %v2158_v53, %v2094_v58 }
 0x397   : > { %v2031_v29 = vpop.f32.mrf.mxu0 }
 0x398   : > { %v2032_v47 = vadd.f32 %v2031_v29, %v5015_v55  ;;  %v2223_v6 = vpop.f32.mrf.mxu3 }
 0x399   : > { %v2224_v23 = vadd.f32 %v2223_v6, %v2159_v7  ;;  %v2096_v37 = vpop.f32.mrf.mxu1 }
 0x39a   : > { %v2097_v35 = vadd.f32 %v2096_v37, %v2032_v47 }
 0x39b   : > { %2282 = vst [vmem:[%s3767_s4 + $0x118] sm:$0xff] %v2224_v23 }
 0x39d   : > { %v2161_v46 = vpop.f32.mrf.mxu2 }
 0x39e   : > { %v2162_v62 = vadd.f32 %v2161_v46, %v2097_v35 }
 0x39f   : > { %v2034_v43 = vpop.f32.mrf.mxu0 }
 0x3a0   : > { %v2035_v15 = vadd.f32 %v2034_v43, %v5025_v63  ;;  %v2226_v16 = vpop.f32.mrf.mxu3 }
 0x3a1   : > { %v2227_v20 = vadd.f32 %v2226_v16, %v2162_v62  ;;  %v2099_v0 = vpop.f32.mrf.mxu1 }
 0x3a2   : > { %v2100_v25 = vadd.f32 %v2099_v0, %v2035_v15 }
 0x3a3   : > { %2286 = vst [vmem:[%s3767_s4 + $0x138] sm:$0xff] %v2227_v20 }
 0x3a5   : > { %v2164_v48 = vpop.f32.mrf.mxu2 }
 0x3a6   : > { %v2165_v1 = vadd.f32 %v2164_v48, %v2100_v25 }
 0x3a7   : > { %v2037_v55 = vpop.f32.mrf.mxu0 }
 0x3a8   : > { %v2038_v56 = vadd.f32 %v2037_v55, %v5035_v10  ;;  %v2229_v44 = vpop.f32.mrf.mxu3 }
 0x3a9   : > { %v2230_v54 = vadd.f32 %v2229_v44, %v2165_v1  ;;  %v2102_v5 = vpop.f32.mrf.mxu1 }
 0x3aa   : > { %v2103_v28 = vadd.f32 %v2102_v5, %v2038_v56 }
 0x3ab   : > { %2290 = vst [vmem:[%s3767_s4 + $0x158] sm:$0xff] %v2230_v54 }
 0x3ad   : > { %v2167_v33 = vpop.f32.mrf.mxu2 }
 0x3ae   : > { %v2168_v38 = vadd.f32 %v2167_v33, %v2103_v28 }
 0x3af   : > { %v2040_v63 = vpop.f32.mrf.mxu0 }
 0x3b0   : > { %v2041_v14 = vadd.f32 %v2040_v63, %v5045_v12  ;;  %v2232_v50 = vpop.f32.mrf.mxu3 }
 0x3b1   : > { %v2233_v11 = vadd.f32 %v2232_v50, %v2168_v38  ;;  %v2105_v3 = vpop.f32.mrf.mxu1 }
 0x3b2   : > { %v2106_v57 = vadd.f32 %v2105_v3, %v2041_v14 }
 0x3b3   : > { %2294 = vst [vmem:[%s3767_s4 + $0x178] sm:$0xff] %v2233_v11 }
 0x3b5   : > { %v2170_v24 = vpop.f32.mrf.mxu2 }
 0x3b6   : > { %v2171_v9 = vadd.f32 %v2170_v24, %v2106_v57 }
 0x3b7   : > { %v2043_v10 = vpop.f32.mrf.mxu0 }
 0x3b8   : > { %v2044_v32 = vadd.f32 %v2043_v10, %v5055_v26  ;;  %v2235_v61 = vpop.f32.mrf.mxu3 }
 0x3b9   : > { %v2236_v18 = vadd.f32 %v2235_v61, %v2171_v9  ;;  %v2108_v59 = vpop.f32.mrf.mxu1 }
 0x3ba   : > { %v2109_v36 = vadd.f32 %v2108_v59, %v2044_v32 }
 0x3bb   : > { %2298 = vst [vmem:[%s3767_s4 + $0x198] sm:$0xff] %v2236_v18 }
 0x3bd   : > { %v2173_v52 = vpop.f32.mrf.mxu2 }
 0x3be   : > { %v2174_v39 = vadd.f32 %v2173_v52, %v2109_v36 }
 0x3bf   : > { %v2046_v12 = vpop.f32.mrf.mxu0 }
 0x3c0   : > { %v2047_v45 = vadd.f32 %v2046_v12, %v5065_v4  ;;  %v2238_v30 = vpop.f32.mrf.mxu3 }
 0x3c1   : > { %v2239_v40 = vadd.f32 %v2238_v30, %v2174_v39  ;;  %v2111_v13 = vpop.f32.mrf.mxu1 }
 0x3c2   : > { %v2112_v27 = vadd.f32 %v2111_v13, %v2047_v45 }
 0x3c3   : > { %2302 = vst [vmem:[%s3767_s4 + $0x1b8] sm:$0xff] %v2239_v40 }
 0x3c5   : > { %v2176_v21 = vpop.f32.mrf.mxu2 }
 0x3c6   : > { %v2177_v26 = vadd.f32 %v2176_v21, %v2112_v27 }
 0x3c7   : > { %v2049_v51 = vpop.f32.mrf.mxu0 }
 0x3c8   : > { %v2050_v2 = vadd.f32 %v2049_v51, %v5075_v22  ;;  %v2241_v31 = vpop.f32.mrf.mxu3 }
 0x3c9   : > { %v2242_v17 = vadd.f32 %v2241_v31, %v2177_v26  ;;  %v2114_v41 = vpop.f32.mrf.mxu1 }
 0x3ca   : > { %v2115_v4 = vadd.f32 %v2114_v41, %v2050_v2 }
 0x3cb   : > { %2306 = vst [vmem:[%s3767_s4 + $0x1d8] sm:$0xff] %v2242_v17 }
 0x3cd   : > { %v2179_v60 = vpop.f32.mrf.mxu2 }
 0x3ce   : > { %v2180_v49 = vadd.f32 %v2179_v60, %v2115_v4 }
 0x3d0   : > { %v2244_v42 = vpop.f32.mrf.mxu3 }
 0x3d1   : > { %v2245_v34 = vadd.f32 %v2244_v42, %v2180_v49 }
 0x3d3   : > { %2310 = vst [vmem:[%s3767_s4 + $0x1f8] sm:$0xff] %v2245_v34 }
 0x3d4   : > { %2671 = shalt.err (!%p2668_p3)
}
 0x3d5   : > { %s2708_s19 = smov 512   ;;  %s2709_s4 = smov 32  }
 0x3d6   : > { %2474 = dma.vmem_to_hbm [thread:$0]  (%p2768_p5), %s2326_s7, 8192, %s2328_s8, %s2312_s16, %s2708_s19, %s2708_s19, %s2709_s4  }
 0x3d7 PF: > { %p2480_p4 = scmp.ge.s32.totalorder %s2706_s15, 2  ;;  %s2342_s29 = sand.u32 1, %s2694_s12  }
 0x3d8   : > { %s2343_s11 = scalar_lea.sflag [#allocation3], %s2342_s29 }
 0x3d9   : > { %p2477_p7 = pnand %p2480_p4, %p2772_p6 }
 0x3db   : > { %p2478_p8 = pneg %p2477_p7 }
 0x3dd   : > { %2689 = dma.done.wait (%p2478_p8), %s2343_s11, 8192  }
 0x3de   : > { %2691 = vsyncadd (%p2478_p8), %s2343_s11, 4294959104  ;;  %p13_p9 = scmp.ge.s32.totalorder %s2755_s18, 6   ;;  %s5149_s12 = smov %s2698_s13 }
 0x3df   : > { %s5150_s13 = smov %s2702_s14  ;;  %s5151_s14 = smov %s2766_s21 }
 0x3e0   : > { %s5152_s15 = smov %s2755_s18  ;;  %15 = sbr.rel (!%p13_p9) target bundleno = 3 (0x3), region = 67 }
 0x3e5   :  { %2349 = vsyncpa [#allocation3], 1 }
 0x3e6   :  { %2351 = vsyncpa [#allocation3 + $0x1], 1 }

</bundles_post_ra>
